<compile_context>
chip_gen: v6e
topology: v6e:2x2x1
jax: 0.10.0
libtpu: 0.0.40
codegen_flags: <defaults>
</compile_context>

<pallas_src>
import jax
import jax.numpy as jnp
import numpy as np
from jax.experimental import pallas as pl
from jax.experimental.pallas import tpu as pltpu


# ---------------------------------------------------------------------------
# Problem sizes (small, consistent with the module's forward)
# ---------------------------------------------------------------------------
B = 2          # batch
P = 8          # paragraph_len
Q = 8          # question_len
HP_IN = 32     # hp_input_size
HQ_IN = 32     # hq_input_size
H = 32         # hidden_size
RNN_IN = HP_IN + HQ_IN  # 64


# ---------------------------------------------------------------------------
# Pallas kernel: the full Match-LSTM recurrence in one invocation (grid=()).
# ---------------------------------------------------------------------------
def uni_match_rnn_kernel(
    # inputs (all full arrays resident in VMEM)
    hp_ref,        # (B, P, HP_IN) paragraph encoding (batch-major, as given)
    hq_ref,        # (B, Q, HQ_IN) full question encoding
    mask_ref,      # (B, Q)        question mask (float32)
    wq_ref,        # (HQ_IN, H)
    b_attn_ref,    # (1, H)        = bq + bp + br (folded attention bias)
    w_hp_ref,      # (HP_IN, H+RNN_IN) = [Wp | Wgate_p]  (fused Hp weights)
    bgate_ref,     # (1, RNN_IN)
    wg_ref,        # (1, H)        linear_wg: H -> 1
    bg_ref,        # (1, 1)
    w_h_ref,       # (H, 5H)       = [Whh_scaled | Wr]   (fused, 4H lane-aligned)
    wgate_q_ref,   # (HQ_IN, RNN_IN)   (q_alpha half of gated_linear)
    wih_ref,       # (RNN_IN, 4H)      (g-gate columns pre-scaled by 2)
    b_lstm_ref,    # (1, 4H)       = (bih + bhh), g-gate cols pre-scaled by 2
    # output
    hr_ref,        # (B, P*H)      lane-dense output slab
):
    f32 = jnp.float32
    hq = hq_ref[...]                     # (B, Q, HQ_IN)
    mask = mask_ref[...]                 # (B, Q)
    hp = hp_ref[...]                     # (B, P, HP_IN)

    # ---- loop-invariant precompute (hoisted out of the recurrence) ----
    # Wq @ Hq with all attention biases folded in.
    wqhq = (jnp.dot(hq.reshape(B * Q, HQ_IN), wq_ref[...],
                    preferred_element_type=f32).reshape(B, Q, H)
            + b_attn_ref[...])                                  # (B, Q, H)
    # One matmul covers Wp@Hp and the Hp-half of the gate pre-activation
    # for all P steps (leading-dim collapse only; no transpose needed).
    hp_pre = jnp.dot(hp.reshape(B * P, HP_IN), w_hp_ref[...],
                     preferred_element_type=f32
                     ).reshape(B, P, H + RNN_IN)                # (B, P, H+RNN_IN)
    wp_hp_all = hp_pre[:, :, :H]                                # (B, P, H)
    gate_hp_all = hp_pre[:, :, H:] + bgate_ref[...]             # (B, P, RNN_IN)

    # Hoisted broadcasts / weight loads (JAX does not CSE broadcast_in_dim).
    wg_b = jnp.broadcast_to(wg_ref[...].reshape(1, 1, H), (B, Q, H))
    bg = bg_ref[0, 0]
    w_h = w_h_ref[...]
    wgate_q = wgate_q_ref[...]
    wih = wih_ref[...]
    b_lstm = b_lstm_ref[...]

    h = jnp.zeros((B, H), f32)
    c = jnp.zeros((B, H), f32)

    # Fully unrolled static loop over the P=8 time steps (constant offsets).
    for t in range(P):
        hpi = hp[:, t, :]                            # (B, HP_IN)
        wp_hp = wp_hp_all[:, t, :]                   # (B, H)
        gate_hp = gate_hp_all[:, t, :]               # (B, RNN_IN)

        # Fused same-LHS matmul: h_prev @ [Whh_scaled | Wr]
        h_pre = jnp.dot(h, w_h, preferred_element_type=f32)     # (B, 5H)
        whh_h = h_pre[:, :4 * H]                     # (B, 4H) — one full vreg
        wr_hr = h_pre[:, 4 * H:]                     # (B, H)

        # ---- MatchLSTMAttention ----
        G = jnp.tanh(wqhq + (wp_hp + wr_hr)[:, None, :])        # (B, Q, H)
        logits = jnp.sum(G * wg_b, axis=-1) + bg                # (B, Q)

        # masked_softmax (x*m; exp(x - max); *m; normalize with +1e-6)
        x = logits * mask
        e_x = jnp.exp(x - jnp.max(x, axis=1, keepdims=True)) * mask
        denom = jnp.sum(e_x, axis=1, keepdims=True) + 1e-6
        alpha = e_x / denom                                     # exact recip

        # question_alpha = bmm(alpha.unsqueeze(1), Hq).squeeze(1)
        q_alpha = jnp.sum(alpha[:, :, None] * hq, axis=1)       # (B, HQ_IN)

        # ---- gated attention ----
        gate = jax.nn.sigmoid(
            gate_hp + jnp.dot(q_alpha, wgate_q,
                              preferred_element_type=f32))      # (B, RNN_IN)
        zi = gate * jnp.concatenate([hpi, q_alpha], axis=1)     # (B, RNN_IN)

        # ---- LSTMCell (PyTorch gate order: i, f, g, o), one fused matmul.
        # g-gate columns were pre-scaled by 2, so one full-width sigmoid
        # covers all gates: tanh(x) = 2*sigmoid(2x) - 1.
        gates = whh_h + b_lstm + jnp.dot(zi, wih,
                                         preferred_element_type=f32)  # (B, 4H)
        s = jax.nn.sigmoid(gates)                    # single 128-lane EUP pass
        i_g = s[:, 0 * H:1 * H]
        f_g = s[:, 1 * H:2 * H]
        g_g = 2.0 * s[:, 2 * H:3 * H] - 1.0
        o_g = s[:, 3 * H:4 * H]
        c = f_g * c + i_g * g_g
        h = o_g * jnp.tanh(c)

        # Per-step store at lane offset t*H (idle store slot, overlaps compute).
        hr_ref[:, t * H:(t + 1) * H] = h.astype(hr_ref.dtype)


# ---------------------------------------------------------------------------
# One-time parameter preparation (NOT on the per-call hot path)
# ---------------------------------------------------------------------------
def prepare_params(p):
    """Fuse / split / fold weights once at init time."""
    # Pre-scale the g-gate (cell-input) columns by 2 so a single full-width
    # sigmoid recovers tanh inside the kernel.
    scale = jnp.concatenate([
        jnp.ones((2 * H,), jnp.float32),
        2.0 * jnp.ones((H,), jnp.float32),
        jnp.ones((H,), jnp.float32),
    ])[None, :]                                           # (1, 4H)
    wih_s = p["wih"] * scale
    whh_s = p["whh"] * scale
    b_lstm = (p["bih"] + p["bhh"]) * scale
    return {
        "wq": p["wq"],
        "b_attn": p["bq"] + p["bp"] + p["br"],
        "w_hp": jnp.concatenate([p["wp"], p["wgate"][:HP_IN, :]], axis=1),
        "bgate": p["bgate"],
        "wg": p["wg"],
        "bg": p["bg"],
        "w_h": jnp.concatenate([whh_s, p["wr"]], axis=1),   # [Whh | Wr], 4H aligned
        "wgate_q": p["wgate"][HP_IN:, :],
        "wih": wih_s,
        "b_lstm": b_lstm,
    }


# ---------------------------------------------------------------------------
# Wrapper (per-call hot path: just the pallas_call + a free reshape)
# ---------------------------------------------------------------------------
@jax.jit
def uni_match_rnn(Hp, Hq, Hq_mask, prep):
    """Hp: (B,P,HP_IN), Hq: (B,Q,HQ_IN), Hq_mask: (B,Q) -> Hr (B,P,H)."""
    vmem = pl.BlockSpec(memory_space=pltpu.MemorySpace.VMEM)
    hr_flat = pl.pallas_call(
        uni_match_rnn_kernel,
        out_shape=jax.ShapeDtypeStruct((B, P * H), jnp.float32),
        in_specs=[vmem] * 13,
        out_specs=vmem,
    )(
        Hp, Hq, Hq_mask,
        prep["wq"], prep["b_attn"],
        prep["w_hp"], prep["bgate"],
        prep["wg"], prep["bg"],
        prep["w_h"], prep["wgate_q"],
        prep["wih"], prep["b_lstm"],
    )
    return hr_flat.reshape(B, P, H)


# ---------------------------------------------------------------------------
# Pure-JAX reference (same math as the PyTorch module, for correctness check)
# ---------------------------------------------------------------------------
def uni_match_rnn_ref(Hp, Hq, Hq_mask, p):
    h = jnp.zeros((B, H), jnp.float32)
    c = jnp.zeros((B, H), jnp.float32)
    wqhq = jnp.einsum("bqd,dh->bqh", Hq, p["wq"]) + p["bq"]
    outs = []
    for t in range(P):
        hpi = Hp[:, t, :]
        wp_hp = hpi @ p["wp"] + p["bp"]
        wr_hr = h @ p["wr"] + p["br"]
        G = jnp.tanh(wqhq + (wp_hp + wr_hr)[:, None, :])
        wg_g = jnp.sum(G * p["wg"][None, :, :], axis=-1) + p["bg"][0, 0]
        m = Hq_mask
        x = wg_g * m
        e_x = jnp.exp(x - jnp.max(x, axis=1, keepdims=True)) * m
        alpha = e_x / (jnp.sum(e_x, axis=1, keepdims=True) + 1e-6)
        qa = jnp.einsum("bq,bqd->bd", alpha, Hq)
        zi = jnp.concatenate([hpi, qa], axis=1)
        gate = jax.nn.sigmoid(zi @ p["wgate"] + p["bgate"])
        zi = gate * zi
        gates = zi @ p["wih"] + p["bih"] + h @ p["whh"] + p["bhh"]
        i_g = jax.nn.sigmoid(gates[:, 0 * H:1 * H])
        f_g = jax.nn.sigmoid(gates[:, 1 * H:2 * H])
        g_g = jnp.tanh(gates[:, 2 * H:3 * H])
        o_g = jax.nn.sigmoid(gates[:, 3 * H:4 * H])
        c = f_g * c + i_g * g_g
        h = o_g * jnp.tanh(c)
        outs.append(h)
    return jnp.stack(outs, axis=1)


# ---------------------------------------------------------------------------
# Deterministic parameter construction (shapes per module __init__;
# all biases zero, mirroring reset_parameters' constant_(b, 0)).
# ---------------------------------------------------------------------------
def make_params(key):
    ks = jax.random.split(key, 8)
    u = lambda k, shape, s: jax.random.uniform(k, shape, jnp.float32, -s, s)
    params = {
        # attention linears, stored pre-transposed (in, out)
        "wq": u(ks[0], (HQ_IN, H), 0.15),
        "bq": jnp.zeros((1, H), jnp.float32),
        "wp": u(ks[1], (HP_IN, H), 0.15),
        "bp": jnp.zeros((1, H), jnp.float32),
        "wr": u(ks[2], (H, H), 0.15),
        "br": jnp.zeros((1, H), jnp.float32),
        "wg": u(ks[3], (1, H), 0.15),            # linear_wg: H -> 1 (kept as (1,H))
        "bg": jnp.zeros((1, 1), jnp.float32),
        # gated attention linear
        "wgate": u(ks[4], (RNN_IN, RNN_IN), 0.1),
        "bgate": jnp.zeros((1, RNN_IN), jnp.float32),
        # LSTMCell
        "wih": u(ks[5], (RNN_IN, 4 * H), 0.1),
        "whh": u(ks[6], (H, 4 * H), 0.1),
        "bih": jnp.zeros((1, 4 * H), jnp.float32),
        "bhh": jnp.zeros((1, 4 * H), jnp.float32),
    }
    return params
    # TODO(synk): enable_layer_norm=True and GRU network_mode branches not
    # implemented (configuration reproduced uses LSTM + layer_norm=False).


# ---------------------------------------------------------------------------
if __name__ == "__main__":
    key = jax.random.PRNGKey(0)
    k_hp, k_hq, k_par = jax.random.split(key, 3)

    Hp = jax.random.normal(k_hp, (B, P, HP_IN), jnp.float32)
    Hq = jax.random.normal(k_hq, (B, Q, HQ_IN), jnp.float32)
    # mask: batch 0 fully valid, batch 1 only first 5 question tokens valid
    Hq_mask = jnp.stack([
        jnp.ones((Q,), jnp.float32),
        jnp.concatenate([jnp.ones((5,), jnp.float32), jnp.zeros((3,), jnp.float32)]),
    ], axis=0)

    params = make_params(k_par)
    # One-time weight fusion (parameter-init time, NOT per call).
    prep = jax.block_until_ready(prepare_params(params))

    out = uni_match_rnn(Hp, Hq, Hq_mask, prep)
    out = jax.block_until_ready(out)

    ref = uni_match_rnn_ref(Hp, Hq, Hq_mask, params)
    # Exact reciprocal is now used; remaining slack covers default-precision
    # MXU matmuls and the fused-weight summation reordering accumulated over
    # the 8 recurrent steps.  A wiring bug would be orders of magnitude worse.
    np.testing.assert_allclose(np.asarray(out), np.asarray(ref),
                               rtol=2e-3, atol=2e-3)

    print("KERNEL_OK")
</pallas_src>

<mosaic_0001>
module attributes {stable_mosaic.version = 11 : i64} {
  func.func @uni_match_rnn_kernel(%arg0: memref<2x8x32xf32, #tpu.memory_space<vmem>>, %arg1: memref<2x8x32xf32, #tpu.memory_space<vmem>>, %arg2: memref<2x8xf32, #tpu.memory_space<vmem>>, %arg3: memref<32x32xf32, #tpu.memory_space<vmem>>, %arg4: memref<1x32xf32, #tpu.memory_space<vmem>>, %arg5: memref<32x96xf32, #tpu.memory_space<vmem>>, %arg6: memref<1x64xf32, #tpu.memory_space<vmem>>, %arg7: memref<1x32xf32, #tpu.memory_space<vmem>>, %arg8: memref<1x1xf32, #tpu.memory_space<vmem>>, %arg9: memref<32x160xf32, #tpu.memory_space<vmem>>, %arg10: memref<32x64xf32, #tpu.memory_space<vmem>>, %arg11: memref<64x128xf32, #tpu.memory_space<vmem>>, %arg12: memref<1x128xf32, #tpu.memory_space<vmem>>, %arg13: memref<2x256xf32, #tpu.memory_space<vmem>>) attributes {dimension_semantics = [], scalar_prefetch = 0 : i64, scratch_operands = 0 : i64, tpu.core_type = #tpu.core_type<tc>} {
    %c0 = arith.constant 0 : index
    %c0_0 = arith.constant 0 : index
    %c0_1 = arith.constant 0 : index
    %0 = vector.load %arg1[%c0, %c0_0, %c0_1] : memref<2x8x32xf32, #tpu.memory_space<vmem>>, vector<2x8x32xf32>
    %c0_2 = arith.constant 0 : index
    %c0_3 = arith.constant 0 : index
    %1 = vector.load %arg2[%c0_2, %c0_3] : memref<2x8xf32, #tpu.memory_space<vmem>>, vector<2x8xf32>
    %c0_4 = arith.constant 0 : index
    %c0_5 = arith.constant 0 : index
    %c0_6 = arith.constant 0 : index
    %2 = vector.load %arg0[%c0_4, %c0_5, %c0_6] : memref<2x8x32xf32, #tpu.memory_space<vmem>>, vector<2x8x32xf32>
    %3 = vector.shape_cast %0 : vector<2x8x32xf32> to vector<16x32xf32>
    %c0_7 = arith.constant 0 : index
    %c0_8 = arith.constant 0 : index
    %4 = vector.load %arg3[%c0_7, %c0_8] : memref<32x32xf32, #tpu.memory_space<vmem>>, vector<32x32xf32>
    %cst = arith.constant dense<0.000000e+00> : vector<16x32xf32>
    %5 = tpu.matmul %3, %4, %cst {dimension_numbers = #tpu.dot_dimension_numbers<[1], [0], [0], [1], [0, 0, 1, 1], [], []>} : vector<16x32xf32>, vector<32x32xf32>, vector<16x32xf32> -> vector<16x32xf32>
    %6 = vector.shape_cast %5 : vector<16x32xf32> to vector<2x8x32xf32>
    %c0_9 = arith.constant 0 : index
    %c0_10 = arith.constant 0 : index
    %7 = vector.load %arg4[%c0_9, %c0_10] : memref<1x32xf32, #tpu.memory_space<vmem>>, vector<1x32xf32>
    %8 = vector.shape_cast %7 : vector<1x32xf32> to vector<1x1x32xf32>
    %9 = vector.broadcast %8 : vector<1x1x32xf32> to vector<2x8x32xf32>
    %10 = arith.addf %6, %9 : vector<2x8x32xf32>
    %11 = vector.shape_cast %2 : vector<2x8x32xf32> to vector<16x32xf32>
    %c0_11 = arith.constant 0 : index
    %c0_12 = arith.constant 0 : index
    %12 = vector.load %arg5[%c0_11, %c0_12] : memref<32x96xf32, #tpu.memory_space<vmem>>, vector<32x96xf32>
    %cst_13 = arith.constant dense<0.000000e+00> : vector<16x96xf32>
    %13 = tpu.matmul %11, %12, %cst_13 {dimension_numbers = #tpu.dot_dimension_numbers<[1], [0], [0], [1], [0, 0, 1, 1], [], []>} : vector<16x32xf32>, vector<32x96xf32>, vector<16x96xf32> -> vector<16x96xf32>
    %14 = vector.shape_cast %13 : vector<16x96xf32> to vector<2x8x96xf32>
    %15 = vector.extract_strided_slice %14 {offsets = [0, 0, 0], sizes = [2, 8, 32], strides = [1, 1, 1]} : vector<2x8x96xf32> to vector<2x8x32xf32>
    %16 = vector.extract_strided_slice %14 {offsets = [0, 0, 32], sizes = [2, 8, 64], strides = [1, 1, 1]} : vector<2x8x96xf32> to vector<2x8x64xf32>
    %c0_14 = arith.constant 0 : index
    %c0_15 = arith.constant 0 : index
    %17 = vector.load %arg6[%c0_14, %c0_15] : memref<1x64xf32, #tpu.memory_space<vmem>>, vector<1x64xf32>
    %18 = vector.shape_cast %17 : vector<1x64xf32> to vector<1x1x64xf32>
    %19 = vector.broadcast %18 : vector<1x1x64xf32> to vector<2x8x64xf32>
    %20 = arith.addf %16, %19 : vector<2x8x64xf32>
    %c0_16 = arith.constant 0 : index
    %c0_17 = arith.constant 0 : index
    %21 = vector.load %arg7[%c0_16, %c0_17] : memref<1x32xf32, #tpu.memory_space<vmem>>, vector<1x32xf32>
    %22 = vector.shape_cast %21 : vector<1x32xf32> to vector<1x1x32xf32>
    %23 = vector.shape_cast %22 : vector<1x1x32xf32> to vector<1x1x32xf32>
    %24 = vector.broadcast %23 : vector<1x1x32xf32> to vector<2x8x32xf32>
    %c0_18 = arith.constant 0 : index
    %c0_19 = arith.constant 0 : index
    %25 = vector.load %arg8[%c0_18, %c0_19] : memref<1x1xf32, #tpu.memory_space<vmem>>, vector<1x1xf32>
    %26 = vector.extract %25[0, 0] : f32 from vector<1x1xf32>
    %c0_20 = arith.constant 0 : index
    %c0_21 = arith.constant 0 : index
    %27 = vector.load %arg9[%c0_20, %c0_21] : memref<32x160xf32, #tpu.memory_space<vmem>>, vector<32x160xf32>
    %c0_22 = arith.constant 0 : index
    %c0_23 = arith.constant 0 : index
    %28 = vector.load %arg10[%c0_22, %c0_23] : memref<32x64xf32, #tpu.memory_space<vmem>>, vector<32x64xf32>
    %c0_24 = arith.constant 0 : index
    %c0_25 = arith.constant 0 : index
    %29 = vector.load %arg11[%c0_24, %c0_25] : memref<64x128xf32, #tpu.memory_space<vmem>>, vector<64x128xf32>
    %c0_26 = arith.constant 0 : index
    %c0_27 = arith.constant 0 : index
    %30 = vector.load %arg12[%c0_26, %c0_27] : memref<1x128xf32, #tpu.memory_space<vmem>>, vector<1x128xf32>
    %cst_28 = arith.constant 0.000000e+00 : f32
    %31 = vector.broadcast %cst_28 : f32 to vector<2x32xf32>
    %cst_29 = arith.constant 0.000000e+00 : f32
    %32 = vector.broadcast %cst_29 : f32 to vector<2x32xf32>
    %33 = vector.extract_strided_slice %2 {offsets = [0, 0, 0], sizes = [2, 1, 32], strides = [1, 1, 1]} : vector<2x8x32xf32> to vector<2x1x32xf32>
    %34 = vector.shape_cast %33 : vector<2x1x32xf32> to vector<2x32xf32>
    %35 = vector.extract_strided_slice %15 {offsets = [0, 0, 0], sizes = [2, 1, 32], strides = [1, 1, 1]} : vector<2x8x32xf32> to vector<2x1x32xf32>
    %36 = vector.shape_cast %35 : vector<2x1x32xf32> to vector<2x32xf32>
    %37 = vector.extract_strided_slice %20 {offsets = [0, 0, 0], sizes = [2, 1, 64], strides = [1, 1, 1]} : vector<2x8x64xf32> to vector<2x1x64xf32>
    %38 = vector.shape_cast %37 : vector<2x1x64xf32> to vector<2x64xf32>
    %cst_30 = arith.constant dense<0.000000e+00> : vector<2x160xf32>
    %39 = tpu.matmul %31, %27, %cst_30 {dimension_numbers = #tpu.dot_dimension_numbers<[1], [0], [0], [1], [0, 0, 1, 1], [], []>} : vector<2x32xf32>, vector<32x160xf32>, vector<2x160xf32> -> vector<2x160xf32>
    %40 = vector.extract_strided_slice %39 {offsets = [0, 0], sizes = [2, 128], strides = [1, 1]} : vector<2x160xf32> to vector<2x128xf32>
    %41 = vector.extract_strided_slice %39 {offsets = [0, 128], sizes = [2, 32], strides = [1, 1]} : vector<2x160xf32> to vector<2x32xf32>
    %42 = arith.addf %36, %41 : vector<2x32xf32>
    %43 = vector.shape_cast %42 : vector<2x32xf32> to vector<2x1x32xf32>
    %44 = vector.broadcast %43 : vector<2x1x32xf32> to vector<2x8x32xf32>
    %45 = arith.addf %10, %44 : vector<2x8x32xf32>
    %46 = math.tanh %45 : vector<2x8x32xf32>
    %47 = arith.mulf %46, %24 : vector<2x8x32xf32>
    %cst_31 = arith.constant dense<0.000000e+00> : vector<2x8xf32>
    %48 = vector.multi_reduction <add>, %47, %cst_31 [2] : vector<2x8x32xf32> to vector<2x8xf32>
    %49 = vector.broadcast %26 : f32 to vector<2x8xf32>
    %50 = arith.addf %48, %49 : vector<2x8xf32>
    %51 = arith.mulf %50, %1 : vector<2x8xf32>
    %cst_32 = arith.constant dense<0xFF800000> : vector<2xf32>
    %52 = vector.multi_reduction <maximumf>, %51, %cst_32 [1] : vector<2x8xf32> to vector<2xf32>
    %53 = vector.shape_cast %52 : vector<2xf32> to vector<2x1xf32>
    %54 = vector.broadcast %53 : vector<2x1xf32> to vector<2x8xf32>
    %55 = arith.subf %51, %54 : vector<2x8xf32>
    %56 = math.exp %55 : vector<2x8xf32>
    %57 = arith.mulf %56, %1 : vector<2x8xf32>
    %cst_33 = arith.constant dense<0.000000e+00> : vector<2xf32>
    %58 = vector.multi_reduction <add>, %57, %cst_33 [1] : vector<2x8xf32> to vector<2xf32>
    %59 = vector.shape_cast %58 : vector<2xf32> to vector<2x1xf32>
    %cst_34 = arith.constant 9.99999997E-7 : f32
    %60 = vector.broadcast %cst_34 : f32 to vector<2x1xf32>
    %61 = arith.addf %59, %60 : vector<2x1xf32>
    %62 = vector.broadcast %61 : vector<2x1xf32> to vector<2x8xf32>
    %63 = arith.divf %57, %62 : vector<2x8xf32>
    %64 = vector.shape_cast %63 : vector<2x8xf32> to vector<2x8x1xf32>
    %65 = vector.broadcast %64 : vector<2x8x1xf32> to vector<2x8x32xf32>
    %66 = arith.mulf %65, %0 : vector<2x8x32xf32>
    %cst_35 = arith.constant dense<0.000000e+00> : vector<2x32xf32>
    %67 = vector.multi_reduction <add>, %66, %cst_35 [1] : vector<2x8x32xf32> to vector<2x32xf32>
    %cst_36 = arith.constant dense<0.000000e+00> : vector<2x64xf32>
    %68 = tpu.matmul %67, %28, %cst_36 {dimension_numbers = #tpu.dot_dimension_numbers<[1], [0], [0], [1], [0, 0, 1, 1], [], []>} : vector<2x32xf32>, vector<32x64xf32>, vector<2x64xf32> -> vector<2x64xf32>
    %69 = arith.addf %38, %68 : vector<2x64xf32>
    %70 = arith.negf %69 : vector<2x64xf32>
    %71 = math.exp %70 : vector<2x64xf32>
    %cst_37 = arith.constant 1.000000e+00 : f32
    %72 = vector.broadcast %cst_37 : f32 to vector<2x64xf32>
    %73 = arith.addf %72, %71 : vector<2x64xf32>
    %74 = arith.divf %72, %73 : vector<2x64xf32>
    %75 = tpu.concatenate %34, %67 in 1 : vector<2x32xf32>, vector<2x32xf32> -> vector<2x64xf32>
    %76 = arith.mulf %74, %75 : vector<2x64xf32>
    %77 = vector.broadcast %30 : vector<1x128xf32> to vector<2x128xf32>
    %78 = arith.addf %40, %77 : vector<2x128xf32>
    %cst_38 = arith.constant dense<0.000000e+00> : vector<2x128xf32>
    %79 = tpu.matmul %76, %29, %cst_38 {dimension_numbers = #tpu.dot_dimension_numbers<[1], [0], [0], [1], [0, 0, 1, 1], [], []>} : vector<2x64xf32>, vector<64x128xf32>, vector<2x128xf32> -> vector<2x128xf32>
    %80 = arith.addf %78, %79 : vector<2x128xf32>
    %81 = arith.negf %80 : vector<2x128xf32>
    %82 = math.exp %81 : vector<2x128xf32>
    %cst_39 = arith.constant 1.000000e+00 : f32
    %83 = vector.broadcast %cst_39 : f32 to vector<2x128xf32>
    %84 = arith.addf %83, %82 : vector<2x128xf32>
    %85 = arith.divf %83, %84 : vector<2x128xf32>
    %86 = vector.extract_strided_slice %85 {offsets = [0, 0], sizes = [2, 32], strides = [1, 1]} : vector<2x128xf32> to vector<2x32xf32>
    %87 = vector.extract_strided_slice %85 {offsets = [0, 32], sizes = [2, 32], strides = [1, 1]} : vector<2x128xf32> to vector<2x32xf32>
    %88 = vector.extract_strided_slice %85 {offsets = [0, 64], sizes = [2, 32], strides = [1, 1]} : vector<2x128xf32> to vector<2x32xf32>
    %cst_40 = arith.constant 2.000000e+00 : f32
    %89 = vector.broadcast %cst_40 : f32 to vector<2x32xf32>
    %90 = arith.mulf %89, %88 : vector<2x32xf32>
    %cst_41 = arith.constant 1.000000e+00 : f32
    %91 = vector.broadcast %cst_41 : f32 to vector<2x32xf32>
    %92 = arith.subf %90, %91 : vector<2x32xf32>
    %93 = vector.extract_strided_slice %85 {offsets = [0, 96], sizes = [2, 32], strides = [1, 1]} : vector<2x128xf32> to vector<2x32xf32>
    %94 = arith.mulf %87, %32 : vector<2x32xf32>
    %95 = arith.mulf %86, %92 : vector<2x32xf32>
    %96 = arith.addf %94, %95 : vector<2x32xf32>
    %97 = math.tanh %96 : vector<2x32xf32>
    %98 = arith.mulf %93, %97 : vector<2x32xf32>
    %c0_42 = arith.constant 0 : index
    %c0_43 = arith.constant 0 : index
    %99 = vector.load %arg13[%c0_42, %c0_43] : memref<2x256xf32, #tpu.memory_space<vmem>>, vector<2x32xf32>
    tpu.vector_store %arg13[%c0_42, %c0_43], %98 {strides = array<i32>} : memref<2x256xf32, #tpu.memory_space<vmem>>, vector<2x32xf32>,
    %100 = vector.extract_strided_slice %2 {offsets = [0, 1, 0], sizes = [2, 1, 32], strides = [1, 1, 1]} : vector<2x8x32xf32> to vector<2x1x32xf32>
    %101 = vector.shape_cast %100 : vector<2x1x32xf32> to vector<2x32xf32>
    %102 = vector.extract_strided_slice %15 {offsets = [0, 1, 0], sizes = [2, 1, 32], strides = [1, 1, 1]} : vector<2x8x32xf32> to vector<2x1x32xf32>
    %103 = vector.shape_cast %102 : vector<2x1x32xf32> to vector<2x32xf32>
    %104 = vector.extract_strided_slice %20 {offsets = [0, 1, 0], sizes = [2, 1, 64], strides = [1, 1, 1]} : vector<2x8x64xf32> to vector<2x1x64xf32>
    %105 = vector.shape_cast %104 : vector<2x1x64xf32> to vector<2x64xf32>
    %cst_44 = arith.constant dense<0.000000e+00> : vector<2x160xf32>
    %106 = tpu.matmul %98, %27, %cst_44 {dimension_numbers = #tpu.dot_dimension_numbers<[1], [0], [0], [1], [0, 0, 1, 1], [], []>} : vector<2x32xf32>, vector<32x160xf32>, vector<2x160xf32> -> vector<2x160xf32>
    %107 = vector.extract_strided_slice %106 {offsets = [0, 0], sizes = [2, 128], strides = [1, 1]} : vector<2x160xf32> to vector<2x128xf32>
    %108 = vector.extract_strided_slice %106 {offsets = [0, 128], sizes = [2, 32], strides = [1, 1]} : vector<2x160xf32> to vector<2x32xf32>
    %109 = arith.addf %103, %108 : vector<2x32xf32>
    %110 = vector.shape_cast %109 : vector<2x32xf32> to vector<2x1x32xf32>
    %111 = vector.broadcast %110 : vector<2x1x32xf32> to vector<2x8x32xf32>
    %112 = arith.addf %10, %111 : vector<2x8x32xf32>
    %113 = math.tanh %112 : vector<2x8x32xf32>
    %114 = arith.mulf %113, %24 : vector<2x8x32xf32>
    %cst_45 = arith.constant dense<0.000000e+00> : vector<2x8xf32>
    %115 = vector.multi_reduction <add>, %114, %cst_45 [2] : vector<2x8x32xf32> to vector<2x8xf32>
    %116 = vector.broadcast %26 : f32 to vector<2x8xf32>
    %117 = arith.addf %115, %116 : vector<2x8xf32>
    %118 = arith.mulf %117, %1 : vector<2x8xf32>
    %cst_46 = arith.constant dense<0xFF800000> : vector<2xf32>
    %119 = vector.multi_reduction <maximumf>, %118, %cst_46 [1] : vector<2x8xf32> to vector<2xf32>
    %120 = vector.shape_cast %119 : vector<2xf32> to vector<2x1xf32>
    %121 = vector.broadcast %120 : vector<2x1xf32> to vector<2x8xf32>
    %122 = arith.subf %118, %121 : vector<2x8xf32>
    %123 = math.exp %122 : vector<2x8xf32>
    %124 = arith.mulf %123, %1 : vector<2x8xf32>
    %cst_47 = arith.constant dense<0.000000e+00> : vector<2xf32>
    %125 = vector.multi_reduction <add>, %124, %cst_47 [1] : vector<2x8xf32> to vector<2xf32>
    %126 = vector.shape_cast %125 : vector<2xf32> to vector<2x1xf32>
    %cst_48 = arith.constant 9.99999997E-7 : f32
    %127 = vector.broadcast %cst_48 : f32 to vector<2x1xf32>
    %128 = arith.addf %126, %127 : vector<2x1xf32>
    %129 = vector.broadcast %128 : vector<2x1xf32> to vector<2x8xf32>
    %130 = arith.divf %124, %129 : vector<2x8xf32>
    %131 = vector.shape_cast %130 : vector<2x8xf32> to vector<2x8x1xf32>
    %132 = vector.broadcast %131 : vector<2x8x1xf32> to vector<2x8x32xf32>
    %133 = arith.mulf %132, %0 : vector<2x8x32xf32>
    %cst_49 = arith.constant dense<0.000000e+00> : vector<2x32xf32>
    %134 = vector.multi_reduction <add>, %133, %cst_49 [1] : vector<2x8x32xf32> to vector<2x32xf32>
    %cst_50 = arith.constant dense<0.000000e+00> : vector<2x64xf32>
    %135 = tpu.matmul %134, %28, %cst_50 {dimension_numbers = #tpu.dot_dimension_numbers<[1], [0], [0], [1], [0, 0, 1, 1], [], []>} : vector<2x32xf32>, vector<32x64xf32>, vector<2x64xf32> -> vector<2x64xf32>
    %136 = arith.addf %105, %135 : vector<2x64xf32>
    %137 = arith.negf %136 : vector<2x64xf32>
    %138 = math.exp %137 : vector<2x64xf32>
    %cst_51 = arith.constant 1.000000e+00 : f32
    %139 = vector.broadcast %cst_51 : f32 to vector<2x64xf32>
    %140 = arith.addf %139, %138 : vector<2x64xf32>
    %141 = arith.divf %139, %140 : vector<2x64xf32>
    %142 = tpu.concatenate %101, %134 in 1 : vector<2x32xf32>, vector<2x32xf32> -> vector<2x64xf32>
    %143 = arith.mulf %141, %142 : vector<2x64xf32>
    %144 = vector.broadcast %30 : vector<1x128xf32> to vector<2x128xf32>
    %145 = arith.addf %107, %144 : vector<2x128xf32>
    %cst_52 = arith.constant dense<0.000000e+00> : vector<2x128xf32>
    %146 = tpu.matmul %143, %29, %cst_52 {dimension_numbers = #tpu.dot_dimension_numbers<[1], [0], [0], [1], [0, 0, 1, 1], [], []>} : vector<2x64xf32>, vector<64x128xf32>, vector<2x128xf32> -> vector<2x128xf32>
    %147 = arith.addf %145, %146 : vector<2x128xf32>
    %148 = arith.negf %147 : vector<2x128xf32>
    %149 = math.exp %148 : vector<2x128xf32>
    %cst_53 = arith.constant 1.000000e+00 : f32
    %150 = vector.broadcast %cst_53 : f32 to vector<2x128xf32>
    %151 = arith.addf %150, %149 : vector<2x128xf32>
    %152 = arith.divf %150, %151 : vector<2x128xf32>
    %153 = vector.extract_strided_slice %152 {offsets = [0, 0], sizes = [2, 32], strides = [1, 1]} : vector<2x128xf32> to vector<2x32xf32>
    %154 = vector.extract_strided_slice %152 {offsets = [0, 32], sizes = [2, 32], strides = [1, 1]} : vector<2x128xf32> to vector<2x32xf32>
    %155 = vector.extract_strided_slice %152 {offsets = [0, 64], sizes = [2, 32], strides = [1, 1]} : vector<2x128xf32> to vector<2x32xf32>
    %cst_54 = arith.constant 2.000000e+00 : f32
    %156 = vector.broadcast %cst_54 : f32 to vector<2x32xf32>
    %157 = arith.mulf %156, %155 : vector<2x32xf32>
    %cst_55 = arith.constant 1.000000e+00 : f32
    %158 = vector.broadcast %cst_55 : f32 to vector<2x32xf32>
    %159 = arith.subf %157, %158 : vector<2x32xf32>
    %160 = vector.extract_strided_slice %152 {offsets = [0, 96], sizes = [2, 32], strides = [1, 1]} : vector<2x128xf32> to vector<2x32xf32>
    %161 = arith.mulf %154, %96 : vector<2x32xf32>
    %162 = arith.mulf %153, %159 : vector<2x32xf32>
    %163 = arith.addf %161, %162 : vector<2x32xf32>
    %164 = math.tanh %163 : vector<2x32xf32>
    %165 = arith.mulf %160, %164 : vector<2x32xf32>
    %c0_56 = arith.constant 0 : index
    %c32 = arith.constant 32 : index
    %166 = vector.load %arg13[%c0_56, %c32] : memref<2x256xf32, #tpu.memory_space<vmem>>, vector<2x32xf32>
    tpu.vector_store %arg13[%c0_56, %c32], %165 {strides = array<i32>} : memref<2x256xf32, #tpu.memory_space<vmem>>, vector<2x32xf32>,
    %167 = vector.extract_strided_slice %2 {offsets = [0, 2, 0], sizes = [2, 1, 32], strides = [1, 1, 1]} : vector<2x8x32xf32> to vector<2x1x32xf32>
    %168 = vector.shape_cast %167 : vector<2x1x32xf32> to vector<2x32xf32>
    %169 = vector.extract_strided_slice %15 {offsets = [0, 2, 0], sizes = [2, 1, 32], strides = [1, 1, 1]} : vector<2x8x32xf32> to vector<2x1x32xf32>
    %170 = vector.shape_cast %169 : vector<2x1x32xf32> to vector<2x32xf32>
    %171 = vector.extract_strided_slice %20 {offsets = [0, 2, 0], sizes = [2, 1, 64], strides = [1, 1, 1]} : vector<2x8x64xf32> to vector<2x1x64xf32>
    %172 = vector.shape_cast %171 : vector<2x1x64xf32> to vector<2x64xf32>
    %cst_57 = arith.constant dense<0.000000e+00> : vector<2x160xf32>
    %173 = tpu.matmul %165, %27, %cst_57 {dimension_numbers = #tpu.dot_dimension_numbers<[1], [0], [0], [1], [0, 0, 1, 1], [], []>} : vector<2x32xf32>, vector<32x160xf32>, vector<2x160xf32> -> vector<2x160xf32>
    %174 = vector.extract_strided_slice %173 {offsets = [0, 0], sizes = [2, 128], strides = [1, 1]} : vector<2x160xf32> to vector<2x128xf32>
    %175 = vector.extract_strided_slice %173 {offsets = [0, 128], sizes = [2, 32], strides = [1, 1]} : vector<2x160xf32> to vector<2x32xf32>
    %176 = arith.addf %170, %175 : vector<2x32xf32>
    %177 = vector.shape_cast %176 : vector<2x32xf32> to vector<2x1x32xf32>
    %178 = vector.broadcast %177 : vector<2x1x32xf32> to vector<2x8x32xf32>
    %179 = arith.addf %10, %178 : vector<2x8x32xf32>
    %180 = math.tanh %179 : vector<2x8x32xf32>
    %181 = arith.mulf %180, %24 : vector<2x8x32xf32>
    %cst_58 = arith.constant dense<0.000000e+00> : vector<2x8xf32>
    %182 = vector.multi_reduction <add>, %181, %cst_58 [2] : vector<2x8x32xf32> to vector<2x8xf32>
    %183 = vector.broadcast %26 : f32 to vector<2x8xf32>
    %184 = arith.addf %182, %183 : vector<2x8xf32>
    %185 = arith.mulf %184, %1 : vector<2x8xf32>
    %cst_59 = arith.constant dense<0xFF800000> : vector<2xf32>
    %186 = vector.multi_reduction <maximumf>, %185, %cst_59 [1] : vector<2x8xf32> to vector<2xf32>
    %187 = vector.shape_cast %186 : vector<2xf32> to vector<2x1xf32>
    %188 = vector.broadcast %187 : vector<2x1xf32> to vector<2x8xf32>
    %189 = arith.subf %185, %188 : vector<2x8xf32>
    %190 = math.exp %189 : vector<2x8xf32>
    %191 = arith.mulf %190, %1 : vector<2x8xf32>
    %cst_60 = arith.constant dense<0.000000e+00> : vector<2xf32>
    %192 = vector.multi_reduction <add>, %191, %cst_60 [1] : vector<2x8xf32> to vector<2xf32>
    %193 = vector.shape_cast %192 : vector<2xf32> to vector<2x1xf32>
    %cst_61 = arith.constant 9.99999997E-7 : f32
    %194 = vector.broadcast %cst_61 : f32 to vector<2x1xf32>
    %195 = arith.addf %193, %194 : vector<2x1xf32>
    %196 = vector.broadcast %195 : vector<2x1xf32> to vector<2x8xf32>
    %197 = arith.divf %191, %196 : vector<2x8xf32>
    %198 = vector.shape_cast %197 : vector<2x8xf32> to vector<2x8x1xf32>
    %199 = vector.broadcast %198 : vector<2x8x1xf32> to vector<2x8x32xf32>
    %200 = arith.mulf %199, %0 : vector<2x8x32xf32>
    %cst_62 = arith.constant dense<0.000000e+00> : vector<2x32xf32>
    %201 = vector.multi_reduction <add>, %200, %cst_62 [1] : vector<2x8x32xf32> to vector<2x32xf32>
    %cst_63 = arith.constant dense<0.000000e+00> : vector<2x64xf32>
    %202 = tpu.matmul %201, %28, %cst_63 {dimension_numbers = #tpu.dot_dimension_numbers<[1], [0], [0], [1], [0, 0, 1, 1], [], []>} : vector<2x32xf32>, vector<32x64xf32>, vector<2x64xf32> -> vector<2x64xf32>
    %203 = arith.addf %172, %202 : vector<2x64xf32>
    %204 = arith.negf %203 : vector<2x64xf32>
    %205 = math.exp %204 : vector<2x64xf32>
    %cst_64 = arith.constant 1.000000e+00 : f32
    %206 = vector.broadcast %cst_64 : f32 to vector<2x64xf32>
    %207 = arith.addf %206, %205 : vector<2x64xf32>
    %208 = arith.divf %206, %207 : vector<2x64xf32>
    %209 = tpu.concatenate %168, %201 in 1 : vector<2x32xf32>, vector<2x32xf32> -> vector<2x64xf32>
    %210 = arith.mulf %208, %209 : vector<2x64xf32>
    %211 = vector.broadcast %30 : vector<1x128xf32> to vector<2x128xf32>
    %212 = arith.addf %174, %211 : vector<2x128xf32>
    %cst_65 = arith.constant dense<0.000000e+00> : vector<2x128xf32>
    %213 = tpu.matmul %210, %29, %cst_65 {dimension_numbers = #tpu.dot_dimension_numbers<[1], [0], [0], [1], [0, 0, 1, 1], [], []>} : vector<2x64xf32>, vector<64x128xf32>, vector<2x128xf32> -> vector<2x128xf32>
    %214 = arith.addf %212, %213 : vector<2x128xf32>
    %215 = arith.negf %214 : vector<2x128xf32>
    %216 = math.exp %215 : vector<2x128xf32>
    %cst_66 = arith.constant 1.000000e+00 : f32
    %217 = vector.broadcast %cst_66 : f32 to vector<2x128xf32>
    %218 = arith.addf %217, %216 : vector<2x128xf32>
    %219 = arith.divf %217, %218 : vector<2x128xf32>
    %220 = vector.extract_strided_slice %219 {offsets = [0, 0], sizes = [2, 32], strides = [1, 1]} : vector<2x128xf32> to vector<2x32xf32>
    %221 = vector.extract_strided_slice %219 {offsets = [0, 32], sizes = [2, 32], strides = [1, 1]} : vector<2x128xf32> to vector<2x32xf32>
    %222 = vector.extract_strided_slice %219 {offsets = [0, 64], sizes = [2, 32], strides = [1, 1]} : vector<2x128xf32> to vector<2x32xf32>
    %cst_67 = arith.constant 2.000000e+00 : f32
    %223 = vector.broadcast %cst_67 : f32 to vector<2x32xf32>
    %224 = arith.mulf %223, %222 : vector<2x32xf32>
    %cst_68 = arith.constant 1.000000e+00 : f32
    %225 = vector.broadcast %cst_68 : f32 to vector<2x32xf32>
    %226 = arith.subf %224, %225 : vector<2x32xf32>
    %227 = vector.extract_strided_slice %219 {offsets = [0, 96], sizes = [2, 32], strides = [1, 1]} : vector<2x128xf32> to vector<2x32xf32>
    %228 = arith.mulf %221, %163 : vector<2x32xf32>
    %229 = arith.mulf %220, %226 : vector<2x32xf32>
    %230 = arith.addf %228, %229 : vector<2x32xf32>
    %231 = math.tanh %230 : vector<2x32xf32>
    %232 = arith.mulf %227, %231 : vector<2x32xf32>
    %c0_69 = arith.constant 0 : index
    %c64 = arith.constant 64 : index
    %233 = vector.load %arg13[%c0_69, %c64] : memref<2x256xf32, #tpu.memory_space<vmem>>, vector<2x32xf32>
    tpu.vector_store %arg13[%c0_69, %c64], %232 {strides = array<i32>} : memref<2x256xf32, #tpu.memory_space<vmem>>, vector<2x32xf32>,
    %234 = vector.extract_strided_slice %2 {offsets = [0, 3, 0], sizes = [2, 1, 32], strides = [1, 1, 1]} : vector<2x8x32xf32> to vector<2x1x32xf32>
    %235 = vector.shape_cast %234 : vector<2x1x32xf32> to vector<2x32xf32>
    %236 = vector.extract_strided_slice %15 {offsets = [0, 3, 0], sizes = [2, 1, 32], strides = [1, 1, 1]} : vector<2x8x32xf32> to vector<2x1x32xf32>
    %237 = vector.shape_cast %236 : vector<2x1x32xf32> to vector<2x32xf32>
    %238 = vector.extract_strided_slice %20 {offsets = [0, 3, 0], sizes = [2, 1, 64], strides = [1, 1, 1]} : vector<2x8x64xf32> to vector<2x1x64xf32>
    %239 = vector.shape_cast %238 : vector<2x1x64xf32> to vector<2x64xf32>
    %cst_70 = arith.constant dense<0.000000e+00> : vector<2x160xf32>
    %240 = tpu.matmul %232, %27, %cst_70 {dimension_numbers = #tpu.dot_dimension_numbers<[1], [0], [0], [1], [0, 0, 1, 1], [], []>} : vector<2x32xf32>, vector<32x160xf32>, vector<2x160xf32> -> vector<2x160xf32>
    %241 = vector.extract_strided_slice %240 {offsets = [0, 0], sizes = [2, 128], strides = [1, 1]} : vector<2x160xf32> to vector<2x128xf32>
    %242 = vector.extract_strided_slice %240 {offsets = [0, 128], sizes = [2, 32], strides = [1, 1]} : vector<2x160xf32> to vector<2x32xf32>
    %243 = arith.addf %237, %242 : vector<2x32xf32>
    %244 = vector.shape_cast %243 : vector<2x32xf32> to vector<2x1x32xf32>
    %245 = vector.broadcast %244 : vector<2x1x32xf32> to vector<2x8x32xf32>
    %246 = arith.addf %10, %245 : vector<2x8x32xf32>
    %247 = math.tanh %246 : vector<2x8x32xf32>
    %248 = arith.mulf %247, %24 : vector<2x8x32xf32>
    %cst_71 = arith.constant dense<0.000000e+00> : vector<2x8xf32>
    %249 = vector.multi_reduction <add>, %248, %cst_71 [2] : vector<2x8x32xf32> to vector<2x8xf32>
    %250 = vector.broadcast %26 : f32 to vector<2x8xf32>
    %251 = arith.addf %249, %250 : vector<2x8xf32>
    %252 = arith.mulf %251, %1 : vector<2x8xf32>
    %cst_72 = arith.constant dense<0xFF800000> : vector<2xf32>
    %253 = vector.multi_reduction <maximumf>, %252, %cst_72 [1] : vector<2x8xf32> to vector<2xf32>
    %254 = vector.shape_cast %253 : vector<2xf32> to vector<2x1xf32>
    %255 = vector.broadcast %254 : vector<2x1xf32> to vector<2x8xf32>
    %256 = arith.subf %252, %255 : vector<2x8xf32>
    %257 = math.exp %256 : vector<2x8xf32>
    %258 = arith.mulf %257, %1 : vector<2x8xf32>
    %cst_73 = arith.constant dense<0.000000e+00> : vector<2xf32>
    %259 = vector.multi_reduction <add>, %258, %cst_73 [1] : vector<2x8xf32> to vector<2xf32>
    %260 = vector.shape_cast %259 : vector<2xf32> to vector<2x1xf32>
    %cst_74 = arith.constant 9.99999997E-7 : f32
    %261 = vector.broadcast %cst_74 : f32 to vector<2x1xf32>
    %262 = arith.addf %260, %261 : vector<2x1xf32>
    %263 = vector.broadcast %262 : vector<2x1xf32> to vector<2x8xf32>
    %264 = arith.divf %258, %263 : vector<2x8xf32>
    %265 = vector.shape_cast %264 : vector<2x8xf32> to vector<2x8x1xf32>
    %266 = vector.broadcast %265 : vector<2x8x1xf32> to vector<2x8x32xf32>
    %267 = arith.mulf %266, %0 : vector<2x8x32xf32>
    %cst_75 = arith.constant dense<0.000000e+00> : vector<2x32xf32>
    %268 = vector.multi_reduction <add>, %267, %cst_75 [1] : vector<2x8x32xf32> to vector<2x32xf32>
    %cst_76 = arith.constant dense<0.000000e+00> : vector<2x64xf32>
    %269 = tpu.matmul %268, %28, %cst_76 {dimension_numbers = #tpu.dot_dimension_numbers<[1], [0], [0], [1], [0, 0, 1, 1], [], []>} : vector<2x32xf32>, vector<32x64xf32>, vector<2x64xf32> -> vector<2x64xf32>
    %270 = arith.addf %239, %269 : vector<2x64xf32>
    %271 = arith.negf %270 : vector<2x64xf32>
    %272 = math.exp %271 : vector<2x64xf32>
    %cst_77 = arith.constant 1.000000e+00 : f32
    %273 = vector.broadcast %cst_77 : f32 to vector<2x64xf32>
    %274 = arith.addf %273, %272 : vector<2x64xf32>
    %275 = arith.divf %273, %274 : vector<2x64xf32>
    %276 = tpu.concatenate %235, %268 in 1 : vector<2x32xf32>, vector<2x32xf32> -> vector<2x64xf32>
    %277 = arith.mulf %275, %276 : vector<2x64xf32>
    %278 = vector.broadcast %30 : vector<1x128xf32> to vector<2x128xf32>
    %279 = arith.addf %241, %278 : vector<2x128xf32>
    %cst_78 = arith.constant dense<0.000000e+00> : vector<2x128xf32>
    %280 = tpu.matmul %277, %29, %cst_78 {dimension_numbers = #tpu.dot_dimension_numbers<[1], [0], [0], [1], [0, 0, 1, 1], [], []>} : vector<2x64xf32>, vector<64x128xf32>, vector<2x128xf32> -> vector<2x128xf32>
    %281 = arith.addf %279, %280 : vector<2x128xf32>
    %282 = arith.negf %281 : vector<2x128xf32>
    %283 = math.exp %282 : vector<2x128xf32>
    %cst_79 = arith.constant 1.000000e+00 : f32
    %284 = vector.broadcast %cst_79 : f32 to vector<2x128xf32>
    %285 = arith.addf %284, %283 : vector<2x128xf32>
    %286 = arith.divf %284, %285 : vector<2x128xf32>
    %287 = vector.extract_strided_slice %286 {offsets = [0, 0], sizes = [2, 32], strides = [1, 1]} : vector<2x128xf32> to vector<2x32xf32>
    %288 = vector.extract_strided_slice %286 {offsets = [0, 32], sizes = [2, 32], strides = [1, 1]} : vector<2x128xf32> to vector<2x32xf32>
    %289 = vector.extract_strided_slice %286 {offsets = [0, 64], sizes = [2, 32], strides = [1, 1]} : vector<2x128xf32> to vector<2x32xf32>
    %cst_80 = arith.constant 2.000000e+00 : f32
    %290 = vector.broadcast %cst_80 : f32 to vector<2x32xf32>
    %291 = arith.mulf %290, %289 : vector<2x32xf32>
    %cst_81 = arith.constant 1.000000e+00 : f32
    %292 = vector.broadcast %cst_81 : f32 to vector<2x32xf32>
    %293 = arith.subf %291, %292 : vector<2x32xf32>
    %294 = vector.extract_strided_slice %286 {offsets = [0, 96], sizes = [2, 32], strides = [1, 1]} : vector<2x128xf32> to vector<2x32xf32>
    %295 = arith.mulf %288, %230 : vector<2x32xf32>
    %296 = arith.mulf %287, %293 : vector<2x32xf32>
    %297 = arith.addf %295, %296 : vector<2x32xf32>
    %298 = math.tanh %297 : vector<2x32xf32>
    %299 = arith.mulf %294, %298 : vector<2x32xf32>
    %c0_82 = arith.constant 0 : index
    %c96 = arith.constant 96 : index
    %300 = vector.load %arg13[%c0_82, %c96] : memref<2x256xf32, #tpu.memory_space<vmem>>, vector<2x32xf32>
    tpu.vector_store %arg13[%c0_82, %c96], %299 {strides = array<i32>} : memref<2x256xf32, #tpu.memory_space<vmem>>, vector<2x32xf32>,
    %301 = vector.extract_strided_slice %2 {offsets = [0, 4, 0], sizes = [2, 1, 32], strides = [1, 1, 1]} : vector<2x8x32xf32> to vector<2x1x32xf32>
    %302 = vector.shape_cast %301 : vector<2x1x32xf32> to vector<2x32xf32>
    %303 = vector.extract_strided_slice %15 {offsets = [0, 4, 0], sizes = [2, 1, 32], strides = [1, 1, 1]} : vector<2x8x32xf32> to vector<2x1x32xf32>
    %304 = vector.shape_cast %303 : vector<2x1x32xf32> to vector<2x32xf32>
    %305 = vector.extract_strided_slice %20 {offsets = [0, 4, 0], sizes = [2, 1, 64], strides = [1, 1, 1]} : vector<2x8x64xf32> to vector<2x1x64xf32>
    %306 = vector.shape_cast %305 : vector<2x1x64xf32> to vector<2x64xf32>
    %cst_83 = arith.constant dense<0.000000e+00> : vector<2x160xf32>
    %307 = tpu.matmul %299, %27, %cst_83 {dimension_numbers = #tpu.dot_dimension_numbers<[1], [0], [0], [1], [0, 0, 1, 1], [], []>} : vector<2x32xf32>, vector<32x160xf32>, vector<2x160xf32> -> vector<2x160xf32>
    %308 = vector.extract_strided_slice %307 {offsets = [0, 0], sizes = [2, 128], strides = [1, 1]} : vector<2x160xf32> to vector<2x128xf32>
    %309 = vector.extract_strided_slice %307 {offsets = [0, 128], sizes = [2, 32], strides = [1, 1]} : vector<2x160xf32> to vector<2x32xf32>
    %310 = arith.addf %304, %309 : vector<2x32xf32>
    %311 = vector.shape_cast %310 : vector<2x32xf32> to vector<2x1x32xf32>
    %312 = vector.broadcast %311 : vector<2x1x32xf32> to vector<2x8x32xf32>
    %313 = arith.addf %10, %312 : vector<2x8x32xf32>
    %314 = math.tanh %313 : vector<2x8x32xf32>
    %315 = arith.mulf %314, %24 : vector<2x8x32xf32>
    %cst_84 = arith.constant dense<0.000000e+00> : vector<2x8xf32>
    %316 = vector.multi_reduction <add>, %315, %cst_84 [2] : vector<2x8x32xf32> to vector<2x8xf32>
    %317 = vector.broadcast %26 : f32 to vector<2x8xf32>
    %318 = arith.addf %316, %317 : vector<2x8xf32>
    %319 = arith.mulf %318, %1 : vector<2x8xf32>
    %cst_85 = arith.constant dense<0xFF800000> : vector<2xf32>
    %320 = vector.multi_reduction <maximumf>, %319, %cst_85 [1] : vector<2x8xf32> to vector<2xf32>
    %321 = vector.shape_cast %320 : vector<2xf32> to vector<2x1xf32>
    %322 = vector.broadcast %321 : vector<2x1xf32> to vector<2x8xf32>
    %323 = arith.subf %319, %322 : vector<2x8xf32>
    %324 = math.exp %323 : vector<2x8xf32>
    %325 = arith.mulf %324, %1 : vector<2x8xf32>
    %cst_86 = arith.constant dense<0.000000e+00> : vector<2xf32>
    %326 = vector.multi_reduction <add>, %325, %cst_86 [1] : vector<2x8xf32> to vector<2xf32>
    %327 = vector.shape_cast %326 : vector<2xf32> to vector<2x1xf32>
    %cst_87 = arith.constant 9.99999997E-7 : f32
    %328 = vector.broadcast %cst_87 : f32 to vector<2x1xf32>
    %329 = arith.addf %327, %328 : vector<2x1xf32>
    %330 = vector.broadcast %329 : vector<2x1xf32> to vector<2x8xf32>
    %331 = arith.divf %325, %330 : vector<2x8xf32>
    %332 = vector.shape_cast %331 : vector<2x8xf32> to vector<2x8x1xf32>
    %333 = vector.broadcast %332 : vector<2x8x1xf32> to vector<2x8x32xf32>
    %334 = arith.mulf %333, %0 : vector<2x8x32xf32>
    %cst_88 = arith.constant dense<0.000000e+00> : vector<2x32xf32>
    %335 = vector.multi_reduction <add>, %334, %cst_88 [1] : vector<2x8x32xf32> to vector<2x32xf32>
    %cst_89 = arith.constant dense<0.000000e+00> : vector<2x64xf32>
    %336 = tpu.matmul %335, %28, %cst_89 {dimension_numbers = #tpu.dot_dimension_numbers<[1], [0], [0], [1], [0, 0, 1, 1], [], []>} : vector<2x32xf32>, vector<32x64xf32>, vector<2x64xf32> -> vector<2x64xf32>
    %337 = arith.addf %306, %336 : vector<2x64xf32>
    %338 = arith.negf %337 : vector<2x64xf32>
    %339 = math.exp %338 : vector<2x64xf32>
    %cst_90 = arith.constant 1.000000e+00 : f32
    %340 = vector.broadcast %cst_90 : f32 to vector<2x64xf32>
    %341 = arith.addf %340, %339 : vector<2x64xf32>
    %342 = arith.divf %340, %341 : vector<2x64xf32>
    %343 = tpu.concatenate %302, %335 in 1 : vector<2x32xf32>, vector<2x32xf32> -> vector<2x64xf32>
    %344 = arith.mulf %342, %343 : vector<2x64xf32>
    %345 = vector.broadcast %30 : vector<1x128xf32> to vector<2x128xf32>
    %346 = arith.addf %308, %345 : vector<2x128xf32>
    %cst_91 = arith.constant dense<0.000000e+00> : vector<2x128xf32>
    %347 = tpu.matmul %344, %29, %cst_91 {dimension_numbers = #tpu.dot_dimension_numbers<[1], [0], [0], [1], [0, 0, 1, 1], [], []>} : vector<2x64xf32>, vector<64x128xf32>, vector<2x128xf32> -> vector<2x128xf32>
    %348 = arith.addf %346, %347 : vector<2x128xf32>
    %349 = arith.negf %348 : vector<2x128xf32>
    %350 = math.exp %349 : vector<2x128xf32>
    %cst_92 = arith.constant 1.000000e+00 : f32
    %351 = vector.broadcast %cst_92 : f32 to vector<2x128xf32>
    %352 = arith.addf %351, %350 : vector<2x128xf32>
    %353 = arith.divf %351, %352 : vector<2x128xf32>
    %354 = vector.extract_strided_slice %353 {offsets = [0, 0], sizes = [2, 32], strides = [1, 1]} : vector<2x128xf32> to vector<2x32xf32>
    %355 = vector.extract_strided_slice %353 {offsets = [0, 32], sizes = [2, 32], strides = [1, 1]} : vector<2x128xf32> to vector<2x32xf32>
    %356 = vector.extract_strided_slice %353 {offsets = [0, 64], sizes = [2, 32], strides = [1, 1]} : vector<2x128xf32> to vector<2x32xf32>
    %cst_93 = arith.constant 2.000000e+00 : f32
    %357 = vector.broadcast %cst_93 : f32 to vector<2x32xf32>
    %358 = arith.mulf %357, %356 : vector<2x32xf32>
    %cst_94 = arith.constant 1.000000e+00 : f32
    %359 = vector.broadcast %cst_94 : f32 to vector<2x32xf32>
    %360 = arith.subf %358, %359 : vector<2x32xf32>
    %361 = vector.extract_strided_slice %353 {offsets = [0, 96], sizes = [2, 32], strides = [1, 1]} : vector<2x128xf32> to vector<2x32xf32>
    %362 = arith.mulf %355, %297 : vector<2x32xf32>
    %363 = arith.mulf %354, %360 : vector<2x32xf32>
    %364 = arith.addf %362, %363 : vector<2x32xf32>
    %365 = math.tanh %364 : vector<2x32xf32>
    %366 = arith.mulf %361, %365 : vector<2x32xf32>
    %c0_95 = arith.constant 0 : index
    %c128 = arith.constant 128 : index
    %367 = vector.load %arg13[%c0_95, %c128] : memref<2x256xf32, #tpu.memory_space<vmem>>, vector<2x32xf32>
    tpu.vector_store %arg13[%c0_95, %c128], %366 {strides = array<i32>} : memref<2x256xf32, #tpu.memory_space<vmem>>, vector<2x32xf32>,
    %368 = vector.extract_strided_slice %2 {offsets = [0, 5, 0], sizes = [2, 1, 32], strides = [1, 1, 1]} : vector<2x8x32xf32> to vector<2x1x32xf32>
    %369 = vector.shape_cast %368 : vector<2x1x32xf32> to vector<2x32xf32>
    %370 = vector.extract_strided_slice %15 {offsets = [0, 5, 0], sizes = [2, 1, 32], strides = [1, 1, 1]} : vector<2x8x32xf32> to vector<2x1x32xf32>
    %371 = vector.shape_cast %370 : vector<2x1x32xf32> to vector<2x32xf32>
    %372 = vector.extract_strided_slice %20 {offsets = [0, 5, 0], sizes = [2, 1, 64], strides = [1, 1, 1]} : vector<2x8x64xf32> to vector<2x1x64xf32>
    %373 = vector.shape_cast %372 : vector<2x1x64xf32> to vector<2x64xf32>
    %cst_96 = arith.constant dense<0.000000e+00> : vector<2x160xf32>
    %374 = tpu.matmul %366, %27, %cst_96 {dimension_numbers = #tpu.dot_dimension_numbers<[1], [0], [0], [1], [0, 0, 1, 1], [], []>} : vector<2x32xf32>, vector<32x160xf32>, vector<2x160xf32> -> vector<2x160xf32>
    %375 = vector.extract_strided_slice %374 {offsets = [0, 0], sizes = [2, 128], strides = [1, 1]} : vector<2x160xf32> to vector<2x128xf32>
    %376 = vector.extract_strided_slice %374 {offsets = [0, 128], sizes = [2, 32], strides = [1, 1]} : vector<2x160xf32> to vector<2x32xf32>
    %377 = arith.addf %371, %376 : vector<2x32xf32>
    %378 = vector.shape_cast %377 : vector<2x32xf32> to vector<2x1x32xf32>
    %379 = vector.broadcast %378 : vector<2x1x32xf32> to vector<2x8x32xf32>
    %380 = arith.addf %10, %379 : vector<2x8x32xf32>
    %381 = math.tanh %380 : vector<2x8x32xf32>
    %382 = arith.mulf %381, %24 : vector<2x8x32xf32>
    %cst_97 = arith.constant dense<0.000000e+00> : vector<2x8xf32>
    %383 = vector.multi_reduction <add>, %382, %cst_97 [2] : vector<2x8x32xf32> to vector<2x8xf32>
    %384 = vector.broadcast %26 : f32 to vector<2x8xf32>
    %385 = arith.addf %383, %384 : vector<2x8xf32>
    %386 = arith.mulf %385, %1 : vector<2x8xf32>
    %cst_98 = arith.constant dense<0xFF800000> : vector<2xf32>
    %387 = vector.multi_reduction <maximumf>, %386, %cst_98 [1] : vector<2x8xf32> to vector<2xf32>
    %388 = vector.shape_cast %387 : vector<2xf32> to vector<2x1xf32>
    %389 = vector.broadcast %388 : vector<2x1xf32> to vector<2x8xf32>
    %390 = arith.subf %386, %389 : vector<2x8xf32>
    %391 = math.exp %390 : vector<2x8xf32>
    %392 = arith.mulf %391, %1 : vector<2x8xf32>
    %cst_99 = arith.constant dense<0.000000e+00> : vector<2xf32>
    %393 = vector.multi_reduction <add>, %392, %cst_99 [1] : vector<2x8xf32> to vector<2xf32>
    %394 = vector.shape_cast %393 : vector<2xf32> to vector<2x1xf32>
    %cst_100 = arith.constant 9.99999997E-7 : f32
    %395 = vector.broadcast %cst_100 : f32 to vector<2x1xf32>
    %396 = arith.addf %394, %395 : vector<2x1xf32>
    %397 = vector.broadcast %396 : vector<2x1xf32> to vector<2x8xf32>
    %398 = arith.divf %392, %397 : vector<2x8xf32>
    %399 = vector.shape_cast %398 : vector<2x8xf32> to vector<2x8x1xf32>
    %400 = vector.broadcast %399 : vector<2x8x1xf32> to vector<2x8x32xf32>
    %401 = arith.mulf %400, %0 : vector<2x8x32xf32>
    %cst_101 = arith.constant dense<0.000000e+00> : vector<2x32xf32>
    %402 = vector.multi_reduction <add>, %401, %cst_101 [1] : vector<2x8x32xf32> to vector<2x32xf32>
    %cst_102 = arith.constant dense<0.000000e+00> : vector<2x64xf32>
    %403 = tpu.matmul %402, %28, %cst_102 {dimension_numbers = #tpu.dot_dimension_numbers<[1], [0], [0], [1], [0, 0, 1, 1], [], []>} : vector<2x32xf32>, vector<32x64xf32>, vector<2x64xf32> -> vector<2x64xf32>
    %404 = arith.addf %373, %403 : vector<2x64xf32>
    %405 = arith.negf %404 : vector<2x64xf32>
    %406 = math.exp %405 : vector<2x64xf32>
    %cst_103 = arith.constant 1.000000e+00 : f32
    %407 = vector.broadcast %cst_103 : f32 to vector<2x64xf32>
    %408 = arith.addf %407, %406 : vector<2x64xf32>
    %409 = arith.divf %407, %408 : vector<2x64xf32>
    %410 = tpu.concatenate %369, %402 in 1 : vector<2x32xf32>, vector<2x32xf32> -> vector<2x64xf32>
    %411 = arith.mulf %409, %410 : vector<2x64xf32>
    %412 = vector.broadcast %30 : vector<1x128xf32> to vector<2x128xf32>
    %413 = arith.addf %375, %412 : vector<2x128xf32>
    %cst_104 = arith.constant dense<0.000000e+00> : vector<2x128xf32>
    %414 = tpu.matmul %411, %29, %cst_104 {dimension_numbers = #tpu.dot_dimension_numbers<[1], [0], [0], [1], [0, 0, 1, 1], [], []>} : vector<2x64xf32>, vector<64x128xf32>, vector<2x128xf32> -> vector<2x128xf32>
    %415 = arith.addf %413, %414 : vector<2x128xf32>
    %416 = arith.negf %415 : vector<2x128xf32>
    %417 = math.exp %416 : vector<2x128xf32>
    %cst_105 = arith.constant 1.000000e+00 : f32
    %418 = vector.broadcast %cst_105 : f32 to vector<2x128xf32>
    %419 = arith.addf %418, %417 : vector<2x128xf32>
    %420 = arith.divf %418, %419 : vector<2x128xf32>
    %421 = vector.extract_strided_slice %420 {offsets = [0, 0], sizes = [2, 32], strides = [1, 1]} : vector<2x128xf32> to vector<2x32xf32>
    %422 = vector.extract_strided_slice %420 {offsets = [0, 32], sizes = [2, 32], strides = [1, 1]} : vector<2x128xf32> to vector<2x32xf32>
    %423 = vector.extract_strided_slice %420 {offsets = [0, 64], sizes = [2, 32], strides = [1, 1]} : vector<2x128xf32> to vector<2x32xf32>
    %cst_106 = arith.constant 2.000000e+00 : f32
    %424 = vector.broadcast %cst_106 : f32 to vector<2x32xf32>
    %425 = arith.mulf %424, %423 : vector<2x32xf32>
    %cst_107 = arith.constant 1.000000e+00 : f32
    %426 = vector.broadcast %cst_107 : f32 to vector<2x32xf32>
    %427 = arith.subf %425, %426 : vector<2x32xf32>
    %428 = vector.extract_strided_slice %420 {offsets = [0, 96], sizes = [2, 32], strides = [1, 1]} : vector<2x128xf32> to vector<2x32xf32>
    %429 = arith.mulf %422, %364 : vector<2x32xf32>
    %430 = arith.mulf %421, %427 : vector<2x32xf32>
    %431 = arith.addf %429, %430 : vector<2x32xf32>
    %432 = math.tanh %431 : vector<2x32xf32>
    %433 = arith.mulf %428, %432 : vector<2x32xf32>
    %c0_108 = arith.constant 0 : index
    %c160 = arith.constant 160 : index
    %434 = vector.load %arg13[%c0_108, %c160] : memref<2x256xf32, #tpu.memory_space<vmem>>, vector<2x32xf32>
    tpu.vector_store %arg13[%c0_108, %c160], %433 {strides = array<i32>} : memref<2x256xf32, #tpu.memory_space<vmem>>, vector<2x32xf32>,
    %435 = vector.extract_strided_slice %2 {offsets = [0, 6, 0], sizes = [2, 1, 32], strides = [1, 1, 1]} : vector<2x8x32xf32> to vector<2x1x32xf32>
    %436 = vector.shape_cast %435 : vector<2x1x32xf32> to vector<2x32xf32>
    %437 = vector.extract_strided_slice %15 {offsets = [0, 6, 0], sizes = [2, 1, 32], strides = [1, 1, 1]} : vector<2x8x32xf32> to vector<2x1x32xf32>
    %438 = vector.shape_cast %437 : vector<2x1x32xf32> to vector<2x32xf32>
    %439 = vector.extract_strided_slice %20 {offsets = [0, 6, 0], sizes = [2, 1, 64], strides = [1, 1, 1]} : vector<2x8x64xf32> to vector<2x1x64xf32>
    %440 = vector.shape_cast %439 : vector<2x1x64xf32> to vector<2x64xf32>
    %cst_109 = arith.constant dense<0.000000e+00> : vector<2x160xf32>
    %441 = tpu.matmul %433, %27, %cst_109 {dimension_numbers = #tpu.dot_dimension_numbers<[1], [0], [0], [1], [0, 0, 1, 1], [], []>} : vector<2x32xf32>, vector<32x160xf32>, vector<2x160xf32> -> vector<2x160xf32>
    %442 = vector.extract_strided_slice %441 {offsets = [0, 0], sizes = [2, 128], strides = [1, 1]} : vector<2x160xf32> to vector<2x128xf32>
    %443 = vector.extract_strided_slice %441 {offsets = [0, 128], sizes = [2, 32], strides = [1, 1]} : vector<2x160xf32> to vector<2x32xf32>
    %444 = arith.addf %438, %443 : vector<2x32xf32>
    %445 = vector.shape_cast %444 : vector<2x32xf32> to vector<2x1x32xf32>
    %446 = vector.broadcast %445 : vector<2x1x32xf32> to vector<2x8x32xf32>
    %447 = arith.addf %10, %446 : vector<2x8x32xf32>
    %448 = math.tanh %447 : vector<2x8x32xf32>
    %449 = arith.mulf %448, %24 : vector<2x8x32xf32>
    %cst_110 = arith.constant dense<0.000000e+00> : vector<2x8xf32>
    %450 = vector.multi_reduction <add>, %449, %cst_110 [2] : vector<2x8x32xf32> to vector<2x8xf32>
    %451 = vector.broadcast %26 : f32 to vector<2x8xf32>
    %452 = arith.addf %450, %451 : vector<2x8xf32>
    %453 = arith.mulf %452, %1 : vector<2x8xf32>
    %cst_111 = arith.constant dense<0xFF800000> : vector<2xf32>
    %454 = vector.multi_reduction <maximumf>, %453, %cst_111 [1] : vector<2x8xf32> to vector<2xf32>
    %455 = vector.shape_cast %454 : vector<2xf32> to vector<2x1xf32>
    %456 = vector.broadcast %455 : vector<2x1xf32> to vector<2x8xf32>
    %457 = arith.subf %453, %456 : vector<2x8xf32>
    %458 = math.exp %457 : vector<2x8xf32>
    %459 = arith.mulf %458, %1 : vector<2x8xf32>
    %cst_112 = arith.constant dense<0.000000e+00> : vector<2xf32>
    %460 = vector.multi_reduction <add>, %459, %cst_112 [1] : vector<2x8xf32> to vector<2xf32>
    %461 = vector.shape_cast %460 : vector<2xf32> to vector<2x1xf32>
    %cst_113 = arith.constant 9.99999997E-7 : f32
    %462 = vector.broadcast %cst_113 : f32 to vector<2x1xf32>
    %463 = arith.addf %461, %462 : vector<2x1xf32>
    %464 = vector.broadcast %463 : vector<2x1xf32> to vector<2x8xf32>
    %465 = arith.divf %459, %464 : vector<2x8xf32>
    %466 = vector.shape_cast %465 : vector<2x8xf32> to vector<2x8x1xf32>
    %467 = vector.broadcast %466 : vector<2x8x1xf32> to vector<2x8x32xf32>
    %468 = arith.mulf %467, %0 : vector<2x8x32xf32>
    %cst_114 = arith.constant dense<0.000000e+00> : vector<2x32xf32>
    %469 = vector.multi_reduction <add>, %468, %cst_114 [1] : vector<2x8x32xf32> to vector<2x32xf32>
    %cst_115 = arith.constant dense<0.000000e+00> : vector<2x64xf32>
    %470 = tpu.matmul %469, %28, %cst_115 {dimension_numbers = #tpu.dot_dimension_numbers<[1], [0], [0], [1], [0, 0, 1, 1], [], []>} : vector<2x32xf32>, vector<32x64xf32>, vector<2x64xf32> -> vector<2x64xf32>
    %471 = arith.addf %440, %470 : vector<2x64xf32>
    %472 = arith.negf %471 : vector<2x64xf32>
    %473 = math.exp %472 : vector<2x64xf32>
    %cst_116 = arith.constant 1.000000e+00 : f32
    %474 = vector.broadcast %cst_116 : f32 to vector<2x64xf32>
    %475 = arith.addf %474, %473 : vector<2x64xf32>
    %476 = arith.divf %474, %475 : vector<2x64xf32>
    %477 = tpu.concatenate %436, %469 in 1 : vector<2x32xf32>, vector<2x32xf32> -> vector<2x64xf32>
    %478 = arith.mulf %476, %477 : vector<2x64xf32>
    %479 = vector.broadcast %30 : vector<1x128xf32> to vector<2x128xf32>
    %480 = arith.addf %442, %479 : vector<2x128xf32>
    %cst_117 = arith.constant dense<0.000000e+00> : vector<2x128xf32>
    %481 = tpu.matmul %478, %29, %cst_117 {dimension_numbers = #tpu.dot_dimension_numbers<[1], [0], [0], [1], [0, 0, 1, 1], [], []>} : vector<2x64xf32>, vector<64x128xf32>, vector<2x128xf32> -> vector<2x128xf32>
    %482 = arith.addf %480, %481 : vector<2x128xf32>
    %483 = arith.negf %482 : vector<2x128xf32>
    %484 = math.exp %483 : vector<2x128xf32>
    %cst_118 = arith.constant 1.000000e+00 : f32
    %485 = vector.broadcast %cst_118 : f32 to vector<2x128xf32>
    %486 = arith.addf %485, %484 : vector<2x128xf32>
    %487 = arith.divf %485, %486 : vector<2x128xf32>
    %488 = vector.extract_strided_slice %487 {offsets = [0, 0], sizes = [2, 32], strides = [1, 1]} : vector<2x128xf32> to vector<2x32xf32>
    %489 = vector.extract_strided_slice %487 {offsets = [0, 32], sizes = [2, 32], strides = [1, 1]} : vector<2x128xf32> to vector<2x32xf32>
    %490 = vector.extract_strided_slice %487 {offsets = [0, 64], sizes = [2, 32], strides = [1, 1]} : vector<2x128xf32> to vector<2x32xf32>
    %cst_119 = arith.constant 2.000000e+00 : f32
    %491 = vector.broadcast %cst_119 : f32 to vector<2x32xf32>
    %492 = arith.mulf %491, %490 : vector<2x32xf32>
    %cst_120 = arith.constant 1.000000e+00 : f32
    %493 = vector.broadcast %cst_120 : f32 to vector<2x32xf32>
    %494 = arith.subf %492, %493 : vector<2x32xf32>
    %495 = vector.extract_strided_slice %487 {offsets = [0, 96], sizes = [2, 32], strides = [1, 1]} : vector<2x128xf32> to vector<2x32xf32>
    %496 = arith.mulf %489, %431 : vector<2x32xf32>
    %497 = arith.mulf %488, %494 : vector<2x32xf32>
    %498 = arith.addf %496, %497 : vector<2x32xf32>
    %499 = math.tanh %498 : vector<2x32xf32>
    %500 = arith.mulf %495, %499 : vector<2x32xf32>
    %c0_121 = arith.constant 0 : index
    %c192 = arith.constant 192 : index
    %501 = vector.load %arg13[%c0_121, %c192] : memref<2x256xf32, #tpu.memory_space<vmem>>, vector<2x32xf32>
    tpu.vector_store %arg13[%c0_121, %c192], %500 {strides = array<i32>} : memref<2x256xf32, #tpu.memory_space<vmem>>, vector<2x32xf32>,
    %502 = vector.extract_strided_slice %2 {offsets = [0, 7, 0], sizes = [2, 1, 32], strides = [1, 1, 1]} : vector<2x8x32xf32> to vector<2x1x32xf32>
    %503 = vector.shape_cast %502 : vector<2x1x32xf32> to vector<2x32xf32>
    %504 = vector.extract_strided_slice %15 {offsets = [0, 7, 0], sizes = [2, 1, 32], strides = [1, 1, 1]} : vector<2x8x32xf32> to vector<2x1x32xf32>
    %505 = vector.shape_cast %504 : vector<2x1x32xf32> to vector<2x32xf32>
    %506 = vector.extract_strided_slice %20 {offsets = [0, 7, 0], sizes = [2, 1, 64], strides = [1, 1, 1]} : vector<2x8x64xf32> to vector<2x1x64xf32>
    %507 = vector.shape_cast %506 : vector<2x1x64xf32> to vector<2x64xf32>
    %cst_122 = arith.constant dense<0.000000e+00> : vector<2x160xf32>
    %508 = tpu.matmul %500, %27, %cst_122 {dimension_numbers = #tpu.dot_dimension_numbers<[1], [0], [0], [1], [0, 0, 1, 1], [], []>} : vector<2x32xf32>, vector<32x160xf32>, vector<2x160xf32> -> vector<2x160xf32>
    %509 = vector.extract_strided_slice %508 {offsets = [0, 0], sizes = [2, 128], strides = [1, 1]} : vector<2x160xf32> to vector<2x128xf32>
    %510 = vector.extract_strided_slice %508 {offsets = [0, 128], sizes = [2, 32], strides = [1, 1]} : vector<2x160xf32> to vector<2x32xf32>
    %511 = arith.addf %505, %510 : vector<2x32xf32>
    %512 = vector.shape_cast %511 : vector<2x32xf32> to vector<2x1x32xf32>
    %513 = vector.broadcast %512 : vector<2x1x32xf32> to vector<2x8x32xf32>
    %514 = arith.addf %10, %513 : vector<2x8x32xf32>
    %515 = math.tanh %514 : vector<2x8x32xf32>
    %516 = arith.mulf %515, %24 : vector<2x8x32xf32>
    %cst_123 = arith.constant dense<0.000000e+00> : vector<2x8xf32>
    %517 = vector.multi_reduction <add>, %516, %cst_123 [2] : vector<2x8x32xf32> to vector<2x8xf32>
    %518 = vector.broadcast %26 : f32 to vector<2x8xf32>
    %519 = arith.addf %517, %518 : vector<2x8xf32>
    %520 = arith.mulf %519, %1 : vector<2x8xf32>
    %cst_124 = arith.constant dense<0xFF800000> : vector<2xf32>
    %521 = vector.multi_reduction <maximumf>, %520, %cst_124 [1] : vector<2x8xf32> to vector<2xf32>
    %522 = vector.shape_cast %521 : vector<2xf32> to vector<2x1xf32>
    %523 = vector.broadcast %522 : vector<2x1xf32> to vector<2x8xf32>
    %524 = arith.subf %520, %523 : vector<2x8xf32>
    %525 = math.exp %524 : vector<2x8xf32>
    %526 = arith.mulf %525, %1 : vector<2x8xf32>
    %cst_125 = arith.constant dense<0.000000e+00> : vector<2xf32>
    %527 = vector.multi_reduction <add>, %526, %cst_125 [1] : vector<2x8xf32> to vector<2xf32>
    %528 = vector.shape_cast %527 : vector<2xf32> to vector<2x1xf32>
    %cst_126 = arith.constant 9.99999997E-7 : f32
    %529 = vector.broadcast %cst_126 : f32 to vector<2x1xf32>
    %530 = arith.addf %528, %529 : vector<2x1xf32>
    %531 = vector.broadcast %530 : vector<2x1xf32> to vector<2x8xf32>
    %532 = arith.divf %526, %531 : vector<2x8xf32>
    %533 = vector.shape_cast %532 : vector<2x8xf32> to vector<2x8x1xf32>
    %534 = vector.broadcast %533 : vector<2x8x1xf32> to vector<2x8x32xf32>
    %535 = arith.mulf %534, %0 : vector<2x8x32xf32>
    %cst_127 = arith.constant dense<0.000000e+00> : vector<2x32xf32>
    %536 = vector.multi_reduction <add>, %535, %cst_127 [1] : vector<2x8x32xf32> to vector<2x32xf32>
    %cst_128 = arith.constant dense<0.000000e+00> : vector<2x64xf32>
    %537 = tpu.matmul %536, %28, %cst_128 {dimension_numbers = #tpu.dot_dimension_numbers<[1], [0], [0], [1], [0, 0, 1, 1], [], []>} : vector<2x32xf32>, vector<32x64xf32>, vector<2x64xf32> -> vector<2x64xf32>
    %538 = arith.addf %507, %537 : vector<2x64xf32>
    %539 = arith.negf %538 : vector<2x64xf32>
    %540 = math.exp %539 : vector<2x64xf32>
    %cst_129 = arith.constant 1.000000e+00 : f32
    %541 = vector.broadcast %cst_129 : f32 to vector<2x64xf32>
    %542 = arith.addf %541, %540 : vector<2x64xf32>
    %543 = arith.divf %541, %542 : vector<2x64xf32>
    %544 = tpu.concatenate %503, %536 in 1 : vector<2x32xf32>, vector<2x32xf32> -> vector<2x64xf32>
    %545 = arith.mulf %543, %544 : vector<2x64xf32>
    %546 = vector.broadcast %30 : vector<1x128xf32> to vector<2x128xf32>
    %547 = arith.addf %509, %546 : vector<2x128xf32>
    %cst_130 = arith.constant dense<0.000000e+00> : vector<2x128xf32>
    %548 = tpu.matmul %545, %29, %cst_130 {dimension_numbers = #tpu.dot_dimension_numbers<[1], [0], [0], [1], [0, 0, 1, 1], [], []>} : vector<2x64xf32>, vector<64x128xf32>, vector<2x128xf32> -> vector<2x128xf32>
    %549 = arith.addf %547, %548 : vector<2x128xf32>
    %550 = arith.negf %549 : vector<2x128xf32>
    %551 = math.exp %550 : vector<2x128xf32>
    %cst_131 = arith.constant 1.000000e+00 : f32
    %552 = vector.broadcast %cst_131 : f32 to vector<2x128xf32>
    %553 = arith.addf %552, %551 : vector<2x128xf32>
    %554 = arith.divf %552, %553 : vector<2x128xf32>
    %555 = vector.extract_strided_slice %554 {offsets = [0, 0], sizes = [2, 32], strides = [1, 1]} : vector<2x128xf32> to vector<2x32xf32>
    %556 = vector.extract_strided_slice %554 {offsets = [0, 32], sizes = [2, 32], strides = [1, 1]} : vector<2x128xf32> to vector<2x32xf32>
    %557 = vector.extract_strided_slice %554 {offsets = [0, 64], sizes = [2, 32], strides = [1, 1]} : vector<2x128xf32> to vector<2x32xf32>
    %cst_132 = arith.constant 2.000000e+00 : f32
    %558 = vector.broadcast %cst_132 : f32 to vector<2x32xf32>
    %559 = arith.mulf %558, %557 : vector<2x32xf32>
    %cst_133 = arith.constant 1.000000e+00 : f32
    %560 = vector.broadcast %cst_133 : f32 to vector<2x32xf32>
    %561 = arith.subf %559, %560 : vector<2x32xf32>
    %562 = vector.extract_strided_slice %554 {offsets = [0, 96], sizes = [2, 32], strides = [1, 1]} : vector<2x128xf32> to vector<2x32xf32>
    %563 = arith.mulf %556, %498 : vector<2x32xf32>
    %564 = arith.mulf %555, %561 : vector<2x32xf32>
    %565 = arith.addf %563, %564 : vector<2x32xf32>
    %566 = math.tanh %565 : vector<2x32xf32>
    %567 = arith.mulf %562, %566 : vector<2x32xf32>
    %c0_134 = arith.constant 0 : index
    %c224 = arith.constant 224 : index
    %568 = vector.load %arg13[%c0_134, %c224] : memref<2x256xf32, #tpu.memory_space<vmem>>, vector<2x32xf32>
    tpu.vector_store %arg13[%c0_134, %c224], %567 {strides = array<i32>} : memref<2x256xf32, #tpu.memory_space<vmem>>, vector<2x32xf32>,
    return
  }
}

</mosaic_0001>

<bundles_post_ra>
// kernel: uni_match_rnn.1
= control target key start
LH: loop header
LB: loop body
LE: loop exit
PB: predicated region body
PF: predicated region fallthrough
CT: control target
= control target key end

     0   :  { %s5963_s0 = inlined_call_operand.hbm [shape: f32[2,8,32], index: 0, kind: input, shape index: {}]   ;;  %s5964_s1 = inlined_call_operand.hbm [shape: f32[2,8,32], index: 1, kind: input, shape index: {}]   ;;  %s5965_s2 = inlined_call_operand.vmem [shape: f32[2,8], index: 2, kind: input, shape index: {}]   ;;  %s5966_s3 = inlined_call_operand.hbm [shape: f32[32,32], index: 3, kind: input, shape index: {}]   ;;  %s5967_s4 = inlined_call_operand.vmem [shape: f32[1,32], index: 4, kind: input, shape index: {}]   ;;  %s5968_s5 = inlined_call_operand.hbm [shape: f32[32,96], index: 5, kind: input, shape index: {}]   ;;  %s5969_s6 = inlined_call_operand.vmem [shape: f32[1,64], index: 6, kind: input, shape index: {}]   ;;  %s5970_s7 = inlined_call_operand.vmem [shape: f32[1,32], index: 7, kind: input, shape index: {}]   ;;  %s5971_s8 = inlined_call_operand.<no memory space> [shape: f32[1,1], index: 8, kind: input, shape index: {}]   ;;  %s5972_s9 = inlined_call_operand.hbm [shape: f32[32,160], index: 9, kind: input, shape index: {}]   ;;  %s5973_s10 = inlined_call_operand.hbm [shape: f32[32,64], index: 10, kind: input, shape index: {}]   ;;  %s5974_s11 = inlined_call_operand.hbm [shape: f32[64,128], index: 11, kind: input, shape index: {}]   ;;  %s5975_s12 = inlined_call_operand.vmem [shape: f32[1,128], index: 12, kind: input, shape index: {}]   ;;  %s5976_s13 = inlined_call_operand.vmem [shape: f32[2,256], index: 13, kind: output, shape index: {}]  }
   0x1   :  { %v18_v0 = vstv %s5971_s8 }
   0x2   :  { %19 = vst [vmem:[#allocation2] sm:$0x1] %v18_v0 }
   0x3   :  { %20 = vsyncpa [#allocation4], 0 }
   0x4   :  { %21 = vsyncpa [#allocation6], 0 }
   0x5   :  { %22 = vsyncpa [#allocation9], 0 }
   0x6   :  { %23 = vsyncpa [#allocation12], 0  ;;  %s4803_s27 = smov [#allocation5]   ;;  %s4804_s29 = smov [#allocation8]  }
   0x7   :  { %s41_s28 = sshll.u32 %s4803_s27, 4  ;;  %s69_s30 = sshll.u32 %s4804_s29, 4  ;;  %s42_s28 = int_to_ptr.vmem [resolvable:$true] %s41_s28  ;;  %s70_s30 = int_to_ptr.vmem [resolvable:$true] %s69_s30 }
   0x8   :  { %s4663_s14 = scalar_lea.vmem %s42_s28, 256  ;;  %p4668_p1 = scmp.lt.s32.totalorder %s42_s28, %s42_s28 }
   0x9   :  { %p4664_p0 = scmp.ne.s32.totalorder %s42_s28, %s4663_s14  ;;  %p4669_p2 = scmp.lt.s32.totalorder %s4663_s14, %s4663_s14 }
   0xb   :  { %p4670_p3 = por %p4669_p2, %p4668_p1 }
   0xd   :  { %p4671_p4 = pnand %p4670_p3, %p4664_p0 }
   0xf   :  { %4674 = shalt.err (!%p4671_p4)
}
  0x10   :  { %s4805_s15 = smov 128   ;;  %s4806_s8 = smov 8  }
  0x11   :  { %47 = dma.hbm_to_vmem [thread:$0]  %s5964_s1, 256, %s42_s28, [#allocation6], %s4805_s15, %s4805_s15, %s4806_s8  }
  0x12   :  { %s4683_s18 = scalar_lea.vmem %s70_s30, 512  ;;  %p4688_p6 = scmp.lt.s32.totalorder %s70_s30, %s70_s30 }
  0x13   :  { %p4684_p5 = scmp.ne.s32.totalorder %s70_s30, %s4683_s18  ;;  %p4689_p7 = scmp.lt.s32.totalorder %s4683_s18, %s4683_s18 }
  0x15   :  { %p4690_p8 = por %p4689_p7, %p4688_p6 }
  0x17   :  { %p4691_p9 = pnand %p4690_p8, %p4684_p5 }
  0x19   :  { %4694 = shalt.err (!%p4691_p9)
}
  0x1a   :  { %75 = dma.hbm_to_vmem [thread:$0]  %s5968_s5, 512, %s70_s30, [#allocation9], %s4805_s15, %s4805_s15, %s4806_s8  }
  0x1b   :  { %s4807_s21 = smov [#allocation11]   ;;  %s4808_s23 = smov [#allocation3]  }
  0x1c   :  { %s99_s22 = sshll.u32 %s4807_s21, 4  ;;  %s29_s24 = sshll.u32 %s4808_s23, 4  ;;  %s100_s22 = int_to_ptr.vmem [resolvable:$true] %s99_s22  ;;  %s30_s24 = int_to_ptr.vmem [resolvable:$true] %s29_s24 }
  0x1d   :  { %s4703_s1 = scalar_lea.vmem %s100_s22, 512  ;;  %p4708_p11 = scmp.lt.s32.totalorder %s100_s22, %s100_s22 }
  0x1e   :  { %p4704_p10 = scmp.ne.s32.totalorder %s100_s22, %s4703_s1  ;;  %p4709_p12 = scmp.lt.s32.totalorder %s4703_s1, %s4703_s1 }
  0x20   :  { %p4710_p13 = por %p4709_p12, %p4708_p11 }
  0x22   :  { %p4711_p0 = pnand %p4710_p13, %p4704_p10 }
  0x24   :  { %4714 = shalt.err (!%p4711_p0)
}
  0x25   :  { %105 = dma.hbm_to_vmem [thread:$0]  %s5973_s10, 512, %s100_s22, [#allocation12], %s4805_s15, %s4805_s15, %s4806_s8  }
  0x26   :  { %s4723_s5 = scalar_lea.vmem %s30_s24, 256  ;;  %p4728_p2 = scmp.lt.s32.totalorder %s30_s24, %s30_s24 }
  0x27   :  { %p4724_p1 = scmp.ne.s32.totalorder %s30_s24, %s4723_s5  ;;  %p4729_p3 = scmp.lt.s32.totalorder %s4723_s5, %s4723_s5 }
  0x29   :  { %p4730_p4 = por %p4729_p3, %p4728_p2 }
  0x2b   :  { %p4731_p5 = pnand %p4730_p4, %p4724_p1 }
  0x2d   :  { %4734 = shalt.err (!%p4731_p5)
}
  0x2e   :  { %35 = dma.hbm_to_vmem [thread:$0]  %s5963_s0, 256, %s30_s24, [#allocation4], %s4805_s15, %s4805_s15, %s4806_s8  }
  0x2f   :  { %s4809_s29 = smov [#allocation7]   ;;  %s4810_s14 = smov [#allocation10]  }
  0x30   :  { %s55_s30 = sshll.u32 %s4809_s29, 4  ;;  %s87_s16 = sshll.u32 %s4810_s14, 4  ;;  %s56_s30 = int_to_ptr.vmem [resolvable:$true] %s55_s30  ;;  %s88_s16 = int_to_ptr.vmem [resolvable:$true] %s87_s16 }
  0x31   :  { %s4743_s10 = scalar_lea.vmem %s56_s30, 512  ;;  %p4748_p7 = scmp.lt.s32.totalorder %s56_s30, %s56_s30 }
  0x32   :  { %p4744_p6 = scmp.ne.s32.totalorder %s56_s30, %s4743_s10  ;;  %p4749_p8 = scmp.lt.s32.totalorder %s4743_s10, %s4743_s10 }
  0x34   :  { %p4750_p9 = por %p4749_p8, %p4748_p7 }
  0x36   :  { %p4751_p10 = pnand %p4750_p9, %p4744_p6 }
  0x38   :  { %4754 = shalt.err (!%p4751_p10)
}
  0x39   :  { %61 = dma.hbm_to_vmem [thread:$0]  %s5966_s3, 512, %s56_s30, [#allocation6], %s4805_s15, %s4805_s15, %s4806_s8  }
  0x3a   :  { %s4763_s0 = scalar_lea.vmem %s88_s16, 1024  ;;  %p4768_p12 = scmp.lt.s32.totalorder %s88_s16, %s88_s16 }
  0x3b   :  { %p4764_p11 = scmp.ne.s32.totalorder %s88_s16, %s4763_s0  ;;  %p4769_p13 = scmp.lt.s32.totalorder %s4763_s0, %s4763_s0 }
  0x3d   :  { %p4770_p0 = por %p4769_p13, %p4768_p12 }
  0x3f   :  { %p4771_p1 = pnand %p4770_p0, %p4764_p11 }
  0x41   :  { %4774 = shalt.err (!%p4771_p1)
}
  0x42   :  { %s4811_s19 = smov 256   ;;  %s4812_s20 = smov 16  }
  0x43   :  { %93 = dma.hbm_to_vmem [thread:$0]  %s5972_s9, 1024, %s88_s16, [#allocation9], %s4811_s19, %s4811_s19, %s4812_s20  }
  0x44   :  { %s4813_s23 = smov [#allocation13]  }
  0x45   :  { %s111_s24 = sshll.u32 %s4813_s23, 4  ;;  %s112_s24 = int_to_ptr.vmem [resolvable:$true] %s111_s24 }
  0x46   :  { %s4783_s1 = scalar_lea.vmem %s112_s24, 1024  ;;  %p4788_p3 = scmp.lt.s32.totalorder %s112_s24, %s112_s24 }
  0x47   :  { %p4784_p2 = scmp.ne.s32.totalorder %s112_s24, %s4783_s1  ;;  %p4789_p4 = scmp.lt.s32.totalorder %s4783_s1, %s4783_s1 }
  0x49   :  { %p4790_p5 = por %p4789_p4, %p4788_p3 }
  0x4b   :  { %p4791_p6 = pnand %p4790_p5, %p4784_p2 }
  0x4d   :  { %4794 = shalt.err (!%p4791_p6)
}
  0x4e   :  { %117 = dma.hbm_to_vmem [thread:$0]  %s5974_s11, 1024, %s112_s24, [#allocation12], %s4805_s15, %s4805_s15, %s4806_s8  }
  0x4f   :  { %4795 = dma.done.wait [#allocation4], 256  }
  0x50   :  { %4796 = vsyncadd [#allocation4], 4294967040 }
  0x51   :  { %4797 = dma.done.wait [#allocation6], 768  }
  0x52   :  { %4798 = vsyncadd [#allocation6], 4294966528 }
  0x53   :  { %4799 = dma.done.wait [#allocation9], 1536  }
  0x54   :  { %4800 = vsyncadd [#allocation9], 4294965760 }
  0x55   :  { %4801 = dma.done.wait [#allocation12], 1536  }
  0x56   :  { %4802 = vsyncadd [#allocation12], 4294965760  ;;  %v4814_v1 = vmov 0.0   ;;  %v149_v2 = vld [vmem:[#allocation7 + $0x18] sm:$0xff]  ;;  %v148_v3 = vld [vmem:[#allocation7 + $0x10] sm:$0xff]  ;;  %vm150_vm0 = vcmask 261120   ;;  %v447_v22 = vlaneseq }
  0x57   :  { %434 = vmatprep.mubr.f32.mxu0 %v4814_v1  ;;  %4113 = vmatprep.subr.mxu1 %v149_v2  ;;  %v4934_v4 = vld [vmem:[#allocation10 + $0x38] sm:$0xff]  ;;  %v4936_v5 = vld [vmem:[#allocation10 + $0x30] sm:$0xff]  ;;  %v147_v6 = vld [vmem:[#allocation7 + $0x8] sm:$0xff]  ;;  %v4815_v53 = vmov 0   ;;  %vm507_vm1 = vcmask 1041409   ;;  %vm510_vm2 = vcmask 58368  }
  0x58   :  { %4114 = vmatpush3.msra.mxu1 %v149_v2  ;;  %394 = vmatprep.subr.mxu0 %v4934_v4  ;;  %v4939_v7 = vld [vmem:[#allocation10 + $0x28] sm:$0xff]  ;;  %v4941_v8 = vld [vmem:[#allocation5] sm:$0xff]  ;;  %v4944_v9 = vld [vmem:[#allocation10 + $0x20] sm:$0xff]  ;;  %v4977_v23 = vshrl.u32 %v447_v22, 7  ;;  %v498_v63 = vand.u32 127, %v447_v22  ;;  %vm4816_vm3 = vmmov 0  }
  0x59   :  { %4115 = vmatprep.subr.mxu1 %v148_v3  ;;  %395 = vmatpush1.msra.mxu0 %v4936_v5  ;;  %v146_v10 = vld [vmem:[#allocation7] sm:$0xff]  ;;  %v4947_v11 = vld [vmem:[#allocation10 + $0x18] sm:$0xff]  ;;  %v4951_v12 = vld [vmem:[#allocation10 + $0x10] sm:$0xff]  ;;  %s4817_s5 = smov 32   ;;  %vm723_vm4 = vcmask 523264   ;;  %s4819_s14 = smov 64  }
  0x5a   :  { %4116 = vmatpush3.msra.mxu1 %v148_v3  ;;  %396 = vmatprep.subr.mxu0 %v4939_v7  ;;  %v4954_v13 = vld [vmem:[#allocation5 + $0x8] sm:$0xff]  ;;  %v4957_v15 = vld [vmem:[#allocation10 + $0x8] sm:$0xff]  ;;  %v243_v16 = vld [vmem:[#allocation8 + $0x10] sm:$0xff]  ;;  %v4980_v24 = vsub.s32 0, %v4977_v23  ;;  %v4986_v26 = vsub.s32 1, %v4977_v23  ;;  %v5029_v0 = vsub.s32 %v498_v63, %v4977_v23  ;;  %vm1140_vm5 = vcmask 1042434  }
  0x5b   :  { %4117 = vmatprep.subr.mxu1 %v147_v6  ;;  %4121 = vmatprep.mubr.msk.f32.mxu1 %vm150_vm0, %v4941_v8  ;;  %v244_v14 = vld [vmem:[#allocation8 + $0x18] sm:$0xff]  ;;  %v4960_v17 = vld [vmem:[#allocation10] sm:$0xff]  ;;  %v242_v18 = vld [vmem:[#allocation8 + $0x8] sm:$0xff]  ;;  %vm1583_vm6 = vcmask 1043459   ;;  %vm2027_vm7 = vcmask 1044484   ;;  %vm2461_vm8 = vcmask 1045509  }
  0x5c   :  { %4118 = vmatpush3.msra.mxu1 %v147_v6  ;;  %397 = vmatpush1.msra.mxu0 %v4944_v9  ;;  %v4965_v19 = vld [vmem:[#allocation3] sm:$0xff]  ;;  %v4971_v21 = vld [vmem:[#allocation3 + $0x8] sm:$0xff]  ;;  %v344_v27 = vld [vmem:[#allocation2] sm:$0x1]  ;;  %vm2904_vm9 = vcmask 1046534   ;;  %vm3347_vm10 = vcmask 1047559  }
  0x5d   :  { %4119 = vmatprep.subr.mxu1 %v146_v10  ;;  %398 = vmatprep.subr.mxu0 %v4947_v11  ;;  %v241_v20 = vld [vmem:[#allocation8] sm:$0xff]  ;;  %4375 = vpush %v344_v27  ;;  %v3928_v35 = vld [vmem:[%s5967_s4] ss:$0 sm:$0xff]  ;;  %vm833_vm11 = vcmask 254976   ;;  %vm1274_vm12 = vcmask 517376   ;;  %vm1718_vm13 = vcmask 779776  }
  0x5e   :  { %4120 = vmatpush3.msra.mxu1 %v146_v10  ;;  %399 = vmatpush1.msra.mxu0 %v4951_v12  ;;  %v143_v25 = vld [vmem:[%s5965_s2] sm:$0x3]  ;;  %vm2151_vm14 = vcmask 1042176  }
  0x5f   :  { %4122 = vmatmul.mubr.msk.f32.vlgmr.msra.gmra.mxu1 %vm150_vm0, %v4954_v13  ;;  %4124 = vmatprep.subr.mxu1 %v244_v14  ;;  %v474_v28 = vrot.slane %v143_v25, %v4980_v24  ;;  %v481_v29 = vrot.slane %v143_v25, %v4986_v26  ;;  %v5012_v48 = vld [vmem:[%s5970_s7] ss:$0 sm:$0xff] }
  0x60   :  { %4125 = vmatpush3.msra.mxu1 %v244_v14  ;;  %400 = vmatprep.subr.mxu0 %v4957_v15 }
  0x61   :  { %4126 = vmatprep.subr.mxu1 %v243_v16  ;;  %401 = vmatpush1.msra.mxu0 %v4960_v17 }
  0x62   :  { %4127 = vmatpush3.msra.mxu1 %v243_v16  ;;  %435 = vmatmul.mubr.f32.vlgmr.msra.gmra.mxu0 %v4814_v1 }
  0x63   :  { %4128 = vmatprep.subr.mxu1 %v242_v18  ;;  %4132 = vmatprep.mubr.msk.f32.mxu1 %vm150_vm0, %v4965_v19 }
  0x64   :  { %4129 = vmatpush3.msra.mxu1 %v242_v18  ;;  %4146 = vmatprep.subr.mxu0 %v4814_v1 }
  0x65   :  { %4130 = vmatprep.subr.mxu1 %v241_v20  ;;  %476 = vbcast.lane.b32.xlu1 %v474_v28, 256 }
  0x66   :  { %4131 = vmatpush3.msra.mxu1 %v241_v20  ;;  %4395 = vset.pattern.permute.xlu0 %v4815_v53 }
  0x67   :  { %4133 = vmatmul.mubr.msk.f32.vlgmr.msra.gmra.mxu1 %vm150_vm0, %v4971_v21  ;;  %4135 = vmatprep.subr.mxu1 %v4814_v1 }
  0x68   :  { %4396 = vset.pattern.permute.xlu1 %v4815_v53  ;;  %4143 = vmatprep.mubr.msk.f32.mxu1 %vm4816_vm3, %v4814_v1 }
  0x69   :  { %483 = vbcast.lane.b32.xlu1 %v481_v29, 256  ;;  %4162 = vmatprep.mubr.msk.f32.mxu0 %vm4816_vm3, %v4814_v1 }
  0x8e   :  { %s4376_s26 = spop %4375 }
  0x8f   :  { %v5018_v54 = vstv %s4376_s26 }
  0xd7   :  { %v5020_v55 = vpop.permute.xlu1 %476 }
  0xdb   :  { %v5024_v60 = vpop.permute.xlu1 %483 }
 0x11f   :  { %v4123_v30 = vpop.f32.mrf.mxu1 }
 0x120   :  { %v5000_v39 = vadd.f32 %v4123_v30, %v3928_v35 }
 0x121   :  { %v223_v33 = vpop.f32.mrf.mxu1 }
 0x122   :  { %v4990_v31 = vpop.f32.mrf.mxu0  ;;  %v5004_v42 = vadd.f32 %v3928_v35, %v223_v33 }
 0x124   :  { %v438_v32 = vpop.f32.mrf.mxu0 }
 0x125   :  { %v442_v34 = vrot.slane %v438_v32, 1 }
 0x127   :  { %v4995_v36 = vpop.f32.mrf.mxu1 }
 0x128   :  { %v446_v37 = vadd.f32 %v4995_v36, %v442_v34 }
 0x129   :  { %v4998_v38 = vpop.f32.mrf.mxu1 }
 0x12a   :  { %v445_v40 = vadd.f32 %v438_v32, %v4998_v38  ;;  %v454_v41 = vrot.slane %v446_v37, %v4980_v24 }
 0x12c   :  { %v450_v43 = vrot.slane %v445_v40, %v4980_v24  ;;  %v456_v44 = vadd.f32 %v454_v41, %v5000_v39 }
 0x12e   :  { %v455_v45 = vadd.f32 %v450_v43, %v5004_v42  ;;  %4397 = vtanh.f32 %v456_v44 }
 0x130   :  { %4399 = vtanh.f32 %v455_v45 }
 0x13b   :  { %v4398_v46 = vpop.eup %4397 }
 0x13c   :  { %v460_v51 = vmul.f32 %v4398_v46, %v5012_v48 }
 0x13d   :  { %v4400_v47 = vpop.eup %4399 }
 0x13e   :  { %v459_v49 = vmul.f32 %v4400_v47, %v5012_v48  ;;  %v464_v52 = vsel %vm150_vm0, %v460_v51, 0.0 }
 0x140   :  { %v461_v50 = vsel %vm150_vm0, %v459_v49, 0.0 }
 0x141   :  { %462 = vadd.xlane.f32.xlu0 %v461_v50 }
 0x145   :  { %465 = vadd.xlane.f32.xlu0 %v464_v52 }
 0x1ca   :  { %v463_v56 = vpop.xlane.xlu0 %462 }
 0x1cb   :  { %v468_v57 = vadd.f32 %v5018_v54, %v463_v56  ;;  %v5045_v56 = vld [vmem:[#allocation11 + $0x18] sm:$0xff] }
 0x1cc   :  { %4136 = vmatpush3.msra.mxu1 %v5045_v56 }
 0x1cd   :  { %v487_v58 = vmul.f32 %v5020_v55, %v468_v57  ;;  %v5047_v57 = vld [vmem:[#allocation11 + $0x10] sm:$0xff]  ;;  %4137 = vmatprep.subr.mxu1 %v4814_v1 }
 0x1ce   :  { %v466_v59 = vpop.xlane.xlu0 %465  ;;  %4138 = vmatpush3.msra.mxu1 %v5047_v57 }
 0x1cf   :  { %v469_v61 = vadd.f32 %v5018_v54, %v466_v59  ;;  %492 = vperm.xlu0 %4395, %v487_v58   ;;  %4139 = vmatprep.subr.mxu1 %v4814_v1  ;;  %v5059_v59 = vld [vmem:[#allocation11] sm:$0xff] }
 0x1d1   :  { %v488_v62 = vmul.f32 %v5024_v60, %v469_v61 }
 0x1d3   :  { %495 = vperm.xlu1 %4396, %v488_v62  }
 0x24a   :  { %v493_v2 = vpop.permute.xlu0 %492 }
 0x24b   :  { %v502_v6 = vrot.slane %v493_v2, %v5029_v0 }
 0x24e   :  { %v496_v3 = vpop.permute.xlu1 %495 }
 0x24f   :  { %v506_v10 = vrot.slane %v496_v3, %v5029_v0 }
 0x251   :  { %v508_v14 = vsel %vm507_vm1, %v506_v10, %v502_v6 }
 0x252   :  { %v511_v16 = vsel %vm510_vm2, %v508_v14, -inf }
 0x253   :  { %512 = vmax.xlane.f32.xlu1 %v511_v16 }
 0x2dc   :  { %v513_v18 = vpop.xlane.xlu1 %512 }
 0x2dd   :  { %v518_v20 = vrot.slane %v513_v18, %v4980_v24  ;;  %v522_v22 = vrot.slane %v513_v18, %v4986_v26 }
 0x2df   :  { %v525_v25 = vsub.f32 %v487_v58, %v518_v20  ;;  %v526_v27 = vsub.f32 %v488_v62, %v522_v22  ;;  %v5053_v58 = vld [vmem:[#allocation11 + $0x8] sm:$0xff] }
 0x2e0   :  { %4140 = vmatpush3.msra.mxu1 %v5053_v58 }
 0x2e1   :  { %v527_v28 = vmul.f32 1.442695, %v525_v25  ;;  %v529_v29 = vmul.f32 1.442695, %v526_v27  ;;  %4141 = vmatprep.subr.mxu1 %v4814_v1 }
 0x2e2   :  { %4142 = vmatpush3.msra.mxu1 %v5059_v59 }
 0x2e3   :  { %4401 = vpow2.f32 %v527_v28  ;;  %863 = vmatprep.subr.mxu1 %v4934_v4 }
 0x2e4   :  { %4403 = vpow2.f32 %v529_v29 }
 0x2f0   :  { %v4402_v30 = vpop.eup %4401 }
 0x2f1   :  { %v4404_v32 = vpop.eup %4403  ;;  %v531_v33 = vmul.f32 %v4402_v30, %v5020_v55 }
 0x2f2   :  { %v532_v34 = vmul.f32 %v4404_v32, %v5024_v60 }
 0x2f3   :  { %536 = vperm.xlu1 %4396, %v531_v33  }
 0x2f4   :  { %539 = vperm.xlu0 %4395, %v532_v34  }
 0x36e   :  { %v537_v35 = vpop.permute.xlu1 %536 }
 0x36f   :  { %v540_v37 = vpop.permute.xlu0 %539  ;;  %v544_v40 = vrot.slane %v537_v35, %v5029_v0  ;;  %v5086_v35 = vrot.slane %v4971_v21, 7  ;;  %v5096_v21 = vld [vmem:[#allocation13 + $0x38] sm:$0xff] }
 0x370   :  { %v548_v41 = vrot.slane %v540_v37, %v5029_v0  ;;  %4147 = vmatpush3.msra.mxu0 %v5096_v21 }
 0x371   :  { %v694_v37 = vsel %vm507_vm1, %v5086_v35, %v4965_v19  ;;  %4148 = vmatprep.subr.mxu0 %v4814_v1 }
 0x372   :  { %v549_v43 = vsel %vm507_vm1, %v548_v41, %v544_v40 }
 0x373   :  { %v551_v44 = vsel %vm510_vm2, %v549_v43, 0.0 }
 0x374   :  { %552 = vadd.xlane.f32.xlu0 %v551_v44 }
 0x3fd   :  { %v553_v45 = vpop.xlane.xlu0 %552 }
 0x3fe   :  { %v554_v46 = vadd.f32 1e-06, %v553_v45 }
 0x400   :  { %v559_v47 = vrot.slane %v554_v46, %v4980_v24  ;;  %v563_v49 = vrot.slane %v554_v46, %v4986_v26 }
 0x402   :  { %4405 = vrcp.f32 %v559_v47  ;;  %v5098_v47 = vld [vmem:[#allocation13 + $0x30] sm:$0xff] }
 0x403   :  { %4407 = vrcp.f32 %v563_v49  ;;  %v5102_v49 = vld [vmem:[#allocation13 + $0x28] sm:$0xff]  ;;  %4149 = vmatpush3.msra.mxu0 %v5098_v47 }
 0x404   :  { %4150 = vmatprep.subr.mxu0 %v4814_v1 }
 0x405   :  { %4151 = vmatpush3.msra.mxu0 %v5102_v49 }
 0x406   :  { %4152 = vmatprep.subr.mxu0 %v4814_v1 }
 0x40f   :  { %v4406_v50 = vpop.eup %4405 }
 0x410   :  { %v567_v51 = vmul.f32 %v4406_v50, %v531_v33  ;;  %v4408_v52 = vpop.eup %4407  ;;  %v5106_v50 = vld [vmem:[#allocation13 + $0x20] sm:$0xff] }
 0x411   :  { %v569_v53 = vmul.f32 %v4408_v52, %v532_v34  ;;  %v3931_v34 = vld [vmem:[%s5969_s6] ss:$0 sm:$0xff]  ;;  %4153 = vmatpush3.msra.mxu0 %v5106_v50  ;;  %v5114_v52 = vld [vmem:[#allocation13 + $0x10] sm:$0xff]  ;;  %s4818_s6 = smov 96  }
 0x412   :  { %572 = vperm.xlu1 %4396, %v567_v51   ;;  %v5110_v51 = vld [vmem:[#allocation13 + $0x18] sm:$0xff]  ;;  %4154 = vmatprep.subr.mxu0 %v4814_v1 }
 0x413   :  { %4155 = vmatpush3.msra.mxu0 %v5110_v51 }
 0x414   :  { %4156 = vmatprep.subr.mxu0 %v4814_v1 }
 0x415   :  { %4157 = vmatpush3.msra.mxu0 %v5114_v52 }
 0x416   :  { %577 = vperm.xlu1 %4396, %v569_v53   ;;  %v5118_v53 = vld [vmem:[#allocation13 + $0x8] sm:$0xff]  ;;  %4158 = vmatprep.subr.mxu0 %v4814_v1 }
 0x417   :  { %4159 = vmatpush3.msra.mxu0 %v5118_v53 }
 0x418   :  { %4160 = vmatprep.subr.mxu0 %v4814_v1 }
 0x48d   :  { %v573_v61 = vpop.permute.xlu1 %572 }
 0x48e   :  { %v580_v62 = vmul.f32 %v573_v61, %v4941_v8  ;;  %v5122_v61 = vld [vmem:[#allocation13] sm:$0xff] }
 0x48f   :  { %4161 = vmatpush3.msra.mxu0 %v5122_v61 }
 0x490   :  { %v582_v63 = vsel %vm150_vm0, %v580_v62, 0.0  ;;  %4176 = vmatprep.subr.mxu0 %v4814_v1 }
 0x491   :  { %v583_v2 = vrot.slane %v582_v63, 4  ;;  %v578_v3 = vpop.permute.xlu1 %577 }
 0x492   :  { %v581_v6 = vmul.f32 %v578_v3, %v4954_v13 }
 0x493   :  { %v584_v10 = vadd.f32 %v583_v2, %v582_v63 }
 0x494   :  { %v589_v14 = vsel %vm150_vm0, %v581_v6, 0.0 }
 0x495   :  { %v585_v16 = vrot.slane %v584_v10, 2  ;;  %v590_v18 = vrot.slane %v589_v14, 4 }
 0x497   :  { %v586_v20 = vadd.f32 %v585_v16, %v584_v10  ;;  %v591_v22 = vadd.f32 %v590_v18, %v589_v14 }
 0x499   :  { %v592_v25 = vrot.slane %v591_v22, 2  ;;  %v587_v28 = vrot.slane %v586_v20, 1 }
 0x49b   :  { %v593_v27 = vadd.f32 %v592_v25, %v591_v22  ;;  %v588_v30 = vadd.f32 %v587_v28, %v586_v20 }
 0x49d   :  { %v594_v29 = vrot.slane %v593_v27, 1 }
 0x49f   :  { %v595_v32 = vadd.f32 %v594_v29, %v593_v27 }
 0x4a1   :  { %v598_v33 = vsel %vm507_vm1, %v595_v32, %v588_v30 }
 0x4a2   :  { %696 = vrot.lane.b32.xlu1 %v598_v33, %s4817_s5  ;;  %4144 = vmatmul.mubr.msk.f32.vlgmr.msra.gmra.mxu1 %vm150_vm0, %v598_v33 }
 0x4a3   :  { %864 = vmatpush1.msra.mxu1 %v4936_v5  ;;  %903 = vmatprep.mubr.f32.mxu1 %v4814_v1 }
 0x4a4   :  { %865 = vmatprep.subr.mxu1 %v4939_v7 }
 0x4a5   :  { %866 = vmatpush1.msra.mxu1 %v4944_v9 }
 0x4a6   :  { %332 = vrot.lane.b32.xlu1 %v3931_v34, %s4817_s5  ;;  %867 = vmatprep.subr.mxu1 %v4947_v11 }
 0x4a7   :  { %868 = vmatpush1.msra.mxu1 %v4951_v12 }
 0x4a8   :  { %869 = vmatprep.subr.mxu1 %v4957_v15 }
 0x4a9   :  { %870 = vmatpush1.msra.mxu1 %v4960_v17 }
 0x4aa   :  { %4165 = vmatprep.subr.mxu1 %v4814_v1 }
 0x514   :  { %v697_v40 = vpop.permute.xlu1 %696 }
 0x515   :  { %v699_v41 = vsel %vm150_vm0, %v694_v37, %v697_v40 }
 0x516   :  { %v701_v43 = vrot.slane %v699_v41, 1 }
 0x518   :  { %704 = vrot.lane.b32.xlu0 %v701_v43, %s4817_s5  ;;  %v333_v62 = vpop.permute.xlu1 %332  ;;  %v5160_v43 = vld [vmem:[%s5975_s12] ss:$0 sm:$0xff] }
 0x519   :  { %v5129_v63 = vadd.f32 %v4995_v36, %v333_v62  ;;  %v5133_v6 = vadd.f32 %v333_v62, %v4998_v38 }
 0x562   :  { %v667_v44 = vpop.f32.mrf.mxu1 }
 0x563   :  { %v672_v45 = vrot.slane %v667_v44, 1 }
 0x564   :  { %v4145_v46 = vpop.f32.mrf.mxu1 }
 0x565   :  { %675 = vrot.lane.b32.xlu1 %v672_v45, %s4817_s5 }
 0x569   :  { %673 = vrot.lane.b32.xlu1 %v667_v44, %s4817_s5  ;;  %v716_v44 = vadd.f32 %v5160_v43, %v4990_v31 }
 0x56d   :  { %702 = vrot.lane.b32.xlu1 %v699_v41, %s4817_s5 }
 0x58a   :  { %v705_v29 = vpop.permute.xlu0 %704 }
 0x5d7   :  { %v676_v2 = vpop.permute.xlu1 %675 }
 0x5d8   :  { %v680_v3 = vadd.f32 %v676_v2, %v5129_v63 }
 0x5da   :  { %v3935_v10 = vmul.f32 -1.442695, %v680_v3 }
 0x5db   :  { %v674_v14 = vpop.permute.xlu1 %673 }
 0x5dc   :  { %4409 = vpow2.f32 %v3935_v10  ;;  %v679_v16 = vadd.f32 %v674_v14, %v5133_v6 }
 0x5de   :  { %v3934_v18 = vmul.f32 -1.442695, %v679_v16 }
 0x5df   :  { %v703_v33 = vpop.permute.xlu1 %702 }
 0x5e0   :  { %4411 = vpow2.f32 %v3934_v18 }
 0x5e9   :  { %v4410_v20 = vpop.eup %4409 }
 0x5ea   :  { %v688_v22 = vadd.f32 1.0, %v4410_v20 }
 0x5ec   :  { %4413 = vrcp.f32 %v688_v22 }
 0x5ed   :  { %v4412_v25 = vpop.eup %4411 }
 0x5ee   :  { %v687_v27 = vadd.f32 1.0, %v4412_v25 }
 0x5f0   :  { %4415 = vrcp.f32 %v687_v27 }
 0x5f9   :  { %v4414_v28 = vpop.eup %4413 }
 0x5fa   :  { %v709_v30 = vmul.f32 %v4414_v28, %v705_v29 }
 0x5fc   :  { %v719_v37 = vrot.slane %v709_v30, 7 }
 0x5fd   :  { %v4416_v32 = vpop.eup %4415 }
 0x5fe   :  { %v708_v34 = vmul.f32 %v4416_v32, %v703_v33 }
 0x600   :  { %v720_v40 = vsel %vm507_vm1, %v719_v37, %v708_v34 }
 0x601   :  { %721 = vrot.lane.b32.xlu1 %v720_v40, %s4818_s6 }
 0x673   :  { %v722_v41 = vpop.permute.xlu1 %721 }
 0x674   :  { %4163 = vmatmul.mubr.msk.f32.vlgmr.msra.gmra.mxu0 %vm723_vm4, %v722_v41 }
 0x675   :  { %4177 = vmatpush3.msra.mxu0 %v5096_v21  ;;  %4192 = vmatprep.mubr.msk.f32.mxu0 %vm4816_vm3, %v4814_v1 }
 0x676   :  { %4178 = vmatprep.subr.mxu0 %v4814_v1 }
 0x677   :  { %4179 = vmatpush3.msra.mxu0 %v5098_v47 }
 0x678   :  { %4180 = vmatprep.subr.mxu0 %v4814_v1 }
 0x679   :  { %4181 = vmatpush3.msra.mxu0 %v5102_v49 }
 0x67a   :  { %4182 = vmatprep.subr.mxu0 %v4814_v1 }
 0x67b   :  { %4183 = vmatpush3.msra.mxu0 %v5106_v50 }
 0x67c   :  { %4184 = vmatprep.subr.mxu0 %v4814_v1 }
 0x67d   :  { %4185 = vmatpush3.msra.mxu0 %v5110_v51 }
 0x67e   :  { %4186 = vmatprep.subr.mxu0 %v4814_v1 }
 0x67f   :  { %4187 = vmatpush3.msra.mxu0 %v5114_v52 }
 0x680   :  { %4188 = vmatprep.subr.mxu0 %v4814_v1 }
 0x681   :  { %4189 = vmatpush3.msra.mxu0 %v5118_v53 }
 0x682   :  { %4190 = vmatprep.subr.mxu0 %v4814_v1 }
 0x683   :  { %4191 = vmatpush3.msra.mxu0 %v5122_v61 }
 0x684   :  { %4206 = vmatprep.subr.mxu0 %v4814_v1 }
 0x734   :  { %v792_v45 = vpop.f32.mrf.mxu0 }
 0x735   :  { %v796_v46 = vadd.f32 %v792_v45, %v716_v44 }
 0x736   :  { %v4164_v62 = vpop.f32.mrf.mxu0 }
 0x737   :  { %v3938_v2 = vmul.f32 -1.442695, %v796_v46 }
 0x739   :  { %4417 = vpow2.f32 %v3938_v2 }
 0x746   :  { %v4418_v3 = vpop.eup %4417 }
 0x747   :  { %v800_v10 = vadd.f32 1.0, %v4418_v3 }
 0x749   :  { %4419 = vrcp.f32 %v800_v10 }
 0x756   :  { %v4420_v14 = vpop.eup %4419 }
 0x757   :  { %v803_v16 = vmul.f32 2.0, %v4420_v14  ;;  %v805_v25 = vmul.f32 0.0, %v4420_v14 }
 0x759   :  { %v3939_v18 = vadd.f32 -1.0, %v803_v16 }
 0x75b   :  { %807 = vrot.lane.b32.xlu1 %v3939_v18, %s4819_s14 }
 0x7cd   :  { %v808_v20 = vpop.permute.xlu1 %807 }
 0x7ce   :  { %v810_v22 = vmul.f32 %v4420_v14, %v808_v20 }
 0x7d0   :  { %812 = vrot.lane.b32.xlu1 %v810_v22, %s4817_s5 }
 0x842   :  { %v813_v31 = vpop.permute.xlu1 %812 }
 0x843   :  { %v5166_v27 = vadd.f32 %v813_v31, %v805_v25 }
 0x845   :  { %4421 = vtanh.f32 %v5166_v27 }
 0x852   :  { %v4422_v28 = vpop.eup %4421 }
 0x853   :  { %818 = vrot.lane.b32.xlu1 %v4422_v28, %s4819_s14 }
 0x8c5   :  { %v819_v29 = vpop.permute.xlu1 %818 }
 0x8c6   :  { %v5170_v30 = vmul.f32 %v4420_v14, %v819_v29 }
 0x8c8   :  { %835 = vrot.lane.b32.xlu0 %v5170_v30, %s4817_s5 }
 0x93a   :  { %v836_v32 = vpop.permute.xlu0 %835 }
 0x93b   :  { %3940 = vmatmul.mubr.msk.f32.vlgmr.msra.gmra.mxu1 %vm150_vm0, %v836_v32 }
 0x93c   :  { %4166 = vmatpush3.msra.mxu1 %v5045_v56  ;;  %4173 = vmatprep.mubr.msk.f32.mxu1 %vm4816_vm3, %v4814_v1 }
 0x93d   :  { %4167 = vmatprep.subr.mxu1 %v4814_v1 }
 0x93e   :  { %4168 = vmatpush3.msra.mxu1 %v5047_v57 }
 0x93f   :  { %4169 = vmatprep.subr.mxu1 %v4814_v1 }
 0x940   :  { %4170 = vmatpush3.msra.mxu1 %v5053_v58 }
 0x941   :  { %4171 = vmatprep.subr.mxu1 %v4814_v1 }
 0x942   :  { %4172 = vmatpush3.msra.mxu1 %v5059_v59 }
 0x943   :  { %1304 = vmatprep.subr.mxu1 %v4934_v4 }
 0x9fb   :  { %v5185_v33 = vpop.f32.mrf.mxu1 }
 0x9fd   :  { %v907_v34 = vpop.f32.mrf.mxu1 }
 0x9fe   :  { %v911_v37 = vrot.slane %v907_v34, 7  ;;  %v915_v40 = vadd.f32 %v4995_v36, %v907_v34 }
 0xa00   :  { %v914_v41 = vadd.f32 %v911_v37, %v4998_v38  ;;  %v923_v44 = vrot.slane %v915_v40, %v4986_v26 }
 0xa02   :  { %v919_v45 = vrot.slane %v914_v41, %v4986_v26  ;;  %v925_v46 = vadd.f32 %v923_v44, %v5000_v39 }
 0xa04   :  { %v924_v62 = vadd.f32 %v919_v45, %v5004_v42  ;;  %4423 = vtanh.f32 %v925_v46 }
 0xa06   :  { %4425 = vtanh.f32 %v924_v62 }
 0xa11   :  { %v4424_v2 = vpop.eup %4423 }
 0xa12   :  { %v929_v3 = vmul.f32 %v4424_v2, %v5012_v48 }
 0xa13   :  { %v4426_v10 = vpop.eup %4425 }
 0xa14   :  { %v933_v14 = vsel %vm150_vm0, %v929_v3, 0.0  ;;  %v928_v16 = vmul.f32 %v4426_v10, %v5012_v48 }
 0xa15   :  { %934 = vadd.xlane.f32.xlu0 %v933_v14 }
 0xa16   :  { %v930_v18 = vsel %vm150_vm0, %v928_v16, 0.0 }
 0xa17   :  { %931 = vadd.xlane.f32.xlu1 %v930_v18 }
 0xa9e   :  { %v935_v20 = vpop.xlane.xlu0 %934 }
 0xa9f   :  { %v937_v22 = vadd.f32 %v935_v20, %v5018_v54 }
 0xaa0   :  { %v932_v25 = vpop.xlane.xlu1 %931 }
 0xaa1   :  { %v939_v31 = vmul.f32 %v937_v22, %v5024_v60  ;;  %v936_v28 = vadd.f32 %v932_v25, %v5018_v54 }
 0xaa3   :  { %v938_v29 = vmul.f32 %v936_v28, %v5020_v55  ;;  %946 = vperm.xlu1 %4396, %v939_v31  }
 0xaa5   :  { %943 = vperm.xlu0 %4395, %v938_v29  }
 0xb1e   :  { %v947_v32 = vpop.permute.xlu1 %946 }
 0xb1f   :  { %v955_v37 = vrot.slane %v947_v32, %v5029_v0 }
 0xb20   :  { %v944_v34 = vpop.permute.xlu0 %943 }
 0xb21   :  { %v951_v40 = vrot.slane %v944_v34, %v5029_v0 }
 0xb23   :  { %v956_v41 = vsel %vm507_vm1, %v955_v37, %v951_v40 }
 0xb24   :  { %v958_v44 = vsel %vm510_vm2, %v956_v41, -inf }
 0xb25   :  { %959 = vmax.xlane.f32.xlu1 %v958_v44 }
 0xbae   :  { %v960_v45 = vpop.xlane.xlu1 %959 }
 0xbaf   :  { %v965_v46 = vrot.slane %v960_v45, %v4980_v24  ;;  %v969_v62 = vrot.slane %v960_v45, %v4986_v26 }
 0xbb1   :  { %v972_v2 = vsub.f32 %v938_v29, %v965_v46  ;;  %v973_v3 = vsub.f32 %v939_v31, %v969_v62 }
 0xbb3   :  { %v974_v10 = vmul.f32 1.442695, %v972_v2  ;;  %v976_v14 = vmul.f32 1.442695, %v973_v3 }
 0xbb5   :  { %4427 = vpow2.f32 %v974_v10 }
 0xbb6   :  { %4429 = vpow2.f32 %v976_v14 }
 0xbc2   :  { %v4428_v16 = vpop.eup %4427 }
 0xbc3   :  { %v978_v18 = vmul.f32 %v4428_v16, %v5020_v55  ;;  %v4430_v20 = vpop.eup %4429 }
 0xbc4   :  { %v979_v22 = vmul.f32 %v4430_v20, %v5024_v60 }
 0xbc5   :  { %983 = vperm.xlu0 %4395, %v978_v18  }
 0xbc9   :  { %986 = vperm.xlu0 %4395, %v979_v22  }
 0xc40   :  { %v984_v25 = vpop.permute.xlu0 %983 }
 0xc41   :  { %v991_v32 = vrot.slane %v984_v25, %v5029_v0 }
 0xc44   :  { %v987_v28 = vpop.permute.xlu0 %986 }
 0xc45   :  { %v995_v34 = vrot.slane %v987_v28, %v5029_v0 }
 0xc47   :  { %v996_v31 = vsel %vm507_vm1, %v995_v34, %v991_v32 }
 0xc48   :  { %v998_v29 = vsel %vm510_vm2, %v996_v31, 0.0 }
 0xc49   :  { %999 = vadd.xlane.f32.xlu0 %v998_v29 }
 0xcd2   :  { %v1000_v37 = vpop.xlane.xlu0 %999 }
 0xcd3   :  { %v1001_v40 = vadd.f32 1e-06, %v1000_v37 }
 0xcd5   :  { %v1006_v41 = vrot.slane %v1001_v40, %v4980_v24  ;;  %v1010_v44 = vrot.slane %v1001_v40, %v4986_v26 }
 0xcd7   :  { %4431 = vrcp.f32 %v1006_v41 }
 0xcd8   :  { %4433 = vrcp.f32 %v1010_v44 }
 0xce4   :  { %v4432_v45 = vpop.eup %4431 }
 0xce5   :  { %v4434_v46 = vpop.eup %4433  ;;  %v1014_v62 = vmul.f32 %v4432_v45, %v978_v18 }
 0xce6   :  { %v1016_v2 = vmul.f32 %v4434_v46, %v979_v22  ;;  %v1141_v46 = vsel %vm1140_vm5, %v5086_v35, %v4965_v19 }
 0xce7   :  { %1019 = vperm.xlu1 %4396, %v1014_v62  }
 0xce8   :  { %1024 = vperm.xlu0 %4395, %v1016_v2  }
 0xd62   :  { %v1020_v3 = vpop.permute.xlu1 %1019 }
 0xd63   :  { %v1025_v10 = vpop.permute.xlu0 %1024  ;;  %v1027_v14 = vmul.f32 %v1020_v3, %v4941_v8 }
 0xd64   :  { %v1028_v16 = vmul.f32 %v1025_v10, %v4954_v13 }
 0xd65   :  { %v1029_v20 = vsel %vm150_vm0, %v1027_v14, 0.0 }
 0xd66   :  { %v1036_v25 = vsel %vm150_vm0, %v1028_v16, 0.0  ;;  %v1030_v28 = vrot.slane %v1029_v20, 4 }
 0xd67   :  { %v1037_v32 = vrot.slane %v1036_v25, 4 }
 0xd68   :  { %v1031_v34 = vadd.f32 %v1030_v28, %v1029_v20 }
 0xd69   :  { %v1038_v31 = vadd.f32 %v1037_v32, %v1036_v25 }
 0xd6a   :  { %v1032_v29 = vrot.slane %v1031_v34, 2 }
 0xd6b   :  { %v1039_v37 = vrot.slane %v1038_v31, 2 }
 0xd6c   :  { %v1033_v18 = vadd.f32 %v1032_v29, %v1031_v34 }
 0xd6d   :  { %v1040_v22 = vadd.f32 %v1039_v37, %v1038_v31 }
 0xd6e   :  { %v1034_v40 = vrot.slane %v1033_v18, 1 }
 0xd6f   :  { %v1041_v41 = vrot.slane %v1040_v22, 1 }
 0xd70   :  { %v1035_v44 = vadd.f32 %v1034_v40, %v1033_v18 }
 0xd71   :  { %v1042_v45 = vadd.f32 %v1041_v41, %v1040_v22  ;;  %v1158_v41 = vadd.f32 %v5160_v43, %v5185_v33 }
 0xd73   :  { %v1143_v8 = vsel %vm1140_vm5, %v1042_v45, %v1035_v44  ;;  %v1045_v13 = vsel %vm507_vm1, %v1042_v45, %v1035_v44 }
 0xd74   :  { %1144 = vrot.lane.b32.xlu1 %v1143_v8, %s4817_s5  ;;  %4174 = vmatmul.mubr.msk.f32.vlgmr.msra.gmra.mxu1 %vm150_vm0, %v1045_v13 }
 0xd75   :  { %1305 = vmatpush1.msra.mxu1 %v4936_v5  ;;  %1344 = vmatprep.mubr.f32.mxu1 %v4814_v1 }
 0xd76   :  { %1306 = vmatprep.subr.mxu1 %v4939_v7 }
 0xd77   :  { %1307 = vmatpush1.msra.mxu1 %v4944_v9 }
 0xd78   :  { %1308 = vmatprep.subr.mxu1 %v4947_v11 }
 0xd79   :  { %1309 = vmatpush1.msra.mxu1 %v4951_v12 }
 0xd7a   :  { %1310 = vmatprep.subr.mxu1 %v4957_v15 }
 0xd7b   :  { %1311 = vmatpush1.msra.mxu1 %v4960_v17 }
 0xd7c   :  { %4195 = vmatprep.subr.mxu1 %v4814_v1 }
 0xde6   :  { %v1145_v5 = vpop.permute.xlu1 %1144 }
 0xde7   :  { %v1147_v62 = vsel %vm150_vm0, %v1141_v46, %v1145_v5 }
 0xde8   :  { %1150 = vrot.lane.b32.xlu0 %v1147_v62, %s4817_s5  ;;  %v1149_v11 = vrot.slane %v1147_v62, 1 }
 0xe34   :  { %v1114_v7 = vpop.f32.mrf.mxu1 }
 0xe35   :  { %v1119_v9 = vrot.slane %v1114_v7, 7 }
 0xe36   :  { %v4175_v2 = vpop.f32.mrf.mxu1 }
 0xe37   :  { %1120 = vrot.lane.b32.xlu1 %v1119_v9, %s4817_s5 }
 0xe3b   :  { %1122 = vrot.lane.b32.xlu1 %v1114_v7, %s4817_s5 }
 0xe3f   :  { %1152 = vrot.lane.b32.xlu1 %v1149_v11, %s4817_s5 }
 0xe5a   :  { %v1151_v32 = vpop.permute.xlu0 %1150 }
 0xea9   :  { %v1121_v12 = vpop.permute.xlu1 %1120 }
 0xeaa   :  { %v1126_v15 = vadd.f32 %v1121_v12, %v5133_v6 }
 0xeac   :  { %v3942_v17 = vmul.f32 -1.442695, %v1126_v15 }
 0xead   :  { %v1123_v19 = vpop.permute.xlu1 %1122 }
 0xeae   :  { %4435 = vpow2.f32 %v3942_v17  ;;  %v1127_v3 = vadd.f32 %v1123_v19, %v5129_v63 }
 0xeb0   :  { %v3943_v10 = vmul.f32 -1.442695, %v1127_v3 }
 0xeb1   :  { %v1153_v29 = vpop.permute.xlu1 %1152 }
 0xeb2   :  { %4437 = vpow2.f32 %v3943_v10 }
 0xebb   :  { %v4436_v14 = vpop.eup %4435 }
 0xebc   :  { %v1134_v16 = vadd.f32 1.0, %v4436_v14 }
 0xebe   :  { %4439 = vrcp.f32 %v1134_v16 }
 0xebf   :  { %v4438_v20 = vpop.eup %4437 }
 0xec0   :  { %v1135_v25 = vadd.f32 1.0, %v4438_v20  ;;  %v1360_v20 = vsub.s32 2, %v4977_v23 }
 0xec2   :  { %4441 = vrcp.f32 %v1135_v25 }
 0xecb   :  { %v4440_v28 = vpop.eup %4439 }
 0xecc   :  { %v1156_v34 = vmul.f32 %v4440_v28, %v1151_v32 }
 0xece   :  { %v1161_v18 = vrot.slane %v1156_v34, 1 }
 0xecf   :  { %v4442_v31 = vpop.eup %4441 }
 0xed0   :  { %v1157_v37 = vmul.f32 %v4442_v31, %v1153_v29 }
 0xed2   :  { %v1162_v22 = vsel %vm507_vm1, %v1157_v37, %v1161_v18 }
 0xed3   :  { %1163 = vrot.lane.b32.xlu0 %v1162_v22, %s4818_s6 }
 0xf45   :  { %v1164_v40 = vpop.permute.xlu0 %1163 }
 0xf46   :  { %4193 = vmatmul.mubr.msk.f32.vlgmr.msra.gmra.mxu0 %vm723_vm4, %v1164_v40 }
 0xf47   :  { %4207 = vmatpush3.msra.mxu0 %v5096_v21  ;;  %4222 = vmatprep.mubr.msk.f32.mxu0 %vm4816_vm3, %v4814_v1 }
 0xf48   :  { %4208 = vmatprep.subr.mxu0 %v4814_v1 }
 0xf49   :  { %4209 = vmatpush3.msra.mxu0 %v5098_v47 }
 0xf4a   :  { %4210 = vmatprep.subr.mxu0 %v4814_v1 }
 0xf4b   :  { %4211 = vmatpush3.msra.mxu0 %v5102_v49 }
 0xf4c   :  { %4212 = vmatprep.subr.mxu0 %v4814_v1 }
 0xf4d   :  { %4213 = vmatpush3.msra.mxu0 %v5106_v50 }
 0xf4e   :  { %4214 = vmatprep.subr.mxu0 %v4814_v1 }
 0xf4f   :  { %4215 = vmatpush3.msra.mxu0 %v5110_v51 }
 0xf50   :  { %4216 = vmatprep.subr.mxu0 %v4814_v1 }
 0xf51   :  { %4217 = vmatpush3.msra.mxu0 %v5114_v52 }
 0xf52   :  { %4218 = vmatprep.subr.mxu0 %v4814_v1 }
 0xf53   :  { %4219 = vmatpush3.msra.mxu0 %v5118_v53 }
 0xf54   :  { %4220 = vmatprep.subr.mxu0 %v4814_v1 }
 0xf55   :  { %4221 = vmatpush3.msra.mxu0 %v5122_v61 }
 0xf56   :  { %4236 = vmatprep.subr.mxu0 %v4814_v1 }
0x1006   :  { %v1233_v44 = vpop.f32.mrf.mxu0 }
0x1007   :  { %v1237_v45 = vadd.f32 %v1233_v44, %v1158_v41 }
0x1008   :  { %v4194_v8 = vpop.f32.mrf.mxu0 }
0x1009   :  { %v3945_v13 = vmul.f32 -1.442695, %v1237_v45 }
0x100b   :  { %4443 = vpow2.f32 %v3945_v13 }
0x1018   :  { %v4444_v46 = vpop.eup %4443 }
0x1019   :  { %v1241_v5 = vadd.f32 1.0, %v4444_v46 }
0x101b   :  { %4445 = vrcp.f32 %v1241_v5 }
0x1028   :  { %v4446_v62 = vpop.eup %4445 }
0x1029   :  { %v1244_v7 = vmul.f32 2.0, %v4446_v62  ;;  %v1246_v12 = vmul.f32 %v4446_v62, %v5166_v27 }
0x102b   :  { %v3946_v9 = vadd.f32 -1.0, %v1244_v7 }
0x102d   :  { %1248 = vrot.lane.b32.xlu1 %v3946_v9, %s4819_s14 }
0x109f   :  { %v1249_v2 = vpop.permute.xlu1 %1248 }
0x10a0   :  { %v1251_v11 = vmul.f32 %v4446_v62, %v1249_v2 }
0x10a2   :  { %1253 = vrot.lane.b32.xlu0 %v1251_v11, %s4817_s5 }
0x1114   :  { %v1254_v33 = vpop.permute.xlu0 %1253 }
0x1115   :  { %v5266_v15 = vadd.f32 %v1254_v33, %v1246_v12 }
0x1117   :  { %4447 = vtanh.f32 %v5266_v15 }
0x1124   :  { %v4448_v17 = vpop.eup %4447 }
0x1125   :  { %1259 = vrot.lane.b32.xlu1 %v4448_v17, %s4819_s14 }
0x1197   :  { %v1260_v19 = vpop.permute.xlu1 %1259 }
0x1198   :  { %v5270_v3 = vmul.f32 %v4446_v62, %v1260_v19 }
0x119a   :  { %1276 = vrot.lane.b32.xlu0 %v5270_v3, %s4817_s5 }
0x120c   :  { %v1277_v10 = vpop.permute.xlu0 %1276 }
0x120d   :  { %3947 = vmatmul.mubr.msk.f32.vlgmr.msra.gmra.mxu1 %vm150_vm0, %v1277_v10 }
0x120e   :  { %4196 = vmatpush3.msra.mxu1 %v5045_v56  ;;  %4203 = vmatprep.mubr.msk.f32.mxu1 %vm4816_vm3, %v4814_v1 }
0x120f   :  { %4197 = vmatprep.subr.mxu1 %v4814_v1 }
0x1210   :  { %4198 = vmatpush3.msra.mxu1 %v5047_v57 }
0x1211   :  { %4199 = vmatprep.subr.mxu1 %v4814_v1 }
0x1212   :  { %4200 = vmatpush3.msra.mxu1 %v5053_v58 }
0x1213   :  { %4201 = vmatprep.subr.mxu1 %v4814_v1 }
0x1214   :  { %4202 = vmatpush3.msra.mxu1 %v5059_v59 }
0x1215   :  { %1748 = vmatprep.subr.mxu1 %v4934_v4 }
0x12cd   :  { %v5285_v27 = vpop.f32.mrf.mxu1 }
0x12cf   :  { %v1348_v56 = vpop.f32.mrf.mxu1 }
0x12d0   :  { %v1352_v14 = vrot.slane %v1348_v56, 6  ;;  %v1353_v16 = vrot.slane %v1348_v56, 7 }
0x12d2   :  { %v1356_v25 = vadd.f32 %v1352_v14, %v4998_v38  ;;  %v1357_v57 = vadd.f32 %v4995_v36, %v1353_v16 }
0x12d4   :  { %v1361_v28 = vrot.slane %v1356_v25, %v1360_v20  ;;  %v1365_v32 = vrot.slane %v1357_v57, %v1360_v20 }
0x12d6   :  { %v1366_v58 = vadd.f32 %v1361_v28, %v5004_v42  ;;  %v1367_v34 = vadd.f32 %v1365_v32, %v5000_v39 }
0x12d8   :  { %4449 = vtanh.f32 %v1366_v58 }
0x12d9   :  { %4451 = vtanh.f32 %v1367_v34 }
0x12e5   :  { %v4450_v4 = vpop.eup %4449 }
0x12e6   :  { %v4452_v59 = vpop.eup %4451  ;;  %v1370_v31 = vmul.f32 %v4450_v4, %v5012_v48 }
0x12e7   :  { %v1371_v29 = vmul.f32 %v4452_v59, %v5012_v48 }
0x12e8   :  { %v1372_v37 = vsel %vm150_vm0, %v1370_v31, 0.0 }
0x12e9   :  { %v1375_v18 = vsel %vm150_vm0, %v1371_v29, 0.0  ;;  %1373 = vadd.xlane.f32.xlu1 %v1372_v37 }
0x12ea   :  { %1376 = vadd.xlane.f32.xlu0 %v1375_v18 }
0x1372   :  { %v1374_v22 = vpop.xlane.xlu1 %1373 }
0x1373   :  { %v1377_v40 = vpop.xlane.xlu0 %1376  ;;  %v1378_v41 = vadd.f32 %v1374_v22, %v5018_v54 }
0x1374   :  { %v1379_v44 = vadd.f32 %v1377_v40, %v5018_v54 }
0x1375   :  { %v1380_v45 = vmul.f32 %v1378_v41, %v5020_v55 }
0x1376   :  { %v1381_v8 = vmul.f32 %v1379_v44, %v5024_v60  ;;  %v5314_v44 = vld [vmem:[#allocation5] sm:$0xff] }
0x1377   :  { %1385 = vperm.xlu0 %4395, %v1380_v45  }
0x1378   :  { %1388 = vperm.xlu1 %4396, %v1381_v8  }
0x13f2   :  { %v1386_v13 = vpop.permute.xlu0 %1385 }
0x13f3   :  { %v1393_v48 = vrot.slane %v1386_v13, %v5029_v0  ;;  %v1389_v46 = vpop.permute.xlu1 %1388 }
0x13f4   :  { %v1397_v5 = vrot.slane %v1389_v46, %v5029_v0 }
0x13f6   :  { %v1398_v62 = vsel %vm507_vm1, %v1397_v5, %v1393_v48 }
0x13f7   :  { %v1400_v7 = vsel %vm510_vm2, %v1398_v62, -inf }
0x13f8   :  { %1401 = vmax.xlane.f32.xlu1 %v1400_v7 }
0x1481   :  { %v1402_v9 = vpop.xlane.xlu1 %1401 }
0x1482   :  { %v1407_v2 = vrot.slane %v1402_v9, %v4980_v24  ;;  %v1411_v11 = vrot.slane %v1402_v9, %v4986_v26 }
0x1484   :  { %v1414_v12 = vsub.f32 %v1380_v45, %v1407_v2  ;;  %v1415_v33 = vsub.f32 %v1381_v8, %v1411_v11  ;;  %v5317_v8 = vld [vmem:[#allocation5 + $0x8] sm:$0xff] }
0x1486   :  { %v1416_v17 = vmul.f32 1.442695, %v1414_v12  ;;  %v1418_v19 = vmul.f32 1.442695, %v1415_v33 }
0x1488   :  { %4453 = vpow2.f32 %v1416_v17 }
0x1489   :  { %4455 = vpow2.f32 %v1418_v19 }
0x1495   :  { %v4454_v10 = vpop.eup %4453 }
0x1496   :  { %v1420_v56 = vmul.f32 %v4454_v10, %v5020_v55  ;;  %v4456_v14 = vpop.eup %4455 }
0x1497   :  { %v1421_v16 = vmul.f32 %v4456_v14, %v5024_v60 }
0x1498   :  { %1425 = vperm.xlu0 %4395, %v1420_v56  }
0x149c   :  { %1428 = vperm.xlu0 %4395, %v1421_v16  }
0x1513   :  { %v1426_v20 = vpop.permute.xlu0 %1425 }
0x1514   :  { %v1433_v57 = vrot.slane %v1426_v20, %v5029_v0  ;;  %v5326_v20 = vld [vmem:[#allocation10 + $0x30] sm:$0xff] }
0x1517   :  { %v1429_v25 = vpop.permute.xlu0 %1428 }
0x1518   :  { %v1437_v28 = vrot.slane %v1429_v25, %v5029_v0  ;;  %v5330_v25 = vld [vmem:[#allocation10 + $0x28] sm:$0xff] }
0x151a   :  { %v1438_v32 = vsel %vm507_vm1, %v1437_v28, %v1433_v57  ;;  %v5333_v57 = vld [vmem:[#allocation10 + $0x20] sm:$0xff]  ;;  %v5336_v28 = vld [vmem:[#allocation10 + $0x18] sm:$0xff] }
0x151b   :  { %v1440_v58 = vsel %vm510_vm2, %v1438_v32, 0.0  ;;  %v5339_v32 = vld [vmem:[#allocation10 + $0x10] sm:$0xff] }
0x151c   :  { %1441 = vadd.xlane.f32.xlu0 %v1440_v58  ;;  %v5342_v58 = vld [vmem:[#allocation10 + $0x8] sm:$0xff] }
0x15a5   :  { %v1442_v34 = vpop.xlane.xlu0 %1441 }
0x15a6   :  { %v1443_v4 = vadd.f32 1e-06, %v1442_v34  ;;  %v5345_v34 = vld [vmem:[#allocation10] sm:$0xff] }
0x15a8   :  { %v1448_v59 = vrot.slane %v1443_v4, %v4980_v24  ;;  %v1452_v31 = vrot.slane %v1443_v4, %v4986_v26  ;;  %v5349_v4 = vld [vmem:[#allocation3] sm:$0xff] }
0x15aa   :  { %4457 = vrcp.f32 %v1448_v59  ;;  %v1584_v59 = vsel %vm1583_vm6, %v5086_v35, %v5349_v4 }
0x15ab   :  { %4459 = vrcp.f32 %v1452_v31 }
0x15b7   :  { %v4458_v29 = vpop.eup %4457 }
0x15b8   :  { %v4460_v37 = vpop.eup %4459  ;;  %v1456_v18 = vmul.f32 %v4458_v29, %v1420_v56 }
0x15b9   :  { %v1458_v22 = vmul.f32 %v4460_v37, %v1421_v16 }
0x15ba   :  { %1461 = vperm.xlu1 %4396, %v1456_v18  }
0x15bb   :  { %1466 = vperm.xlu0 %4395, %v1458_v22  }
0x1635   :  { %v1462_v40 = vpop.permute.xlu1 %1461 }
0x1636   :  { %v1467_v41 = vpop.permute.xlu0 %1466  ;;  %v1469_v45 = vmul.f32 %v5314_v44, %v1462_v40 }
0x1637   :  { %v1470_v13 = vmul.f32 %v5317_v8, %v1467_v41 }
0x1638   :  { %v1471_v48 = vsel %vm150_vm0, %v1469_v45, 0.0 }
0x1639   :  { %v1478_v46 = vsel %vm150_vm0, %v1470_v13, 0.0  ;;  %v1472_v5 = vrot.slane %v1471_v48, 4 }
0x163a   :  { %v1479_v62 = vrot.slane %v1478_v46, 4 }
0x163b   :  { %v1473_v7 = vadd.f32 %v1472_v5, %v1471_v48 }
0x163c   :  { %v1480_v9 = vadd.f32 %v1479_v62, %v1478_v46 }
0x163d   :  { %v1474_v2 = vrot.slane %v1473_v7, 2 }
0x163e   :  { %v1481_v11 = vrot.slane %v1480_v9, 2 }
0x163f   :  { %v1475_v12 = vadd.f32 %v1474_v2, %v1473_v7 }
0x1640   :  { %v1482_v33 = vadd.f32 %v1481_v11, %v1480_v9 }
0x1641   :  { %v1476_v17 = vrot.slane %v1475_v12, 1 }
0x1642   :  { %v1483_v19 = vrot.slane %v1482_v33, 1 }
0x1643   :  { %v1477_v10 = vadd.f32 %v1476_v17, %v1475_v12 }
0x1644   :  { %v1484_v56 = vadd.f32 %v1483_v19, %v1482_v33 }
0x1646   :  { %v1586_v14 = vsel %vm1583_vm6, %v1484_v56, %v1477_v10  ;;  %v1487_v16 = vsel %vm507_vm1, %v1484_v56, %v1477_v10 }
0x1647   :  { %1587 = vrot.lane.b32.xlu1 %v1586_v14, %s4817_s5  ;;  %4204 = vmatmul.mubr.msk.f32.vlgmr.msra.gmra.mxu1 %vm150_vm0, %v1487_v16 }
0x1648   :  { %1749 = vmatpush1.msra.mxu1 %v5326_v20  ;;  %1788 = vmatprep.mubr.f32.mxu1 %v4814_v1 }
0x1649   :  { %1750 = vmatprep.subr.mxu1 %v5330_v25 }
0x164a   :  { %1751 = vmatpush1.msra.mxu1 %v5333_v57 }
0x164b   :  { %1752 = vmatprep.subr.mxu1 %v5336_v28 }
0x164c   :  { %1753 = vmatpush1.msra.mxu1 %v5339_v32 }
0x164d   :  { %1754 = vmatprep.subr.mxu1 %v5342_v58 }
0x164e   :  { %1755 = vmatpush1.msra.mxu1 %v5345_v34 }
0x164f   :  { %4225 = vmatprep.subr.mxu1 %v4814_v1 }
0x16b9   :  { %v1588_v31 = vpop.permute.xlu1 %1587 }
0x16ba   :  { %v1590_v29 = vsel %vm150_vm0, %v1584_v59, %v1588_v31 }
0x16bb   :  { %1593 = vrot.lane.b32.xlu0 %v1590_v29, %s4817_s5  ;;  %v1592_v41 = vrot.slane %v1590_v29, 1 }
0x1707   :  { %v1556_v37 = vpop.f32.mrf.mxu1 }
0x1708   :  { %v1561_v18 = vrot.slane %v1556_v37, 6  ;;  %v1562_v40 = vrot.slane %v1556_v37, 7 }
0x1709   :  { %v4205_v22 = vpop.f32.mrf.mxu1 }
0x170a   :  { %1563 = vrot.lane.b32.xlu1 %v1561_v18, %s4817_s5 }
0x170e   :  { %1565 = vrot.lane.b32.xlu1 %v1562_v40, %s4817_s5 }
0x1712   :  { %1595 = vrot.lane.b32.xlu1 %v1592_v41, %s4817_s5 }
0x172d   :  { %v1594_v33 = vpop.permute.xlu0 %1593 }
0x177c   :  { %v1564_v45 = vpop.permute.xlu1 %1563 }
0x177d   :  { %v1569_v13 = vadd.f32 %v1564_v45, %v5133_v6 }
0x177f   :  { %v3949_v48 = vmul.f32 -1.442695, %v1569_v13 }
0x1780   :  { %v1566_v46 = vpop.permute.xlu1 %1565 }
0x1781   :  { %4461 = vpow2.f32 %v3949_v48  ;;  %v1570_v5 = vadd.f32 %v1566_v46, %v5129_v63  ;;  %v5396_v46 = vld [vmem:[#allocation11 + $0x18] sm:$0xff] }
0x1783   :  { %v3950_v62 = vmul.f32 -1.442695, %v1570_v5  ;;  %v5406_v5 = vld [vmem:[#allocation11 + $0x8] sm:$0xff] }
0x1784   :  { %v1596_v10 = vpop.permute.xlu1 %1595 }
0x1785   :  { %4463 = vpow2.f32 %v3950_v62  ;;  %v5410_v62 = vld [vmem:[#allocation11] sm:$0xff] }
0x178e   :  { %v4462_v7 = vpop.eup %4461 }
0x178f   :  { %v1577_v9 = vadd.f32 1.0, %v4462_v7  ;;  %v5413_v7 = vld [vmem:[#allocation10 + $0x38] sm:$0xff] }
0x1791   :  { %4465 = vrcp.f32 %v1577_v9 }
0x1792   :  { %v4464_v2 = vpop.eup %4463 }
0x1793   :  { %v1578_v11 = vadd.f32 1.0, %v4464_v2 }
0x1795   :  { %4467 = vrcp.f32 %v1578_v11 }
0x179e   :  { %v4466_v12 = vpop.eup %4465 }
0x179f   :  { %v1599_v17 = vmul.f32 %v4466_v12, %v1594_v33  ;;  %v1804_v33 = vsub.s32 3, %v4977_v23 }
0x17a1   :  { %v1604_v16 = vrot.slane %v1599_v17, 2 }
0x17a2   :  { %v4468_v19 = vpop.eup %4467 }
0x17a3   :  { %v1600_v56 = vmul.f32 %v4468_v19, %v1596_v10 }
0x17a5   :  { %v1605_v14 = vrot.slane %v1600_v56, 1 }
0x17a7   :  { %v1606_v59 = vsel %vm507_vm1, %v1605_v14, %v1604_v16 }
0x17a8   :  { %1607 = vrot.lane.b32.xlu0 %v1606_v59, %s4818_s6 }
0x181a   :  { %v1608_v31 = vpop.permute.xlu0 %1607 }
0x181b   :  { %4223 = vmatmul.mubr.msk.f32.vlgmr.msra.gmra.mxu0 %vm723_vm4, %v1608_v31 }
0x181c   :  { %4237 = vmatpush3.msra.mxu0 %v5096_v21  ;;  %4252 = vmatprep.mubr.msk.f32.mxu0 %vm4816_vm3, %v4814_v1  ;;  %v1601_v21 = vadd.f32 %v5160_v43, %v5285_v27 }
0x181d   :  { %4238 = vmatprep.subr.mxu0 %v4814_v1 }
0x181e   :  { %4239 = vmatpush3.msra.mxu0 %v5098_v47 }
0x181f   :  { %4240 = vmatprep.subr.mxu0 %v4814_v1 }
0x1820   :  { %4241 = vmatpush3.msra.mxu0 %v5102_v49 }
0x1821   :  { %4242 = vmatprep.subr.mxu0 %v4814_v1 }
0x1822   :  { %4243 = vmatpush3.msra.mxu0 %v5106_v50 }
0x1823   :  { %4244 = vmatprep.subr.mxu0 %v4814_v1 }
0x1824   :  { %4245 = vmatpush3.msra.mxu0 %v5110_v51 }
0x1825   :  { %4246 = vmatprep.subr.mxu0 %v4814_v1 }
0x1826   :  { %4247 = vmatpush3.msra.mxu0 %v5114_v52 }
0x1827   :  { %4248 = vmatprep.subr.mxu0 %v4814_v1 }
0x1828   :  { %4249 = vmatpush3.msra.mxu0 %v5118_v53 }
0x1829   :  { %4250 = vmatprep.subr.mxu0 %v4814_v1 }
0x182a   :  { %4251 = vmatpush3.msra.mxu0 %v5122_v61 }
0x182b   :  { %4266 = vmatprep.subr.mxu0 %v4814_v1 }
0x18db   :  { %v1677_v47 = vpop.f32.mrf.mxu0 }
0x18dc   :  { %v1681_v49 = vadd.f32 %v1677_v47, %v1601_v21  ;;  %v5426_v21 = vld [vmem:[%s5970_s7] ss:$0 sm:$0xff] }
0x18dd   :  { %v4224_v50 = vpop.f32.mrf.mxu0 }
0x18de   :  { %v3952_v51 = vmul.f32 -1.442695, %v1681_v49 }
0x18e0   :  { %4469 = vpow2.f32 %v3952_v51 }
0x18ed   :  { %v4470_v29 = vpop.eup %4469 }
0x18ee   :  { %v1685_v52 = vadd.f32 1.0, %v4470_v29 }
0x18f0   :  { %4471 = vrcp.f32 %v1685_v52 }
0x18fd   :  { %v4472_v37 = vpop.eup %4471 }
0x18fe   :  { %v1688_v18 = vmul.f32 2.0, %v4472_v37  ;;  %v1690_v40 = vmul.f32 %v4472_v37, %v5266_v15  ;;  %v5402_v15 = vld [vmem:[#allocation11 + $0x10] sm:$0xff] }
0x1900   :  { %v3953_v53 = vadd.f32 -1.0, %v1688_v18 }
0x1902   :  { %1692 = vrot.lane.b32.xlu1 %v3953_v53, %s4819_s14 }
0x1974   :  { %v1693_v22 = vpop.permute.xlu1 %1692 }
0x1975   :  { %v1695_v61 = vmul.f32 %v4472_v37, %v1693_v22 }
0x1977   :  { %1697 = vrot.lane.b32.xlu0 %v1695_v61, %s4817_s5 }
0x19e9   :  { %v1698_v43 = vpop.permute.xlu0 %1697 }
0x19ea   :  { %v5387_v27 = vadd.f32 %v1698_v43, %v1690_v40 }
0x19ec   :  { %4473 = vtanh.f32 %v5387_v27 }
0x19f9   :  { %v4474_v41 = vpop.eup %4473 }
0x19fa   :  { %1703 = vrot.lane.b32.xlu1 %v4474_v41, %s4819_s14 }
0x1a6c   :  { %v1704_v45 = vpop.permute.xlu1 %1703 }
0x1a6d   :  { %v5391_v13 = vmul.f32 %v4472_v37, %v1704_v45 }
0x1a6f   :  { %1720 = vrot.lane.b32.xlu0 %v5391_v13, %s4817_s5 }
0x1ae1   :  { %v1721_v48 = vpop.permute.xlu0 %1720 }
0x1ae2   :  { %3954 = vmatmul.mubr.msk.f32.vlgmr.msra.gmra.mxu1 %vm150_vm0, %v1721_v48 }
0x1ae3   :  { %4226 = vmatpush3.msra.mxu1 %v5396_v46  ;;  %4233 = vmatprep.mubr.msk.f32.mxu1 %vm4816_vm3, %v4814_v1 }
0x1ae4   :  { %4227 = vmatprep.subr.mxu1 %v4814_v1 }
0x1ae5   :  { %4228 = vmatpush3.msra.mxu1 %v5402_v15 }
0x1ae6   :  { %4229 = vmatprep.subr.mxu1 %v4814_v1 }
0x1ae7   :  { %4230 = vmatpush3.msra.mxu1 %v5406_v5 }
0x1ae8   :  { %4231 = vmatprep.subr.mxu1 %v4814_v1 }
0x1ae9   :  { %4232 = vmatpush3.msra.mxu1 %v5410_v62 }
0x1aea   :  { %2182 = vmatprep.subr.mxu1 %v5413_v7 }
0x1ba2   :  { %v5416_v9 = vpop.f32.mrf.mxu1 }
0x1ba4   :  { %v1792_v2 = vpop.f32.mrf.mxu1 }
0x1ba5   :  { %v1796_v11 = vrot.slane %v1792_v2, 5  ;;  %v1797_v12 = vrot.slane %v1792_v2, 6 }
0x1ba7   :  { %v1800_v17 = vadd.f32 %v1796_v11, %v4998_v38  ;;  %v1801_v19 = vadd.f32 %v4995_v36, %v1797_v12 }
0x1ba9   :  { %v1805_v10 = vrot.slane %v1800_v17, %v1804_v33  ;;  %v1809_v56 = vrot.slane %v1801_v19, %v1804_v33 }
0x1bab   :  { %v1810_v14 = vadd.f32 %v1805_v10, %v5004_v42  ;;  %v1811_v16 = vadd.f32 %v1809_v56, %v5000_v39 }
0x1bad   :  { %4475 = vtanh.f32 %v1810_v14 }
0x1bae   :  { %4477 = vtanh.f32 %v1811_v16 }
0x1bba   :  { %v4476_v59 = vpop.eup %4475 }
0x1bbb   :  { %v4478_v31 = vpop.eup %4477  ;;  %v1814_v47 = vmul.f32 %v5426_v21, %v4476_v59 }
0x1bbc   :  { %v1815_v49 = vmul.f32 %v5426_v21, %v4478_v31 }
0x1bbd   :  { %v1816_v50 = vsel %vm150_vm0, %v1814_v47, 0.0 }
0x1bbe   :  { %v1819_v51 = vsel %vm150_vm0, %v1815_v49, 0.0  ;;  %1817 = vadd.xlane.f32.xlu1 %v1816_v50 }
0x1bbf   :  { %1820 = vadd.xlane.f32.xlu0 %v1819_v51 }
0x1c47   :  { %v1818_v29 = vpop.xlane.xlu1 %1817 }
0x1c48   :  { %v1821_v52 = vpop.xlane.xlu0 %1820  ;;  %v1822_v37 = vadd.f32 %v1818_v29, %v5018_v54 }
0x1c49   :  { %v1823_v18 = vadd.f32 %v1821_v52, %v5018_v54 }
0x1c4a   :  { %v1824_v53 = vmul.f32 %v1822_v37, %v5020_v55 }
0x1c4b   :  { %v1825_v22 = vmul.f32 %v1823_v18, %v5024_v60 }
0x1c4c   :  { %1829 = vperm.xlu0 %4395, %v1824_v53  }
0x1c4d   :  { %1832 = vperm.xlu1 %4396, %v1825_v22  }
0x1cc7   :  { %v1830_v61 = vpop.permute.xlu0 %1829 }
0x1cc8   :  { %v1837_v40 = vrot.slane %v1830_v61, %v5029_v0  ;;  %v1833_v43 = vpop.permute.xlu1 %1832 }
0x1cc9   :  { %v1841_v41 = vrot.slane %v1833_v43, %v5029_v0 }
0x1ccb   :  { %v1842_v45 = vsel %vm507_vm1, %v1841_v41, %v1837_v40 }
0x1ccc   :  { %v1844_v48 = vsel %vm510_vm2, %v1842_v45, -inf }
0x1ccd   :  { %1845 = vmax.xlane.f32.xlu1 %v1844_v48 }
0x1d56   :  { %v1846_v2 = vpop.xlane.xlu1 %1845 }
0x1d57   :  { %v1851_v11 = vrot.slane %v1846_v2, %v4980_v24  ;;  %v1855_v12 = vrot.slane %v1846_v2, %v4986_v26 }
0x1d59   :  { %v1858_v33 = vsub.f32 %v1824_v53, %v1851_v11  ;;  %v1859_v17 = vsub.f32 %v1825_v22, %v1855_v12 }
0x1d5b   :  { %v1860_v19 = vmul.f32 1.442695, %v1858_v33  ;;  %v1862_v10 = vmul.f32 1.442695, %v1859_v17 }
0x1d5d   :  { %4479 = vpow2.f32 %v1860_v19 }
0x1d5e   :  { %4481 = vpow2.f32 %v1862_v10 }
0x1d6a   :  { %v4480_v56 = vpop.eup %4479 }
0x1d6b   :  { %v1864_v14 = vmul.f32 %v4480_v56, %v5020_v55  ;;  %v4482_v16 = vpop.eup %4481 }
0x1d6c   :  { %v1865_v59 = vmul.f32 %v4482_v16, %v5024_v60 }
0x1d6d   :  { %1869 = vperm.xlu0 %4395, %v1864_v14  }
0x1d71   :  { %1872 = vperm.xlu0 %4395, %v1865_v59  }
0x1de8   :  { %v1870_v31 = vpop.permute.xlu0 %1869 }
0x1de9   :  { %v1877_v49 = vrot.slane %v1870_v31, %v5029_v0 }
0x1dec   :  { %v1873_v47 = vpop.permute.xlu0 %1872 }
0x1ded   :  { %v1881_v50 = vrot.slane %v1873_v47, %v5029_v0 }
0x1def   :  { %v1882_v51 = vsel %vm507_vm1, %v1881_v50, %v1877_v49 }
0x1df0   :  { %v1884_v29 = vsel %vm510_vm2, %v1882_v51, 0.0 }
0x1df1   :  { %1885 = vadd.xlane.f32.xlu0 %v1884_v29 }
0x1e7a   :  { %v1886_v52 = vpop.xlane.xlu0 %1885 }
0x1e7b   :  { %v1887_v37 = vadd.f32 1e-06, %v1886_v52  ;;  %v2028_v52 = vsel %vm2027_vm7, %v5086_v35, %v5349_v4 }
0x1e7d   :  { %v1892_v18 = vrot.slane %v1887_v37, %v4980_v24  ;;  %v1896_v53 = vrot.slane %v1887_v37, %v4986_v26 }
0x1e7f   :  { %4483 = vrcp.f32 %v1892_v18 }
0x1e80   :  { %4485 = vrcp.f32 %v1896_v53 }
0x1e8c   :  { %v4484_v22 = vpop.eup %4483 }
0x1e8d   :  { %v4486_v61 = vpop.eup %4485  ;;  %v1900_v40 = vmul.f32 %v4484_v22, %v1864_v14 }
0x1e8e   :  { %v1902_v43 = vmul.f32 %v4486_v61, %v1865_v59 }
0x1e8f   :  { %1905 = vperm.xlu1 %4396, %v1900_v40  }
0x1e90   :  { %1910 = vperm.xlu0 %4395, %v1902_v43  }
0x1f0a   :  { %v1906_v41 = vpop.permute.xlu1 %1905 }
0x1f0b   :  { %v1911_v45 = vpop.permute.xlu0 %1910  ;;  %v1913_v48 = vmul.f32 %v5314_v44, %v1906_v41 }
0x1f0c   :  { %v1914_v2 = vmul.f32 %v5317_v8, %v1911_v45 }
0x1f0d   :  { %v1915_v11 = vsel %vm150_vm0, %v1913_v48, 0.0 }
0x1f0e   :  { %v1922_v12 = vsel %vm150_vm0, %v1914_v2, 0.0  ;;  %v1916_v33 = vrot.slane %v1915_v11, 4 }
0x1f0f   :  { %v1923_v17 = vrot.slane %v1922_v12, 4 }
0x1f10   :  { %v1917_v19 = vadd.f32 %v1916_v33, %v1915_v11 }
0x1f11   :  { %v1924_v10 = vadd.f32 %v1923_v17, %v1922_v12 }
0x1f12   :  { %v1918_v56 = vrot.slane %v1917_v19, 2 }
0x1f13   :  { %v1925_v16 = vrot.slane %v1924_v10, 2 }
0x1f14   :  { %v1919_v14 = vadd.f32 %v1918_v56, %v1917_v19 }
0x1f15   :  { %v1926_v59 = vadd.f32 %v1925_v16, %v1924_v10 }
0x1f16   :  { %v1920_v31 = vrot.slane %v1919_v14, 1 }
0x1f17   :  { %v1927_v47 = vrot.slane %v1926_v59, 1 }
0x1f18   :  { %v1921_v49 = vadd.f32 %v1920_v31, %v1919_v14 }
0x1f19   :  { %v1928_v50 = vadd.f32 %v1927_v47, %v1926_v59 }
0x1f1b   :  { %v2030_v51 = vsel %vm2027_vm7, %v1928_v50, %v1921_v49  ;;  %v1931_v29 = vsel %vm507_vm1, %v1928_v50, %v1921_v49 }
0x1f1c   :  { %2031 = vrot.lane.b32.xlu1 %v2030_v51, %s4817_s5  ;;  %4234 = vmatmul.mubr.msk.f32.vlgmr.msra.gmra.mxu1 %vm150_vm0, %v1931_v29 }
0x1f1d   :  { %2183 = vmatpush1.msra.mxu1 %v5326_v20  ;;  %2222 = vmatprep.mubr.f32.mxu1 %v4814_v1 }
0x1f1e   :  { %2184 = vmatprep.subr.mxu1 %v5330_v25 }
0x1f1f   :  { %2185 = vmatpush1.msra.mxu1 %v5333_v57 }
0x1f20   :  { %2186 = vmatprep.subr.mxu1 %v5336_v28 }
0x1f21   :  { %2187 = vmatpush1.msra.mxu1 %v5339_v32 }
0x1f22   :  { %2188 = vmatprep.subr.mxu1 %v5342_v58 }
0x1f23   :  { %2189 = vmatpush1.msra.mxu1 %v5345_v34 }
0x1f24   :  { %4255 = vmatprep.subr.mxu1 %v4814_v1 }
0x1f8e   :  { %v2032_v37 = vpop.permute.xlu1 %2031 }
0x1f8f   :  { %v2034_v18 = vsel %vm150_vm0, %v2028_v52, %v2032_v37  ;;  %v5478_v52 = vld [vmem:[#allocation13 + $0x38] sm:$0xff]  ;;  %v5484_v37 = vld [vmem:[#allocation13 + $0x30] sm:$0xff] }
0x1f90   :  { %2037 = vrot.lane.b32.xlu0 %v2034_v18, %s4817_s5  ;;  %v2036_v43 = vrot.slane %v2034_v18, 1  ;;  %v5488_v18 = vld [vmem:[#allocation13 + $0x28] sm:$0xff] }
0x1fdc   :  { %v2000_v53 = vpop.f32.mrf.mxu1 }
0x1fdd   :  { %v2005_v22 = vrot.slane %v2000_v53, 5  ;;  %v2006_v40 = vrot.slane %v2000_v53, 6  ;;  %v5492_v53 = vld [vmem:[#allocation13 + $0x20] sm:$0xff] }
0x1fde   :  { %v4235_v61 = vpop.f32.mrf.mxu1 }
0x1fdf   :  { %2007 = vrot.lane.b32.xlu1 %v2005_v22, %s4817_s5  ;;  %v5496_v22 = vld [vmem:[#allocation13 + $0x18] sm:$0xff]  ;;  %v5500_v61 = vld [vmem:[#allocation13 + $0x10] sm:$0xff] }
0x1fe3   :  { %2009 = vrot.lane.b32.xlu1 %v2006_v40, %s4817_s5  ;;  %v5504_v40 = vld [vmem:[#allocation13 + $0x8] sm:$0xff] }
0x1fe7   :  { %2039 = vrot.lane.b32.xlu1 %v2036_v43, %s4817_s5  ;;  %v5508_v43 = vld [vmem:[#allocation13] sm:$0xff] }
0x2002   :  { %v2038_v16 = vpop.permute.xlu0 %2037 }
0x2051   :  { %v2008_v41 = vpop.permute.xlu1 %2007 }
0x2052   :  { %v2013_v45 = vadd.f32 %v2008_v41, %v5133_v6  ;;  %v5515_v41 = vld [vmem:[%s5975_s12] ss:$0 sm:$0xff] }
0x2054   :  { %v3956_v48 = vmul.f32 -1.442695, %v2013_v45  ;;  %v2045_v45 = vadd.f32 %v5515_v41, %v5416_v9 }
0x2055   :  { %v2010_v2 = vpop.permute.xlu1 %2009 }
0x2056   :  { %4487 = vpow2.f32 %v3956_v48  ;;  %v2014_v11 = vadd.f32 %v2010_v2, %v5129_v63 }
0x2058   :  { %v3957_v12 = vmul.f32 -1.442695, %v2014_v11 }
0x2059   :  { %v2040_v31 = vpop.permute.xlu1 %2039 }
0x205a   :  { %4489 = vpow2.f32 %v3957_v12 }
0x2063   :  { %v4488_v33 = vpop.eup %4487 }
0x2064   :  { %v2021_v17 = vadd.f32 1.0, %v4488_v33 }
0x2066   :  { %4491 = vrcp.f32 %v2021_v17 }
0x2067   :  { %v4490_v19 = vpop.eup %4489 }
0x2068   :  { %v2022_v10 = vadd.f32 1.0, %v4490_v19 }
0x206a   :  { %4493 = vrcp.f32 %v2022_v10 }
0x2073   :  { %v4492_v56 = vpop.eup %4491 }
0x2074   :  { %v2043_v14 = vmul.f32 %v4492_v56, %v2038_v16 }
0x2076   :  { %v2048_v50 = vrot.slane %v2043_v14, 3 }
0x2077   :  { %v4494_v59 = vpop.eup %4493 }
0x2078   :  { %v2044_v47 = vmul.f32 %v4494_v59, %v2040_v31 }
0x207a   :  { %v2049_v49 = vrot.slane %v2044_v47, 2 }
0x207c   :  { %v2050_v51 = vsel %vm507_vm1, %v2049_v49, %v2048_v50 }
0x207d   :  { %2051 = vrot.lane.b32.xlu0 %v2050_v51, %s4818_s6 }
0x20ef   :  { %v2052_v29 = vpop.permute.xlu0 %2051 }
0x20f0   :  { %4253 = vmatmul.mubr.msk.f32.vlgmr.msra.gmra.mxu0 %vm723_vm4, %v2052_v29 }
0x20f1   :  { %4267 = vmatpush3.msra.mxu0 %v5478_v52  ;;  %4282 = vmatprep.mubr.msk.f32.mxu0 %vm4816_vm3, %v4814_v1 }
0x20f2   :  { %4268 = vmatprep.subr.mxu0 %v4814_v1 }
0x20f3   :  { %4269 = vmatpush3.msra.mxu0 %v5484_v37 }
0x20f4   :  { %4270 = vmatprep.subr.mxu0 %v4814_v1 }
0x20f5   :  { %4271 = vmatpush3.msra.mxu0 %v5488_v18 }
0x20f6   :  { %4272 = vmatprep.subr.mxu0 %v4814_v1 }
0x20f7   :  { %4273 = vmatpush3.msra.mxu0 %v5492_v53 }
0x20f8   :  { %4274 = vmatprep.subr.mxu0 %v4814_v1 }
0x20f9   :  { %4275 = vmatpush3.msra.mxu0 %v5496_v22 }
0x20fa   :  { %4276 = vmatprep.subr.mxu0 %v4814_v1 }
0x20fb   :  { %4277 = vmatpush3.msra.mxu0 %v5500_v61 }
0x20fc   :  { %4278 = vmatprep.subr.mxu0 %v4814_v1 }
0x20fd   :  { %4279 = vmatpush3.msra.mxu0 %v5504_v40 }
0x20fe   :  { %4280 = vmatprep.subr.mxu0 %v4814_v1 }
0x20ff   :  { %4281 = vmatpush3.msra.mxu0 %v5508_v43 }
0x2100   :  { %4296 = vmatprep.subr.mxu0 %v4814_v1 }
0x21b0   :  { %v2121_v48 = vpop.f32.mrf.mxu0 }
0x21b1   :  { %v2125_v2 = vadd.f32 %v2121_v48, %v2045_v45 }
0x21b2   :  { %v4254_v11 = vpop.f32.mrf.mxu0 }
0x21b3   :  { %v3959_v12 = vmul.f32 -1.442695, %v2125_v2  ;;  %v2238_v2 = vsub.s32 4, %v4977_v23 }
0x21b5   :  { %4495 = vpow2.f32 %v3959_v12 }
0x21c2   :  { %v4496_v33 = vpop.eup %4495 }
0x21c3   :  { %v2129_v17 = vadd.f32 1.0, %v4496_v33 }
0x21c5   :  { %4497 = vrcp.f32 %v2129_v17 }
0x21d2   :  { %v4498_v19 = vpop.eup %4497 }
0x21d3   :  { %v2132_v10 = vmul.f32 2.0, %v4498_v19  ;;  %v2134_v59 = vmul.f32 %v4498_v19, %v5387_v27 }
0x21d5   :  { %v3960_v56 = vadd.f32 -1.0, %v2132_v10 }
0x21d7   :  { %2136 = vrot.lane.b32.xlu1 %v3960_v56, %s4819_s14 }
0x2249   :  { %v2137_v16 = vpop.permute.xlu1 %2136 }
0x224a   :  { %v2139_v14 = vmul.f32 %v4498_v19, %v2137_v16 }
0x224c   :  { %2141 = vrot.lane.b32.xlu0 %v2139_v14, %s4817_s5 }
0x22be   :  { %v2142_v9 = vpop.permute.xlu0 %2141 }
0x22bf   :  { %v5522_v31 = vadd.f32 %v2142_v9, %v2134_v59 }
0x22c1   :  { %4499 = vtanh.f32 %v5522_v31 }
0x22ce   :  { %v4500_v47 = vpop.eup %4499 }
0x22cf   :  { %2147 = vrot.lane.b32.xlu1 %v4500_v47, %s4819_s14 }
0x2341   :  { %v2148_v49 = vpop.permute.xlu1 %2147 }
0x2342   :  { %v5526_v50 = vmul.f32 %v4498_v19, %v2148_v49 }
0x2344   :  { %2154 = vrot.lane.b32.xlu0 %v5526_v50, %s4817_s5 }
0x23b6   :  { %v2155_v51 = vpop.permute.xlu0 %2154 }
0x23b7   :  { %3961 = vmatmul.mubr.msk.f32.vlgmr.msra.gmra.mxu1 %vm150_vm0, %v2155_v51 }
0x23b8   :  { %4256 = vmatpush3.msra.mxu1 %v5396_v46  ;;  %4263 = vmatprep.mubr.msk.f32.mxu1 %vm4816_vm3, %v4814_v1 }
0x23b9   :  { %4257 = vmatprep.subr.mxu1 %v4814_v1 }
0x23ba   :  { %4258 = vmatpush3.msra.mxu1 %v5402_v15 }
0x23bb   :  { %4259 = vmatprep.subr.mxu1 %v4814_v1 }
0x23bc   :  { %4260 = vmatpush3.msra.mxu1 %v5406_v5 }
0x23bd   :  { %4261 = vmatprep.subr.mxu1 %v4814_v1 }
0x23be   :  { %4262 = vmatpush3.msra.mxu1 %v5410_v62 }
0x23bf   :  { %2625 = vmatprep.subr.mxu1 %v5413_v7 }
0x2477   :  { %v5541_v27 = vpop.f32.mrf.mxu1 }
0x2479   :  { %v2226_v29 = vpop.f32.mrf.mxu1 }
0x247a   :  { %v2230_v45 = vrot.slane %v2226_v29, 4  ;;  %v2231_v48 = vrot.slane %v2226_v29, 5 }
0x247c   :  { %v2234_v11 = vadd.f32 %v2230_v45, %v4998_v38  ;;  %v2235_v12 = vadd.f32 %v4995_v36, %v2231_v48 }
0x247e   :  { %v2239_v33 = vrot.slane %v2234_v11, %v2238_v2  ;;  %v2243_v17 = vrot.slane %v2235_v12, %v2238_v2 }
0x2480   :  { %v2244_v19 = vadd.f32 %v2239_v33, %v5004_v42  ;;  %v2245_v10 = vadd.f32 %v2243_v17, %v5000_v39 }
0x2482   :  { %4501 = vtanh.f32 %v2244_v19 }
0x2483   :  { %4503 = vtanh.f32 %v2245_v10 }
0x248f   :  { %v4502_v56 = vpop.eup %4501 }
0x2490   :  { %v4504_v16 = vpop.eup %4503  ;;  %v2248_v14 = vmul.f32 %v5426_v21, %v4502_v56 }
0x2491   :  { %v2249_v59 = vmul.f32 %v5426_v21, %v4504_v16 }
0x2492   :  { %v2250_v9 = vsel %vm150_vm0, %v2248_v14, 0.0 }
0x2493   :  { %v2253_v47 = vsel %vm150_vm0, %v2249_v59, 0.0  ;;  %2251 = vadd.xlane.f32.xlu1 %v2250_v9 }
0x2494   :  { %2254 = vadd.xlane.f32.xlu0 %v2253_v47 }
0x251c   :  { %v2252_v49 = vpop.xlane.xlu1 %2251 }
0x251d   :  { %v2255_v51 = vpop.xlane.xlu0 %2254  ;;  %v2256_v29 = vadd.f32 %v2252_v49, %v5018_v54 }
0x251e   :  { %v2257_v45 = vadd.f32 %v2255_v51, %v5018_v54 }
0x251f   :  { %v2258_v48 = vmul.f32 %v2256_v29, %v5020_v55 }
0x2520   :  { %v2259_v2 = vmul.f32 %v2257_v45, %v5024_v60 }
0x2521   :  { %2263 = vperm.xlu0 %4395, %v2258_v48  }
0x2522   :  { %2266 = vperm.xlu1 %4396, %v2259_v2  }
0x259c   :  { %v2264_v11 = vpop.permute.xlu0 %2263 }
0x259d   :  { %v2271_v12 = vrot.slane %v2264_v11, %v5029_v0  ;;  %v2267_v33 = vpop.permute.xlu1 %2266 }
0x259e   :  { %v2275_v17 = vrot.slane %v2267_v33, %v5029_v0 }
0x25a0   :  { %v2276_v19 = vsel %vm507_vm1, %v2275_v17, %v2271_v12 }
0x25a1   :  { %v2278_v10 = vsel %vm510_vm2, %v2276_v19, -inf }
0x25a2   :  { %2279 = vmax.xlane.f32.xlu1 %v2278_v10 }
0x262b   :  { %v2280_v56 = vpop.xlane.xlu1 %2279 }
0x262c   :  { %v2285_v16 = vrot.slane %v2280_v56, %v4980_v24  ;;  %v2289_v14 = vrot.slane %v2280_v56, %v4986_v26 }
0x262e   :  { %v2292_v59 = vsub.f32 %v2258_v48, %v2285_v16  ;;  %v2293_v9 = vsub.f32 %v2259_v2, %v2289_v14 }
0x2630   :  { %v2294_v47 = vmul.f32 1.442695, %v2292_v59  ;;  %v2296_v49 = vmul.f32 1.442695, %v2293_v9 }
0x2632   :  { %4505 = vpow2.f32 %v2294_v47 }
0x2633   :  { %4507 = vpow2.f32 %v2296_v49 }
0x263f   :  { %v4506_v51 = vpop.eup %4505 }
0x2640   :  { %v2298_v29 = vmul.f32 %v4506_v51, %v5020_v55  ;;  %v4508_v45 = vpop.eup %4507 }
0x2641   :  { %v2299_v11 = vmul.f32 %v4508_v45, %v5024_v60 }
0x2642   :  { %2303 = vperm.xlu0 %4395, %v2298_v29  }
0x2646   :  { %2306 = vperm.xlu0 %4395, %v2299_v11  }
0x26bd   :  { %v2304_v12 = vpop.permute.xlu0 %2303 }
0x26be   :  { %v2311_v17 = vrot.slane %v2304_v12, %v5029_v0 }
0x26c1   :  { %v2307_v33 = vpop.permute.xlu0 %2306 }
0x26c2   :  { %v2315_v19 = vrot.slane %v2307_v33, %v5029_v0 }
0x26c4   :  { %v2316_v48 = vsel %vm507_vm1, %v2315_v19, %v2311_v17 }
0x26c5   :  { %v2318_v2 = vsel %vm510_vm2, %v2316_v48, 0.0 }
0x26c6   :  { %2319 = vadd.xlane.f32.xlu0 %v2318_v2 }
0x274f   :  { %v2320_v10 = vpop.xlane.xlu0 %2319 }
0x2750   :  { %v2321_v56 = vadd.f32 1e-06, %v2320_v10 }
0x2752   :  { %v2326_v16 = vrot.slane %v2321_v56, %v4980_v24  ;;  %v2330_v14 = vrot.slane %v2321_v56, %v4986_v26 }
0x2754   :  { %4509 = vrcp.f32 %v2326_v16 }
0x2755   :  { %4511 = vrcp.f32 %v2330_v14 }
0x2761   :  { %v4510_v59 = vpop.eup %4509 }
0x2762   :  { %v4512_v9 = vpop.eup %4511  ;;  %v2334_v47 = vmul.f32 %v4510_v59, %v2298_v29 }
0x2763   :  { %v2336_v49 = vmul.f32 %v4512_v9, %v2299_v11 }
0x2764   :  { %2339 = vperm.xlu1 %4396, %v2334_v47  }
0x2765   :  { %2344 = vperm.xlu0 %4395, %v2336_v49  }
0x27df   :  { %v2340_v51 = vpop.permute.xlu1 %2339 }
0x27e0   :  { %v2345_v45 = vpop.permute.xlu0 %2344  ;;  %v2347_v12 = vmul.f32 %v5314_v44, %v2340_v51  ;;  %v2462_v51 = vsel %vm2461_vm8, %v5086_v35, %v5349_v4 }
0x27e1   :  { %v2348_v33 = vmul.f32 %v5317_v8, %v2345_v45 }
0x27e2   :  { %v2349_v17 = vsel %vm150_vm0, %v2347_v12, 0.0 }
0x27e3   :  { %v2356_v19 = vsel %vm150_vm0, %v2348_v33, 0.0  ;;  %v2350_v48 = vrot.slane %v2349_v17, 4 }
0x27e4   :  { %v2357_v2 = vrot.slane %v2356_v19, 4 }
0x27e5   :  { %v2351_v10 = vadd.f32 %v2350_v48, %v2349_v17 }
0x27e6   :  { %v2358_v56 = vadd.f32 %v2357_v2, %v2356_v19 }
0x27e7   :  { %v2352_v16 = vrot.slane %v2351_v10, 2 }
0x27e8   :  { %v2359_v14 = vrot.slane %v2358_v56, 2 }
0x27e9   :  { %v2353_v29 = vadd.f32 %v2352_v16, %v2351_v10 }
0x27ea   :  { %v2360_v11 = vadd.f32 %v2359_v14, %v2358_v56 }
0x27eb   :  { %v2354_v59 = vrot.slane %v2353_v29, 1 }
0x27ec   :  { %v2361_v9 = vrot.slane %v2360_v11, 1 }
0x27ed   :  { %v2355_v47 = vadd.f32 %v2354_v59, %v2353_v29 }
0x27ee   :  { %v2362_v49 = vadd.f32 %v2361_v9, %v2360_v11 }
0x27f0   :  { %v2464_v44 = vsel %vm2461_vm8, %v2362_v49, %v2355_v47  ;;  %v2365_v8 = vsel %vm507_vm1, %v2362_v49, %v2355_v47 }
0x27f1   :  { %2465 = vrot.lane.b32.xlu1 %v2464_v44, %s4817_s5  ;;  %4264 = vmatmul.mubr.msk.f32.vlgmr.msra.gmra.mxu1 %vm150_vm0, %v2365_v8 }
0x27f2   :  { %2626 = vmatpush1.msra.mxu1 %v5326_v20  ;;  %2665 = vmatprep.mubr.f32.mxu1 %v4814_v1 }
0x27f3   :  { %2627 = vmatprep.subr.mxu1 %v5330_v25 }
0x27f4   :  { %2628 = vmatpush1.msra.mxu1 %v5333_v57 }
0x27f5   :  { %2629 = vmatprep.subr.mxu1 %v5336_v28 }
0x27f6   :  { %2630 = vmatpush1.msra.mxu1 %v5339_v32 }
0x27f7   :  { %2631 = vmatprep.subr.mxu1 %v5342_v58 }
0x27f8   :  { %2632 = vmatpush1.msra.mxu1 %v5345_v34 }
0x27f9   :  { %4285 = vmatprep.subr.mxu1 %v4814_v1 }
0x2863   :  { %v2466_v20 = vpop.permute.xlu1 %2465 }
0x2864   :  { %v2468_v45 = vsel %vm150_vm0, %v2462_v51, %v2466_v20  ;;  %v2479_v51 = vadd.f32 %v5515_v41, %v5541_v27 }
0x2865   :  { %2471 = vrot.lane.b32.xlu0 %v2468_v45, %s4817_s5  ;;  %v2470_v32 = vrot.slane %v2468_v45, 1 }
0x28b1   :  { %v2434_v25 = vpop.f32.mrf.mxu1 }
0x28b2   :  { %v2439_v57 = vrot.slane %v2434_v25, 4  ;;  %v2440_v28 = vrot.slane %v2434_v25, 5 }
0x28b3   :  { %v4265_v12 = vpop.f32.mrf.mxu1 }
0x28b4   :  { %2441 = vrot.lane.b32.xlu1 %v2439_v57, %s4817_s5 }
0x28b8   :  { %2443 = vrot.lane.b32.xlu1 %v2440_v28, %s4817_s5 }
0x28bc   :  { %2473 = vrot.lane.b32.xlu1 %v2470_v32, %s4817_s5 }
0x28d7   :  { %v2472_v14 = vpop.permute.xlu0 %2471 }
0x2926   :  { %v2442_v58 = vpop.permute.xlu1 %2441 }
0x2927   :  { %v2447_v34 = vadd.f32 %v2442_v58, %v5133_v6 }
0x2929   :  { %v3963_v4 = vmul.f32 -1.442695, %v2447_v34 }
0x292a   :  { %v2444_v33 = vpop.permute.xlu1 %2443 }
0x292b   :  { %4513 = vpow2.f32 %v3963_v4  ;;  %v2448_v17 = vadd.f32 %v2444_v33, %v5129_v63 }
0x292d   :  { %v3964_v19 = vmul.f32 -1.442695, %v2448_v17 }
0x292e   :  { %v2474_v59 = vpop.permute.xlu1 %2473 }
0x292f   :  { %4515 = vpow2.f32 %v3964_v19 }
0x2938   :  { %v4514_v48 = vpop.eup %4513 }
0x2939   :  { %v2455_v2 = vadd.f32 1.0, %v4514_v48 }
0x293b   :  { %4517 = vrcp.f32 %v2455_v2 }
0x293c   :  { %v4516_v10 = vpop.eup %4515 }
0x293d   :  { %v2456_v56 = vadd.f32 1.0, %v4516_v10 }
0x293f   :  { %4519 = vrcp.f32 %v2456_v56 }
0x2948   :  { %v4518_v16 = vpop.eup %4517 }
0x2949   :  { %v2477_v29 = vmul.f32 %v4518_v16, %v2472_v14 }
0x294b   :  { %v2482_v49 = vrot.slane %v2477_v29, 4  ;;  %v2681_v29 = vsub.s32 5, %v4977_v23 }
0x294c   :  { %v4520_v11 = vpop.eup %4519 }
0x294d   :  { %v2478_v9 = vmul.f32 %v4520_v11, %v2474_v59 }
0x294f   :  { %v2483_v47 = vrot.slane %v2478_v9, 3 }
0x2951   :  { %v2484_v44 = vsel %vm507_vm1, %v2483_v47, %v2482_v49 }
0x2952   :  { %2485 = vrot.lane.b32.xlu0 %v2484_v44, %s4818_s6 }
0x29c4   :  { %v2486_v8 = vpop.permute.xlu0 %2485 }
0x29c5   :  { %4283 = vmatmul.mubr.msk.f32.vlgmr.msra.gmra.mxu0 %vm723_vm4, %v2486_v8 }
0x29c6   :  { %4297 = vmatpush3.msra.mxu0 %v5478_v52  ;;  %4312 = vmatprep.mubr.msk.f32.mxu0 %vm4816_vm3, %v4814_v1 }
0x29c7   :  { %4298 = vmatprep.subr.mxu0 %v4814_v1 }
0x29c8   :  { %4299 = vmatpush3.msra.mxu0 %v5484_v37 }
0x29c9   :  { %4300 = vmatprep.subr.mxu0 %v4814_v1 }
0x29ca   :  { %4301 = vmatpush3.msra.mxu0 %v5488_v18 }
0x29cb   :  { %4302 = vmatprep.subr.mxu0 %v4814_v1 }
0x29cc   :  { %4303 = vmatpush3.msra.mxu0 %v5492_v53 }
0x29cd   :  { %4304 = vmatprep.subr.mxu0 %v4814_v1 }
0x29ce   :  { %4305 = vmatpush3.msra.mxu0 %v5496_v22 }
0x29cf   :  { %4306 = vmatprep.subr.mxu0 %v4814_v1 }
0x29d0   :  { %4307 = vmatpush3.msra.mxu0 %v5500_v61 }
0x29d1   :  { %4308 = vmatprep.subr.mxu0 %v4814_v1 }
0x29d2   :  { %4309 = vmatpush3.msra.mxu0 %v5504_v40 }
0x29d3   :  { %4310 = vmatprep.subr.mxu0 %v4814_v1 }
0x29d4   :  { %4311 = vmatpush3.msra.mxu0 %v5508_v43 }
0x29d5   :  { %4326 = vmatprep.subr.mxu0 %v4814_v1 }
0x2a85   :  { %v2555_v20 = vpop.f32.mrf.mxu0 }
0x2a86   :  { %v2559_v45 = vadd.f32 %v2555_v20, %v2479_v51 }
0x2a87   :  { %v4284_v25 = vpop.f32.mrf.mxu0 }
0x2a88   :  { %v3966_v57 = vmul.f32 -1.442695, %v2559_v45 }
0x2a8a   :  { %4521 = vpow2.f32 %v3966_v57 }
0x2a97   :  { %v4522_v12 = vpop.eup %4521 }
0x2a98   :  { %v2563_v28 = vadd.f32 1.0, %v4522_v12 }
0x2a9a   :  { %4523 = vrcp.f32 %v2563_v28 }
0x2aa7   :  { %v4524_v32 = vpop.eup %4523 }
0x2aa8   :  { %v2566_v58 = vmul.f32 2.0, %v4524_v32  ;;  %v2568_v17 = vmul.f32 %v4524_v32, %v5522_v31 }
0x2aaa   :  { %v3967_v34 = vadd.f32 -1.0, %v2566_v58 }
0x2aac   :  { %2570 = vrot.lane.b32.xlu1 %v3967_v34, %s4819_s14 }
0x2b1e   :  { %v2571_v4 = vpop.permute.xlu1 %2570 }
0x2b1f   :  { %v2573_v33 = vmul.f32 %v4524_v32, %v2571_v4 }
0x2b21   :  { %2575 = vrot.lane.b32.xlu0 %v2573_v33, %s4817_s5 }
0x2b93   :  { %v2576_v27 = vpop.permute.xlu0 %2575 }
0x2b94   :  { %v5621_v19 = vadd.f32 %v2576_v27, %v2568_v17 }
0x2b96   :  { %4525 = vtanh.f32 %v5621_v19 }
0x2ba3   :  { %v4526_v48 = vpop.eup %4525 }
0x2ba4   :  { %2581 = vrot.lane.b32.xlu1 %v4526_v48, %s4819_s14 }
0x2c16   :  { %v2582_v2 = vpop.permute.xlu1 %2581 }
0x2c17   :  { %v5625_v10 = vmul.f32 %v4524_v32, %v2582_v2 }
0x2c19   :  { %2597 = vrot.lane.b32.xlu0 %v5625_v10, %s4817_s5 }
0x2c8b   :  { %v2598_v56 = vpop.permute.xlu0 %2597 }
0x2c8c   :  { %3968 = vmatmul.mubr.msk.f32.vlgmr.msra.gmra.mxu1 %vm150_vm0, %v2598_v56 }
0x2c8d   :  { %4286 = vmatpush3.msra.mxu1 %v5396_v46  ;;  %4293 = vmatprep.mubr.msk.f32.mxu1 %vm4816_vm3, %v4814_v1 }
0x2c8e   :  { %4287 = vmatprep.subr.mxu1 %v4814_v1 }
0x2c8f   :  { %4288 = vmatpush3.msra.mxu1 %v5402_v15 }
0x2c90   :  { %4289 = vmatprep.subr.mxu1 %v4814_v1 }
0x2c91   :  { %4290 = vmatpush3.msra.mxu1 %v5406_v5 }
0x2c92   :  { %4291 = vmatprep.subr.mxu1 %v4814_v1 }
0x2c93   :  { %4292 = vmatpush3.msra.mxu1 %v5410_v62 }
0x2c94   :  { %3068 = vmatprep.subr.mxu1 %v5413_v7 }
0x2d4c   :  { %v5640_v31 = vpop.f32.mrf.mxu1 }
0x2d4e   :  { %v2669_v46 = vpop.f32.mrf.mxu1 }
0x2d4f   :  { %v2673_v16 = vrot.slane %v2669_v46, 3  ;;  %v2674_v14 = vrot.slane %v2669_v46, 4 }
0x2d51   :  { %v2677_v11 = vadd.f32 %v2673_v16, %v4998_v38  ;;  %v2678_v15 = vadd.f32 %v4995_v36, %v2674_v14 }
0x2d53   :  { %v2682_v59 = vrot.slane %v2677_v11, %v2681_v29  ;;  %v2686_v9 = vrot.slane %v2678_v15, %v2681_v29 }
0x2d55   :  { %v2687_v5 = vadd.f32 %v2682_v59, %v5004_v42  ;;  %v2688_v47 = vadd.f32 %v2686_v9, %v5000_v39 }
0x2d57   :  { %4527 = vtanh.f32 %v2687_v5 }
0x2d58   :  { %4529 = vtanh.f32 %v2688_v47 }
0x2d64   :  { %v4528_v62 = vpop.eup %4527 }
0x2d65   :  { %v4530_v7 = vpop.eup %4529  ;;  %v2691_v49 = vmul.f32 %v5426_v21, %v4528_v62 }
0x2d66   :  { %v2692_v44 = vmul.f32 %v5426_v21, %v4530_v7 }
0x2d67   :  { %v2693_v8 = vsel %vm150_vm0, %v2691_v49, 0.0 }
0x2d68   :  { %v2696_v51 = vsel %vm150_vm0, %v2692_v44, 0.0  ;;  %2694 = vadd.xlane.f32.xlu1 %v2693_v8 }
0x2d69   :  { %2697 = vadd.xlane.f32.xlu0 %v2696_v51 }
0x2df1   :  { %v2695_v20 = vpop.xlane.xlu1 %2694 }
0x2df2   :  { %v2698_v45 = vpop.xlane.xlu0 %2697  ;;  %v2699_v25 = vadd.f32 %v2695_v20, %v5018_v54 }
0x2df3   :  { %v2700_v57 = vadd.f32 %v2698_v45, %v5018_v54 }
0x2df4   :  { %v2701_v12 = vmul.f32 %v2699_v25, %v5020_v55 }
0x2df5   :  { %v2702_v28 = vmul.f32 %v2700_v57, %v5024_v60 }
0x2df6   :  { %2706 = vperm.xlu0 %4395, %v2701_v12  }
0x2df7   :  { %2709 = vperm.xlu1 %4396, %v2702_v28  }
0x2e71   :  { %v2707_v32 = vpop.permute.xlu0 %2706 }
0x2e72   :  { %v2714_v21 = vrot.slane %v2707_v32, %v5029_v0  ;;  %v2710_v58 = vpop.permute.xlu1 %2709  ;;  %v5669_v32 = vld [vmem:[#allocation5] sm:$0xff] }
0x2e73   :  { %v2718_v34 = vrot.slane %v2710_v58, %v5029_v0  ;;  %v5672_v58 = vld [vmem:[#allocation5 + $0x8] sm:$0xff] }
0x2e75   :  { %v2719_v4 = vsel %vm507_vm1, %v2718_v34, %v2714_v21 }
0x2e76   :  { %v2721_v33 = vsel %vm510_vm2, %v2719_v4, -inf }
0x2e77   :  { %2722 = vmax.xlane.f32.xlu1 %v2721_v33 }
0x2f00   :  { %v2723_v17 = vpop.xlane.xlu1 %2722 }
0x2f01   :  { %v2728_v27 = vrot.slane %v2723_v17, %v4980_v24  ;;  %v2732_v48 = vrot.slane %v2723_v17, %v4986_v26 }
0x2f03   :  { %v2735_v2 = vsub.f32 %v2701_v12, %v2728_v27  ;;  %v2736_v56 = vsub.f32 %v2702_v28, %v2732_v48 }
0x2f05   :  { %v2737_v46 = vmul.f32 1.442695, %v2735_v2  ;;  %v2739_v16 = vmul.f32 1.442695, %v2736_v56 }
0x2f07   :  { %4531 = vpow2.f32 %v2737_v46 }
0x2f08   :  { %4533 = vpow2.f32 %v2739_v16 }
0x2f14   :  { %v4532_v14 = vpop.eup %4531 }
0x2f15   :  { %v2741_v29 = vmul.f32 %v4532_v14, %v5020_v55  ;;  %v4534_v11 = vpop.eup %4533 }
0x2f16   :  { %v2742_v15 = vmul.f32 %v4534_v11, %v5024_v60 }
0x2f17   :  { %2746 = vperm.xlu0 %4395, %v2741_v29  }
0x2f1b   :  { %2749 = vperm.xlu0 %4395, %v2742_v15  }
0x2f92   :  { %v2747_v59 = vpop.permute.xlu0 %2746 }
0x2f93   :  { %v2754_v5 = vrot.slane %v2747_v59, %v5029_v0 }
0x2f96   :  { %v2750_v9 = vpop.permute.xlu0 %2749 }
0x2f97   :  { %v2758_v47 = vrot.slane %v2750_v9, %v5029_v0 }
0x2f99   :  { %v2759_v62 = vsel %vm507_vm1, %v2758_v47, %v2754_v5  ;;  %v5681_v47 = vld [vmem:[#allocation10 + $0x30] sm:$0xff] }
0x2f9a   :  { %v2761_v7 = vsel %vm510_vm2, %v2759_v62, 0.0  ;;  %v5685_v62 = vld [vmem:[#allocation10 + $0x28] sm:$0xff] }
0x2f9b   :  { %2762 = vadd.xlane.f32.xlu0 %v2761_v7  ;;  %v5688_v7 = vld [vmem:[#allocation10 + $0x20] sm:$0xff] }
0x3024   :  { %v2763_v49 = vpop.xlane.xlu0 %2762 }
0x3025   :  { %v2764_v44 = vadd.f32 1e-06, %v2763_v49  ;;  %v5691_v49 = vld [vmem:[#allocation10 + $0x18] sm:$0xff] }
0x3027   :  { %v2769_v8 = vrot.slane %v2764_v44, %v4980_v24  ;;  %v2773_v51 = vrot.slane %v2764_v44, %v4986_v26  ;;  %v5694_v44 = vld [vmem:[#allocation10 + $0x10] sm:$0xff] }
0x3029   :  { %4535 = vrcp.f32 %v2769_v8  ;;  %v5697_v8 = vld [vmem:[#allocation10 + $0x8] sm:$0xff] }
0x302a   :  { %4537 = vrcp.f32 %v2773_v51  ;;  %v5700_v51 = vld [vmem:[#allocation10] sm:$0xff] }
0x3036   :  { %v4536_v20 = vpop.eup %4535 }
0x3037   :  { %v4538_v45 = vpop.eup %4537  ;;  %v2777_v25 = vmul.f32 %v4536_v20, %v2741_v29  ;;  %v5704_v20 = vld [vmem:[#allocation3] sm:$0xff] }
0x3038   :  { %v2779_v57 = vmul.f32 %v4538_v45, %v2742_v15  ;;  %v2905_v45 = vsel %vm2904_vm9, %v5086_v35, %v5704_v20 }
0x3039   :  { %2782 = vperm.xlu1 %4396, %v2777_v25  }
0x303a   :  { %2787 = vperm.xlu0 %4395, %v2779_v57  }
0x30b4   :  { %v2783_v12 = vpop.permute.xlu1 %2782 }
0x30b5   :  { %v2788_v28 = vpop.permute.xlu0 %2787  ;;  %v2790_v21 = vmul.f32 %v5669_v32, %v2783_v12 }
0x30b6   :  { %v2791_v34 = vmul.f32 %v5672_v58, %v2788_v28 }
0x30b7   :  { %v2792_v4 = vsel %vm150_vm0, %v2790_v21, 0.0 }
0x30b8   :  { %v2799_v33 = vsel %vm150_vm0, %v2791_v34, 0.0  ;;  %v2793_v17 = vrot.slane %v2792_v4, 4 }
0x30b9   :  { %v2800_v27 = vrot.slane %v2799_v33, 4 }
0x30ba   :  { %v2794_v48 = vadd.f32 %v2793_v17, %v2792_v4 }
0x30bb   :  { %v2801_v2 = vadd.f32 %v2800_v27, %v2799_v33 }
0x30bc   :  { %v2795_v56 = vrot.slane %v2794_v48, 2 }
0x30bd   :  { %v2802_v46 = vrot.slane %v2801_v2, 2 }
0x30be   :  { %v2796_v16 = vadd.f32 %v2795_v56, %v2794_v48 }
0x30bf   :  { %v2803_v14 = vadd.f32 %v2802_v46, %v2801_v2 }
0x30c0   :  { %v2797_v29 = vrot.slane %v2796_v16, 1 }
0x30c1   :  { %v2804_v11 = vrot.slane %v2803_v14, 1 }
0x30c2   :  { %v2798_v15 = vadd.f32 %v2797_v29, %v2796_v16 }
0x30c3   :  { %v2805_v59 = vadd.f32 %v2804_v11, %v2803_v14 }
0x30c5   :  { %v2907_v9 = vsel %vm2904_vm9, %v2805_v59, %v2798_v15  ;;  %v2808_v5 = vsel %vm507_vm1, %v2805_v59, %v2798_v15 }
0x30c6   :  { %2908 = vrot.lane.b32.xlu1 %v2907_v9, %s4817_s5  ;;  %4294 = vmatmul.mubr.msk.f32.vlgmr.msra.gmra.mxu1 %vm150_vm0, %v2808_v5 }
0x30c7   :  { %3069 = vmatpush1.msra.mxu1 %v5681_v47  ;;  %3108 = vmatprep.mubr.f32.mxu1 %v4814_v1 }
0x30c8   :  { %3070 = vmatprep.subr.mxu1 %v5685_v62 }
0x30c9   :  { %3071 = vmatpush1.msra.mxu1 %v5688_v7 }
0x30ca   :  { %3072 = vmatprep.subr.mxu1 %v5691_v49 }
0x30cb   :  { %3073 = vmatpush1.msra.mxu1 %v5694_v44 }
0x30cc   :  { %3074 = vmatprep.subr.mxu1 %v5697_v8 }
0x30cd   :  { %3075 = vmatpush1.msra.mxu1 %v5700_v51 }
0x30ce   :  { %4315 = vmatprep.subr.mxu1 %v4814_v1 }
0x3138   :  { %v2909_v25 = vpop.permute.xlu1 %2908 }
0x3139   :  { %v2911_v57 = vsel %vm150_vm0, %v2905_v45, %v2909_v25 }
0x313a   :  { %2914 = vrot.lane.b32.xlu0 %v2911_v57, %s4817_s5  ;;  %v2913_v4 = vrot.slane %v2911_v57, 1 }
0x3186   :  { %v2877_v12 = vpop.f32.mrf.mxu1 }
0x3187   :  { %v2882_v28 = vrot.slane %v2877_v12, 3  ;;  %v2883_v34 = vrot.slane %v2877_v12, 4 }
0x3188   :  { %v4295_v21 = vpop.f32.mrf.mxu1 }
0x3189   :  { %2884 = vrot.lane.b32.xlu1 %v2882_v28, %s4817_s5 }
0x318d   :  { %2886 = vrot.lane.b32.xlu1 %v2883_v34, %s4817_s5 }
0x3191   :  { %2916 = vrot.lane.b32.xlu1 %v2913_v4, %s4817_s5 }
0x31ac   :  { %v2915_v15 = vpop.permute.xlu0 %2914 }
0x31fb   :  { %v2885_v33 = vpop.permute.xlu1 %2884 }
0x31fc   :  { %v2890_v17 = vadd.f32 %v2885_v33, %v5133_v6 }
0x31fe   :  { %v3970_v27 = vmul.f32 -1.442695, %v2890_v17 }
0x31ff   :  { %v2887_v48 = vpop.permute.xlu1 %2886 }
0x3200   :  { %4539 = vpow2.f32 %v3970_v27  ;;  %v2891_v2 = vadd.f32 %v2887_v48, %v5129_v63 }
0x3202   :  { %v3971_v56 = vmul.f32 -1.442695, %v2891_v2 }
0x3203   :  { %v2917_v5 = vpop.permute.xlu1 %2916 }
0x3204   :  { %4541 = vpow2.f32 %v3971_v56 }
0x320d   :  { %v4540_v46 = vpop.eup %4539 }
0x320e   :  { %v2898_v16 = vadd.f32 1.0, %v4540_v46  ;;  %v5751_v46 = vld [vmem:[#allocation11 + $0x18] sm:$0xff] }
0x3210   :  { %4543 = vrcp.f32 %v2898_v16  ;;  %v5761_v16 = vld [vmem:[#allocation11 + $0x8] sm:$0xff] }
0x3211   :  { %v4542_v14 = vpop.eup %4541 }
0x3212   :  { %v2899_v29 = vadd.f32 1.0, %v4542_v14  ;;  %v5765_v14 = vld [vmem:[#allocation11] sm:$0xff] }
0x3214   :  { %4545 = vrcp.f32 %v2899_v29  ;;  %v4644_v29 = vld [vmem:[#allocation10 + $0x38] sm:$0xff] }
0x321d   :  { %v4544_v11 = vpop.eup %4543 }
0x321e   :  { %v2920_v59 = vmul.f32 %v4544_v11, %v2915_v15 }
0x3220   :  { %v2925_v57 = vrot.slane %v2920_v59, 5 }
0x3221   :  { %v4546_v9 = vpop.eup %4545 }
0x3222   :  { %v2921_v45 = vmul.f32 %v4546_v9, %v2917_v5  ;;  %v3124_v5 = vsub.s32 6, %v4977_v23 }
0x3224   :  { %v2926_v25 = vrot.slane %v2921_v45, 4 }
0x3226   :  { %v2927_v12 = vsel %vm507_vm1, %v2926_v25, %v2925_v57 }
0x3227   :  { %2928 = vrot.lane.b32.xlu0 %v2927_v12, %s4818_s6 }
0x3299   :  { %v2929_v28 = vpop.permute.xlu0 %2928 }
0x329a   :  { %4313 = vmatmul.mubr.msk.f32.vlgmr.msra.gmra.mxu0 %vm723_vm4, %v2929_v28 }
0x329b   :  { %4327 = vmatpush3.msra.mxu0 %v5478_v52  ;;  %4342 = vmatprep.mubr.msk.f32.mxu0 %vm4816_vm3, %v4814_v1  ;;  %v2922_v52 = vadd.f32 %v5515_v41, %v5640_v31 }
0x329c   :  { %4328 = vmatprep.subr.mxu0 %v4814_v1 }
0x329d   :  { %4329 = vmatpush3.msra.mxu0 %v5484_v37 }
0x329e   :  { %4330 = vmatprep.subr.mxu0 %v4814_v1 }
0x329f   :  { %4331 = vmatpush3.msra.mxu0 %v5488_v18 }
0x32a0   :  { %4332 = vmatprep.subr.mxu0 %v4814_v1 }
0x32a1   :  { %4333 = vmatpush3.msra.mxu0 %v5492_v53 }
0x32a2   :  { %4334 = vmatprep.subr.mxu0 %v4814_v1 }
0x32a3   :  { %4335 = vmatpush3.msra.mxu0 %v5496_v22 }
0x32a4   :  { %4336 = vmatprep.subr.mxu0 %v4814_v1 }
0x32a5   :  { %4337 = vmatpush3.msra.mxu0 %v5500_v61 }
0x32a6   :  { %4338 = vmatprep.subr.mxu0 %v4814_v1 }
0x32a7   :  { %4339 = vmatpush3.msra.mxu0 %v5504_v40 }
0x32a8   :  { %4340 = vmatprep.subr.mxu0 %v4814_v1 }
0x32a9   :  { %4341 = vmatpush3.msra.mxu0 %v5508_v43 }
0x32aa   :  { %4356 = vmatprep.subr.mxu0 %v4814_v1 }
0x335a   :  { %v2998_v37 = vpop.f32.mrf.mxu0 }
0x335b   :  { %v3002_v18 = vadd.f32 %v2998_v37, %v2922_v52 }
0x335c   :  { %v4314_v53 = vpop.f32.mrf.mxu0 }
0x335d   :  { %v3973_v22 = vmul.f32 -1.442695, %v3002_v18  ;;  %v5778_v53 = vld [vmem:[%s5970_s7] ss:$0 sm:$0xff] }
0x335f   :  { %4547 = vpow2.f32 %v3973_v22 }
0x336c   :  { %v4548_v21 = vpop.eup %4547 }
0x336d   :  { %v3006_v61 = vadd.f32 1.0, %v4548_v21 }
0x336f   :  { %4549 = vrcp.f32 %v3006_v61 }
0x337c   :  { %v4550_v34 = vpop.eup %4549 }
0x337d   :  { %v3009_v4 = vmul.f32 2.0, %v4550_v34  ;;  %v3011_v17 = vmul.f32 %v4550_v34, %v5621_v19  ;;  %v5757_v19 = vld [vmem:[#allocation11 + $0x10] sm:$0xff] }
0x337f   :  { %v3974_v40 = vadd.f32 -1.0, %v3009_v4 }
0x3381   :  { %3013 = vrot.lane.b32.xlu1 %v3974_v40, %s4819_s14 }
0x33f3   :  { %v3014_v33 = vpop.permute.xlu1 %3013 }
0x33f4   :  { %v3016_v43 = vmul.f32 %v4550_v34, %v3014_v33 }
0x33f6   :  { %3018 = vrot.lane.b32.xlu0 %v3016_v43, %s4817_s5 }
0x3468   :  { %v3019_v41 = vpop.permute.xlu0 %3018 }
0x3469   :  { %v5742_v31 = vadd.f32 %v3019_v41, %v3011_v17 }
0x346b   :  { %4551 = vtanh.f32 %v5742_v31 }
0x3478   :  { %v4552_v27 = vpop.eup %4551 }
0x3479   :  { %3024 = vrot.lane.b32.xlu1 %v4552_v27, %s4819_s14 }
0x34eb   :  { %v3025_v48 = vpop.permute.xlu1 %3024 }
0x34ec   :  { %v5746_v2 = vmul.f32 %v4550_v34, %v3025_v48 }
0x34ee   :  { %3040 = vrot.lane.b32.xlu0 %v5746_v2, %s4817_s5 }
0x3560   :  { %v3041_v56 = vpop.permute.xlu0 %3040 }
0x3561   :  { %3975 = vmatmul.mubr.msk.f32.vlgmr.msra.gmra.mxu1 %vm150_vm0, %v3041_v56 }
0x3562   :  { %4316 = vmatpush3.msra.mxu1 %v5751_v46  ;;  %4323 = vmatprep.mubr.msk.f32.mxu1 %vm4816_vm3, %v4814_v1 }
0x3563   :  { %4317 = vmatprep.subr.mxu1 %v4814_v1 }
0x3564   :  { %4318 = vmatpush3.msra.mxu1 %v5757_v19 }
0x3565   :  { %4319 = vmatprep.subr.mxu1 %v4814_v1 }
0x3566   :  { %4320 = vmatpush3.msra.mxu1 %v5761_v16 }
0x3567   :  { %4321 = vmatprep.subr.mxu1 %v4814_v1 }
0x3568   :  { %4322 = vmatpush3.msra.mxu1 %v5765_v14 }
0x3569   :  { %3511 = vmatprep.subr.mxu1 %v4644_v29 }
0x3621   :  { %v5768_v11 = vpop.f32.mrf.mxu1 }
0x3623   :  { %v3112_v15 = vpop.f32.mrf.mxu1 }
0x3624   :  { %v3116_v59 = vrot.slane %v3112_v15, 2  ;;  %v3117_v9 = vrot.slane %v3112_v15, 3 }
0x3626   :  { %v3120_v45 = vadd.f32 %v3116_v59, %v4998_v38  ;;  %v3121_v25 = vadd.f32 %v4995_v36, %v3117_v9 }
0x3628   :  { %v3125_v57 = vrot.slane %v3120_v45, %v3124_v5  ;;  %v3129_v12 = vrot.slane %v3121_v25, %v3124_v5 }
0x362a   :  { %v3130_v28 = vadd.f32 %v3125_v57, %v5004_v42  ;;  %v3131_v52 = vadd.f32 %v3129_v12, %v5000_v39 }
0x362c   :  { %4553 = vtanh.f32 %v3130_v28 }
0x362d   :  { %4555 = vtanh.f32 %v3131_v52 }
0x3639   :  { %v4554_v37 = vpop.eup %4553 }
0x363a   :  { %v4556_v18 = vpop.eup %4555  ;;  %v3134_v22 = vmul.f32 %v5778_v53, %v4554_v37 }
0x363b   :  { %v3135_v21 = vmul.f32 %v5778_v53, %v4556_v18 }
0x363c   :  { %v3136_v61 = vsel %vm150_vm0, %v3134_v22, 0.0 }
0x363d   :  { %v3139_v34 = vsel %vm150_vm0, %v3135_v21, 0.0  ;;  %3137 = vadd.xlane.f32.xlu1 %v3136_v61 }
0x363e   :  { %3140 = vadd.xlane.f32.xlu0 %v3139_v34 }
0x36c6   :  { %v3138_v4 = vpop.xlane.xlu1 %3137 }
0x36c7   :  { %v3141_v40 = vpop.xlane.xlu0 %3140  ;;  %v3142_v33 = vadd.f32 %v3138_v4, %v5018_v54 }
0x36c8   :  { %v3143_v43 = vadd.f32 %v3141_v40, %v5018_v54 }
0x36c9   :  { %v3144_v17 = vmul.f32 %v3142_v33, %v5020_v55 }
0x36ca   :  { %v3145_v41 = vmul.f32 %v3143_v43, %v5024_v60 }
0x36cb   :  { %3149 = vperm.xlu0 %4395, %v3144_v17  }
0x36cc   :  { %3152 = vperm.xlu1 %4396, %v3145_v41  }
0x3746   :  { %v3150_v27 = vpop.permute.xlu0 %3149 }
0x3747   :  { %v3157_v48 = vrot.slane %v3150_v27, %v5029_v0  ;;  %v3153_v56 = vpop.permute.xlu1 %3152 }
0x3748   :  { %v3161_v29 = vrot.slane %v3153_v56, %v5029_v0 }
0x374a   :  { %v3162_v15 = vsel %vm507_vm1, %v3161_v29, %v3157_v48 }
0x374b   :  { %v3164_v59 = vsel %vm510_vm2, %v3162_v15, -inf }
0x374c   :  { %3165 = vmax.xlane.f32.xlu1 %v3164_v59 }
0x37d5   :  { %v3166_v9 = vpop.xlane.xlu1 %3165 }
0x37d6   :  { %v3171_v5 = vrot.slane %v3166_v9, %v4980_v24  ;;  %v3175_v45 = vrot.slane %v3166_v9, %v4986_v26 }
0x37d8   :  { %v3178_v25 = vsub.f32 %v3144_v17, %v3171_v5  ;;  %v3179_v57 = vsub.f32 %v3145_v41, %v3175_v45 }
0x37da   :  { %v3180_v12 = vmul.f32 1.442695, %v3178_v25  ;;  %v3182_v28 = vmul.f32 1.442695, %v3179_v57 }
0x37dc   :  { %4557 = vpow2.f32 %v3180_v12 }
0x37dd   :  { %4559 = vpow2.f32 %v3182_v28 }
0x37e9   :  { %v4558_v52 = vpop.eup %4557 }
0x37ea   :  { %v3184_v37 = vmul.f32 %v4558_v52, %v5020_v55  ;;  %v4560_v18 = vpop.eup %4559 }
0x37eb   :  { %v3185_v22 = vmul.f32 %v4560_v18, %v5024_v60 }
0x37ec   :  { %3189 = vperm.xlu0 %4395, %v3184_v37  }
0x37f0   :  { %3192 = vperm.xlu0 %4395, %v3185_v22  }
0x3867   :  { %v3190_v21 = vpop.permute.xlu0 %3189 }
0x3868   :  { %v3197_v34 = vrot.slane %v3190_v21, %v5029_v0 }
0x386b   :  { %v3193_v61 = vpop.permute.xlu0 %3192 }
0x386c   :  { %v3201_v4 = vrot.slane %v3193_v61, %v5029_v0 }
0x386e   :  { %v3202_v40 = vsel %vm507_vm1, %v3201_v4, %v3197_v34 }
0x386f   :  { %v3204_v33 = vsel %vm510_vm2, %v3202_v40, 0.0 }
0x3870   :  { %3205 = vadd.xlane.f32.xlu0 %v3204_v33 }
0x38f9   :  { %v3206_v43 = vpop.xlane.xlu0 %3205 }
0x38fa   :  { %v3207_v17 = vadd.f32 1e-06, %v3206_v43 }
0x38fc   :  { %v3212_v41 = vrot.slane %v3207_v17, %v4980_v24  ;;  %v3216_v27 = vrot.slane %v3207_v17, %v4986_v26 }
0x38fe   :  { %4561 = vrcp.f32 %v3212_v41  ;;  %v3348_v41 = vsel %vm3347_vm10, %v5086_v35, %v5704_v20 }
0x38ff   :  { %4563 = vrcp.f32 %v3216_v27 }
0x390b   :  { %v4562_v48 = vpop.eup %4561 }
0x390c   :  { %v4564_v56 = vpop.eup %4563  ;;  %v3220_v29 = vmul.f32 %v4562_v48, %v3184_v37 }
0x390d   :  { %v3222_v15 = vmul.f32 %v4564_v56, %v3185_v22 }
0x390e   :  { %3225 = vperm.xlu1 %4396, %v3220_v29  }
0x390f   :  { %3230 = vperm.xlu0 %4395, %v3222_v15  }
0x3989   :  { %v3226_v59 = vpop.permute.xlu1 %3225 }
0x398a   :  { %v3231_v9 = vpop.permute.xlu0 %3230  ;;  %v3233_v5 = vmul.f32 %v5669_v32, %v3226_v59 }
0x398b   :  { %v3234_v45 = vmul.f32 %v5672_v58, %v3231_v9 }
0x398c   :  { %v3235_v25 = vsel %vm150_vm0, %v3233_v5, 0.0 }
0x398d   :  { %v3242_v57 = vsel %vm150_vm0, %v3234_v45, 0.0  ;;  %v3236_v12 = vrot.slane %v3235_v25, 4 }
0x398e   :  { %v3243_v28 = vrot.slane %v3242_v57, 4 }
0x398f   :  { %v3237_v52 = vadd.f32 %v3236_v12, %v3235_v25 }
0x3990   :  { %v3244_v18 = vadd.f32 %v3243_v28, %v3242_v57 }
0x3991   :  { %v3238_v21 = vrot.slane %v3237_v52, 2 }
0x3992   :  { %v3245_v61 = vrot.slane %v3244_v18, 2 }
0x3993   :  { %v3239_v37 = vadd.f32 %v3238_v21, %v3237_v52 }
0x3994   :  { %v3246_v22 = vadd.f32 %v3245_v61, %v3244_v18 }
0x3995   :  { %v3240_v34 = vrot.slane %v3239_v37, 1 }
0x3996   :  { %v3247_v4 = vrot.slane %v3246_v22, 1 }
0x3997   :  { %v3241_v40 = vadd.f32 %v3240_v34, %v3239_v37 }
0x3998   :  { %v3248_v33 = vadd.f32 %v3247_v4, %v3246_v22  ;;  %v4646_v4 = vld [vmem:[#allocation13 + $0x38] sm:$0xff] }
0x399a   :  { %v3350_v43 = vsel %vm3347_vm10, %v3248_v33, %v3241_v40  ;;  %v3251_v17 = vsel %vm507_vm1, %v3248_v33, %v3241_v40  ;;  %v4647_v40 = vld [vmem:[#allocation13 + $0x30] sm:$0xff]  ;;  %v4648_v33 = vld [vmem:[#allocation13 + $0x28] sm:$0xff] }
0x399b   :  { %3351 = vrot.lane.b32.xlu1 %v3350_v43, %s4817_s5  ;;  %4324 = vmatmul.mubr.msk.f32.vlgmr.msra.gmra.mxu1 %vm150_vm0, %v3251_v17  ;;  %v4649_v43 = vld [vmem:[#allocation13 + $0x20] sm:$0xff]  ;;  %v4650_v17 = vld [vmem:[#allocation13 + $0x18] sm:$0xff] }
0x399c   :  { %3512 = vmatpush1.msra.mxu1 %v5681_v47  ;;  %3551 = vmatprep.mubr.f32.mxu1 %v4814_v1 }
0x399d   :  { %3513 = vmatprep.subr.mxu1 %v5685_v62 }
0x399e   :  { %3514 = vmatpush1.msra.mxu1 %v5688_v7 }
0x399f   :  { %3515 = vmatprep.subr.mxu1 %v5691_v49 }
0x39a0   :  { %3516 = vmatpush1.msra.mxu1 %v5694_v44 }
0x39a1   :  { %3517 = vmatprep.subr.mxu1 %v5697_v8 }
0x39a2   :  { %3518 = vmatpush1.msra.mxu1 %v5700_v51 }
0x39a3   :  { %4345 = vmatprep.subr.mxu1 %v4814_v1 }
0x3a0d   :  { %v3352_v47 = vpop.permute.xlu1 %3351 }
0x3a0e   :  { %v3354_v27 = vsel %vm150_vm0, %v3348_v41, %v3352_v47  ;;  %v4651_v41 = vld [vmem:[#allocation13 + $0x10] sm:$0xff]  ;;  %v4652_v47 = vld [vmem:[#allocation13 + $0x8] sm:$0xff] }
0x3a0f   :  { %3357 = vrot.lane.b32.xlu0 %v3354_v27, %s4817_s5  ;;  %v3356_v44 = vrot.slane %v3354_v27, 1  ;;  %v4653_v27 = vld [vmem:[#allocation13] sm:$0xff] }
0x3a5b   :  { %v3320_v62 = vpop.f32.mrf.mxu1 }
0x3a5c   :  { %v3325_v7 = vrot.slane %v3320_v62, 2  ;;  %v3326_v49 = vrot.slane %v3320_v62, 3  ;;  %v5842_v62 = vld [vmem:[%s5975_s12] ss:$0 sm:$0xff] }
0x3a5d   :  { %v4325_v48 = vpop.f32.mrf.mxu1 }
0x3a5e   :  { %3327 = vrot.lane.b32.xlu1 %v3325_v7, %s4817_s5  ;;  %v3365_v7 = vadd.f32 %v5842_v62, %v5768_v11 }
0x3a62   :  { %3329 = vrot.lane.b32.xlu1 %v3326_v49, %s4817_s5 }
0x3a66   :  { %3359 = vrot.lane.b32.xlu1 %v3356_v44, %s4817_s5 }
0x3a81   :  { %v3358_v12 = vpop.permute.xlu0 %3357 }
0x3ad0   :  { %v3328_v8 = vpop.permute.xlu1 %3327 }
0x3ad1   :  { %v3333_v51 = vadd.f32 %v3328_v8, %v5133_v6 }
0x3ad3   :  { %v3977_v56 = vmul.f32 -1.442695, %v3333_v51 }
0x3ad4   :  { %v3330_v29 = vpop.permute.xlu1 %3329 }
0x3ad5   :  { %4565 = vpow2.f32 %v3977_v56  ;;  %v3334_v15 = vadd.f32 %v3330_v29, %v5129_v63 }
0x3ad7   :  { %v3978_v59 = vmul.f32 -1.442695, %v3334_v15 }
0x3ad8   :  { %v3360_v18 = vpop.permute.xlu1 %3359 }
0x3ad9   :  { %4567 = vpow2.f32 %v3978_v59 }
0x3ae2   :  { %v4566_v9 = vpop.eup %4565 }
0x3ae3   :  { %v3341_v5 = vadd.f32 1.0, %v4566_v9 }
0x3ae5   :  { %4569 = vrcp.f32 %v3341_v5 }
0x3ae6   :  { %v4568_v45 = vpop.eup %4567 }
0x3ae7   :  { %v3342_v25 = vadd.f32 1.0, %v4568_v45 }
0x3ae9   :  { %4571 = vrcp.f32 %v3342_v25 }
0x3af2   :  { %v4570_v57 = vpop.eup %4569 }
0x3af3   :  { %v3363_v28 = vmul.f32 %v4570_v57, %v3358_v12 }
0x3af5   :  { %v3368_v37 = vrot.slane %v3363_v28, 6 }
0x3af6   :  { %v4572_v52 = vpop.eup %4571 }
0x3af7   :  { %v3364_v21 = vmul.f32 %v4572_v52, %v3360_v18 }
0x3af9   :  { %v3369_v61 = vrot.slane %v3364_v21, 5 }
0x3afb   :  { %v3370_v22 = vsel %vm507_vm1, %v3369_v61, %v3368_v37  ;;  %v3567_v61 = vsub.s32 7, %v4977_v23 }
0x3afc   :  { %3371 = vrot.lane.b32.xlu0 %v3370_v22, %s4818_s6 }
0x3b6e   :  { %v3372_v34 = vpop.permute.xlu0 %3371 }
0x3b6f   :  { %4343 = vmatmul.mubr.msk.f32.vlgmr.msra.gmra.mxu0 %vm723_vm4, %v3372_v34 }
0x3b70   :  { %4357 = vmatpush3.msra.mxu0 %v4646_v4  ;;  %4372 = vmatprep.mubr.msk.f32.mxu0 %vm4816_vm3, %v4814_v1 }
0x3b71   :  { %4358 = vmatprep.subr.mxu0 %v4814_v1 }
0x3b72   :  { %4359 = vmatpush3.msra.mxu0 %v4647_v40 }
0x3b73   :  { %4360 = vmatprep.subr.mxu0 %v4814_v1 }
0x3b74   :  { %4361 = vmatpush3.msra.mxu0 %v4648_v33 }
0x3b75   :  { %4362 = vmatprep.subr.mxu0 %v4814_v1 }
0x3b76   :  { %4363 = vmatpush3.msra.mxu0 %v4649_v43 }
0x3b77   :  { %4364 = vmatprep.subr.mxu0 %v4814_v1 }
0x3b78   :  { %4365 = vmatpush3.msra.mxu0 %v4650_v17 }
0x3b79   :  { %4366 = vmatprep.subr.mxu0 %v4814_v1 }
0x3b7a   :  { %4367 = vmatpush3.msra.mxu0 %v4651_v41 }
0x3b7b   :  { %4368 = vmatprep.subr.mxu0 %v4814_v1 }
0x3b7c   :  { %4369 = vmatpush3.msra.mxu0 %v4652_v47 }
0x3b7d   :  { %4370 = vmatprep.subr.mxu0 %v4814_v1 }
0x3b7e   :  { %4371 = vmatpush3.msra.mxu0 %v4653_v27 }
0x3c2f   :  { %v3441_v48 = vpop.f32.mrf.mxu0 }
0x3c30   :  { %v3445_v49 = vadd.f32 %v3441_v48, %v3365_v7 }
0x3c31   :  { %v4344_v44 = vpop.f32.mrf.mxu0 }
0x3c32   :  { %v3980_v8 = vmul.f32 -1.442695, %v3445_v49 }
0x3c34   :  { %4573 = vpow2.f32 %v3980_v8 }
0x3c41   :  { %v4574_v51 = vpop.eup %4573 }
0x3c42   :  { %v3449_v56 = vadd.f32 1.0, %v4574_v51 }
0x3c44   :  { %4575 = vrcp.f32 %v3449_v56 }
0x3c51   :  { %v4576_v29 = vpop.eup %4575 }
0x3c52   :  { %v3452_v15 = vmul.f32 2.0, %v4576_v29  ;;  %v3454_v45 = vmul.f32 %v4576_v29, %v5742_v31 }
0x3c54   :  { %v3981_v59 = vadd.f32 -1.0, %v3452_v15 }
0x3c56   :  { %3456 = vrot.lane.b32.xlu1 %v3981_v59, %s4819_s14 }
0x3cc8   :  { %v3457_v9 = vpop.permute.xlu1 %3456 }
0x3cc9   :  { %v3459_v5 = vmul.f32 %v4576_v29, %v3457_v9 }
0x3ccb   :  { %3461 = vrot.lane.b32.xlu0 %v3459_v5, %s4817_s5 }
0x3d3d   :  { %v3462_v11 = vpop.permute.xlu0 %3461 }
0x3d3e   :  { %v5849_v25 = vadd.f32 %v3462_v11, %v3454_v45 }
0x3d40   :  { %4577 = vtanh.f32 %v5849_v25 }
0x3d4d   :  { %v4578_v57 = vpop.eup %4577 }
0x3d4e   :  { %3467 = vrot.lane.b32.xlu1 %v4578_v57, %s4819_s14 }
0x3dc0   :  { %v3468_v12 = vpop.permute.xlu1 %3467 }
0x3dc1   :  { %v5853_v28 = vmul.f32 %v4576_v29, %v3468_v12 }
0x3dc3   :  { %3483 = vrot.lane.b32.xlu0 %v5853_v28, %s4817_s5 }
0x3e35   :  { %v3484_v52 = vpop.permute.xlu0 %3483 }
0x3e36   :  { %3982 = vmatmul.mubr.msk.f32.vlgmr.msra.gmra.mxu1 %vm150_vm0, %v3484_v52 }
0x3e37   :  { %4346 = vmatpush3.msra.mxu1 %v5751_v46  ;;  %4353 = vmatprep.mubr.msk.f32.mxu1 %vm4816_vm3, %v4814_v1 }
0x3e38   :  { %4347 = vmatprep.subr.mxu1 %v4814_v1 }
0x3e39   :  { %4348 = vmatpush3.msra.mxu1 %v5757_v19 }
0x3e3a   :  { %4349 = vmatprep.subr.mxu1 %v4814_v1 }
0x3e3b   :  { %4350 = vmatpush3.msra.mxu1 %v5761_v16 }
0x3e3c   :  { %4351 = vmatprep.subr.mxu1 %v4814_v1 }
0x3e3d   :  { %4352 = vmatpush3.msra.mxu1 %v5765_v14 }
0x3ef6   :  { %v5867_v31 = vpop.f32.mrf.mxu1 }
0x3ef8   :  { %v3555_v18 = vpop.f32.mrf.mxu1 }
0x3ef9   :  { %v3559_v21 = vrot.slane %v3555_v18, 1  ;;  %v3560_v46 = vrot.slane %v3555_v18, 2 }
0x3efb   :  { %v3563_v37 = vadd.f32 %v3559_v21, %v4998_v38  ;;  %v3564_v22 = vadd.f32 %v4995_v36, %v3560_v46 }
0x3efd   :  { %v3568_v19 = vrot.slane %v3563_v37, %v3567_v61  ;;  %v3572_v34 = vrot.slane %v3564_v22, %v3567_v61 }
0x3eff   :  { %v3573_v4 = vadd.f32 %v3568_v19, %v5004_v42  ;;  %v3574_v16 = vadd.f32 %v3572_v34, %v5000_v39 }
0x3f01   :  { %4579 = vtanh.f32 %v3573_v4 }
0x3f02   :  { %4581 = vtanh.f32 %v3574_v16 }
0x3f0e   :  { %v4580_v1 = vpop.eup %4579 }
0x3f0f   :  { %v4582_v14 = vpop.eup %4581  ;;  %v3577_v40 = vmul.f32 %v5778_v53, %v4580_v1 }
0x3f10   :  { %v3578_v33 = vmul.f32 %v5778_v53, %v4582_v14 }
0x3f11   :  { %v3579_v43 = vsel %vm150_vm0, %v3577_v40, 0.0 }
0x3f12   :  { %v3582_v38 = vsel %vm150_vm0, %v3578_v33, 0.0  ;;  %3580 = vadd.xlane.f32.xlu1 %v3579_v43 }
0x3f13   :  { %3583 = vadd.xlane.f32.xlu0 %v3582_v38 }
0x3f9b   :  { %v3581_v36 = vpop.xlane.xlu1 %3580 }
0x3f9c   :  { %v3584_v17 = vpop.xlane.xlu0 %3583  ;;  %v3585_v42 = vadd.f32 %v3581_v36, %v5018_v54 }
0x3f9d   :  { %v3586_v39 = vadd.f32 %v3584_v17, %v5018_v54 }
0x3f9e   :  { %v3587_v41 = vmul.f32 %v3585_v42, %v5020_v55 }
0x3f9f   :  { %v3588_v47 = vmul.f32 %v3586_v39, %v5024_v60 }
0x3fa0   :  { %3592 = vperm.xlu0 %4395, %v3587_v41  }
0x3fa1   :  { %3595 = vperm.xlu1 %4396, %v3588_v47  }
0x401b   :  { %v3593_v27 = vpop.permute.xlu0 %3592 }
0x401c   :  { %v3600_v53 = vrot.slane %v3593_v27, %v5029_v0  ;;  %v3596_v7 = vpop.permute.xlu1 %3595 }
0x401d   :  { %v3604_v48 = vrot.slane %v3596_v7, %v5029_v0 }
0x401f   :  { %v3605_v49 = vsel %vm507_vm1, %v3604_v48, %v3600_v53 }
0x4020   :  { %v3607_v44 = vsel %vm510_vm2, %v3605_v49, -inf }
0x4021   :  { %3608 = vmax.xlane.f32.xlu1 %v3607_v44 }
0x40aa   :  { %v3609_v8 = vpop.xlane.xlu1 %3608 }
0x40ab   :  { %v3614_v54 = vrot.slane %v3609_v8, %v4980_v24  ;;  %v3618_v51 = vrot.slane %v3609_v8, %v4986_v26 }
0x40ad   :  { %v3621_v56 = vsub.f32 %v3587_v41, %v3614_v54  ;;  %v3622_v29 = vsub.f32 %v3588_v47, %v3618_v51 }
0x40af   :  { %v3623_v15 = vmul.f32 1.442695, %v3621_v56  ;;  %v3625_v59 = vmul.f32 1.442695, %v3622_v29 }
0x40b1   :  { %4583 = vpow2.f32 %v3623_v15 }
0x40b2   :  { %4585 = vpow2.f32 %v3625_v59 }
0x40be   :  { %v4584_v9 = vpop.eup %4583 }
0x40bf   :  { %v3627_v5 = vmul.f32 %v4584_v9, %v5020_v55  ;;  %v4586_v45 = vpop.eup %4585 }
0x40c0   :  { %v3628_v11 = vmul.f32 %v4586_v45, %v5024_v60 }
0x40c1   :  { %3632 = vperm.xlu0 %4395, %v3627_v5  }
0x40c5   :  { %3635 = vperm.xlu0 %4395, %v3628_v11  }
0x413c   :  { %v3633_v57 = vpop.permute.xlu0 %3632 }
0x413d   :  { %v3640_v52 = vrot.slane %v3633_v57, %v5029_v0 }
0x4140   :  { %v3636_v12 = vpop.permute.xlu0 %3635 }
0x4141   :  { %v3644_v18 = vrot.slane %v3636_v12, %v5029_v0 }
0x4143   :  { %v3645_v21 = vsel %vm507_vm1, %v3644_v18, %v3640_v52 }
0x4144   :  { %v3647_v46 = vsel %vm510_vm2, %v3645_v21, 0.0 }
0x4145   :  { %3648 = vadd.xlane.f32.xlu0 %v3647_v46 }
0x41ce   :  { %v3649_v61 = vpop.xlane.xlu0 %3648 }
0x41cf   :  { %v3650_v37 = vadd.f32 1e-06, %v3649_v61 }
0x41d1   :  { %v3655_v55 = vrot.slane %v3650_v37, %v4980_v24  ;;  %v3659_v22 = vrot.slane %v3650_v37, %v4986_v26 }
0x41d3   :  { %4587 = vrcp.f32 %v3655_v55 }
0x41d4   :  { %4589 = vrcp.f32 %v3659_v22  ;;  %v3811_v22 = vadd.f32 %v5842_v62, %v5867_v31 }
0x41e0   :  { %v4588_v60 = vpop.eup %4587 }
0x41e1   :  { %v4590_v19 = vpop.eup %4589  ;;  %v3663_v34 = vmul.f32 %v4588_v60, %v3627_v5 }
0x41e2   :  { %v3665_v4 = vmul.f32 %v4590_v19, %v3628_v11 }
0x41e3   :  { %3668 = vperm.xlu1 %4396, %v3663_v34  }
0x41e4   :  { %3673 = vperm.xlu0 %4395, %v3665_v4  }
0x425e   :  { %v3669_v0 = vpop.permute.xlu1 %3668 }
0x425f   :  { %v3674_v16 = vpop.permute.xlu0 %3673  ;;  %v3676_v1 = vmul.f32 %v5669_v32, %v3669_v0 }
0x4260   :  { %v3677_v14 = vmul.f32 %v5672_v58, %v3674_v16 }
0x4261   :  { %v3678_v40 = vsel %vm150_vm0, %v3676_v1, 0.0  ;;  %v4820_v1 = vmov 1983009808  }
0x4262   :  { %v3685_v24 = vsel %vm150_vm0, %v3677_v14, 0.0  ;;  %v3679_v33 = vrot.slane %v3678_v40, 4  ;;  %v824_v14 = vunpack.c.l.s4 %v4820_v1 }
0x4263   :  { %v3686_v26 = vrot.slane %v3685_v24, 4 }
0x4264   :  { %v3680_v43 = vadd.f32 %v3679_v33, %v3678_v40  ;;  %v825_v40 = vunpack.c.0.s8 %v824_v14 }
0x4265   :  { %v3687_v38 = vadd.f32 %v3686_v26, %v3685_v24 }
0x4266   :  { %v3681_v36 = vrot.slane %v3680_v43, 2  ;;  %v828_v26 = vsub.s32 %v825_v40, %v4977_v23 }
0x4267   :  { %v3688_v17 = vrot.slane %v3687_v38, 2 }
0x4268   :  { %v3682_v42 = vadd.f32 %v3681_v36, %v3680_v43  ;;  %v829_v62 = vrot.slane %v5170_v30, %v828_v26  ;;  %v1270_v31 = vrot.slane %v5270_v3, %v828_v26  ;;  %v3035_v30 = vrot.slane %v5746_v2, %v828_v26 }
0x4269   :  { %v3689_v39 = vadd.f32 %v3688_v17, %v3687_v38  ;;  %v1714_v3 = vrot.slane %v5391_v13, %v828_v26 }
0x426a   :  { %v3683_v41 = vrot.slane %v3682_v42, 1 }
0x426b   :  { %v3690_v47 = vrot.slane %v3689_v39, 1 }
0x426c   :  { %v3684_v27 = vadd.f32 %v3683_v41, %v3682_v42  ;;  %v2592_v42 = vrot.slane %v5625_v10, %v828_v26 }
0x426d   :  { %v3691_v53 = vadd.f32 %v3690_v47, %v3689_v39 }
0x426f   :  { %3794 = vrot.lane.b32.xlu1 %v3691_v53, %s4817_s5  ;;  %v3694_v32 = vsel %vm507_vm1, %v3691_v53, %v3684_v27 }
0x4270   :  { %4354 = vmatmul.mubr.msk.f32.vlgmr.msra.gmra.mxu1 %vm150_vm0, %v3694_v32 }
0x4273   :  { %3792 = vrot.lane.b32.xlu1 %v3684_v27, %s4817_s5  ;;  %v3478_v27 = vrot.slane %v5853_v28, %v828_v26 }
0x42e1   :  { %v3795_v58 = vpop.permute.xlu1 %3794 }
0x42e2   :  { %v3799_v44 = vsel %vm150_vm0, %v5086_v35, %v3795_v58 }
0x42e3   :  { %v3802_v51 = vrot.slane %v3799_v44, 1 }
0x42e5   :  { %v3793_v54 = vpop.permute.xlu1 %3792 }
0x42e6   :  { %v3798_v56 = vsel %vm150_vm0, %v5704_v20, %v3793_v54 }
0x4330   :  { %v3763_v7 = vpop.f32.mrf.mxu1 }
0x4331   :  { %v3768_v48 = vrot.slane %v3763_v7, 1  ;;  %v3769_v49 = vrot.slane %v3763_v7, 2 }
0x4332   :  { %v4355_v8 = vpop.f32.mrf.mxu1 }
0x4333   :  { %3772 = vrot.lane.b32.xlu0 %v3769_v49, %s4817_s5  ;;  %3770 = vrot.lane.b32.xlu1 %v3768_v48, %s4817_s5 }
0x4337   :  { %3805 = vrot.lane.b32.xlu0 %v3802_v51, %s4817_s5  ;;  %3803 = vrot.lane.b32.xlu1 %v3798_v56, %s4817_s5 }
0x43a5   :  { %v3773_v29 = vpop.permute.xlu0 %3772  ;;  %v3771_v15 = vpop.permute.xlu1 %3770 }
0x43a6   :  { %v3777_v59 = vadd.f32 %v3773_v29, %v5129_v63  ;;  %v3776_v35 = vadd.f32 %v3771_v15, %v5133_v6 }
0x43a8   :  { %v3985_v9 = vmul.f32 -1.442695, %v3777_v59  ;;  %v3984_v5 = vmul.f32 -1.442695, %v3776_v35 }
0x43a9   :  { %v3806_v52 = vpop.permute.xlu0 %3805  ;;  %v3804_v46 = vpop.permute.xlu1 %3803 }
0x43aa   :  { %4591 = vpow2.f32 %v3985_v9 }
0x43ab   :  { %4593 = vpow2.f32 %v3984_v5 }
0x43b7   :  { %v4592_v45 = vpop.eup %4591 }
0x43b8   :  { %v4594_v11 = vpop.eup %4593  ;;  %v3785_v57 = vadd.f32 1.0, %v4592_v45 }
0x43b9   :  { %v3784_v12 = vadd.f32 1.0, %v4594_v11 }
0x43ba   :  { %4595 = vrcp.f32 %v3785_v57 }
0x43bb   :  { %4597 = vrcp.f32 %v3784_v12 }
0x43c7   :  { %v4596_v20 = vpop.eup %4595 }
0x43c8   :  { %v4598_v18 = vpop.eup %4597  ;;  %v3810_v21 = vmul.f32 %v4596_v20, %v3806_v52 }
0x43c9   :  { %v3809_v61 = vmul.f32 %v4598_v18, %v3804_v46 }
0x43ca   :  { %v3815_v37 = vrot.slane %v3810_v21, 6 }
0x43cb   :  { %v3814_v63 = vrot.slane %v3809_v61, 7 }
0x43cd   :  { %v3816_v6 = vsel %vm507_vm1, %v3815_v37, %v3814_v63 }
0x43ce   :  { %3817 = vrot.lane.b32.xlu1 %v3816_v6, %s4818_s6 }
0x4440   :  { %v3818_v55 = vpop.permute.xlu1 %3817 }
0x4441   :  { %4373 = vmatmul.mubr.msk.f32.vlgmr.msra.gmra.mxu0 %vm723_vm4, %v3818_v55 }
0x4501   :  { %v3887_v60 = vpop.f32.mrf.mxu0 }
0x4502   :  { %v3891_v19 = vadd.f32 %v3887_v60, %v3811_v22 }
0x4503   :  { %v4374_v34 = vpop.f32.mrf.mxu0 }
0x4504   :  { %v3987_v4 = vmul.f32 -1.442695, %v3891_v19 }
0x4506   :  { %4599 = vpow2.f32 %v3987_v4 }
0x4513   :  { %v4600_v0 = vpop.eup %4599 }
0x4514   :  { %v3895_v16 = vadd.f32 1.0, %v4600_v0 }
0x4516   :  { %4601 = vrcp.f32 %v3895_v16 }
0x4523   :  { %v4602_v24 = vpop.eup %4601 }
0x4524   :  { %v3898_v33 = vmul.f32 2.0, %v4602_v24  ;;  %v3900_v10 = vmul.f32 %v4602_v24, %v5849_v25 }
0x4526   :  { %v3988_v43 = vadd.f32 -1.0, %v3898_v33 }
0x4528   :  { %3902 = vrot.lane.b32.xlu0 %v3988_v43, %s4819_s14 }
0x452c   :  { %830 = vrot.lane.b32.xlu0 %v829_v62, %s4817_s5 }
0x4530   :  { %1271 = vrot.lane.b32.xlu0 %v1270_v31, %s4819_s14 }
0x459a   :  { %v3903_v38 = vpop.permute.xlu0 %3902 }
0x459b   :  { %v3905_v36 = vmul.f32 %v4602_v24, %v3903_v38 }
0x459d   :  { %3907 = vrot.lane.b32.xlu1 %v3905_v36, %s4817_s5 }
0x459e   :  { %v831_v17 = vpop.permute.xlu0 %830 }
0x459f   :  { %834 = vst.msk [vmem:[%s5976_s13] sm:$0x3] %vm833_vm11, %v831_v17 }
0x45a1   :  { %2593 = vrot.lane.b32.xlu1 %v2592_v42, %s4817_s5 }
0x45a2   :  { %v1272_v23 = vpop.permute.xlu0 %1271 }
0x45a3   :  { %1275 = vst.msk [vmem:[%s5976_s13] sm:$0x3] %vm1274_vm12, %v1272_v23 }
0x45a5   :  { %3036 = vrot.lane.b32.xlu1 %v3035_v30, %s4819_s14 }
0x45a9   :  { %1715 = vrot.lane.b32.xlu1 %v1714_v3, %s4818_s6 }
0x460f   :  { %v3908_v39 = vpop.permute.xlu1 %3907 }
0x4610   :  { %v3910_v41 = vadd.f32 %v3908_v39, %v3900_v10 }
0x4612   :  { %4603 = vtanh.f32 %v3910_v41 }
0x4613   :  { %v2594_v47 = vpop.permute.xlu1 %2593 }
0x4614   :  { %2596 = vst.msk [vmem:[%s5976_s13 + $0x2] sm:$0x3] %vm833_vm11, %v2594_v47 }
0x4617   :  { %v3037_v2 = vpop.permute.xlu1 %3036 }
0x4618   :  { %3039 = vst.msk [vmem:[%s5976_s13 + $0x2] sm:$0x3] %vm1274_vm12, %v3037_v2 }
0x461b   :  { %v1716_v13 = vpop.permute.xlu1 %1715 }
0x461c   :  { %1719 = vst.msk [vmem:[%s5976_s13] sm:$0x3] %vm1718_vm13, %v1716_v13 }
0x461d   :  { %2152 = vst.msk [vmem:[%s5976_s13] sm:$0x3] %vm2151_vm14, %v5526_v50 }
0x461f   :  { %v4604_v25 = vpop.eup %4603 }
0x4620   :  { %3913 = vrot.lane.b32.xlu0 %v4604_v25, %s4819_s14 }
0x4624   :  { %3479 = vrot.lane.b32.xlu0 %v3478_v27, %s4818_s6 }
0x4692   :  { %v3914_v53 = vpop.permute.xlu0 %3913 }
0x4693   :  { %v3916_v32 = vmul.f32 %v4602_v24, %v3914_v53 }
0x4696   :  { %v3480_v58 = vpop.permute.xlu0 %3479 }
0x4697   :  { %3482 = vst.msk [vmem:[%s5976_s13 + $0x2] sm:$0x3] %vm1718_vm13, %v3480_v58 }
0x4698   :  { %3917 = vst.msk [vmem:[%s5976_s13 + $0x2] sm:$0x3] %vm2151_vm14, %v3916_v32 }
0x4699   :  { %3922 = vsyncpa [#allocation4], 1 }
0x469a   :  { %3923 = vsyncpa [#allocation6], 1 }
0x469b   :  { %3924 = vsyncpa [#allocation9], 1 }
0x469c   :  { %3925 = vsyncpa [#allocation12], 1 }

</bundles_post_ra>
